<compile_context>
chip_gen: v7x
topology: tpu7x:2x2x1
jax: 0.10.0
libtpu: 0.0.40
codegen_flags: <defaults>
</compile_context>

<pallas_src>
import jax
import jax.numpy as jnp
from jax.experimental import pallas as pl
from jax.experimental.pallas import tpu as pltpu


def _flash_sdpa_kernel(q_ref, k_ref, sf_ref, v_ref, o_ref, m_sc, l_sc, acc_sc):
    """One (batch-block, q-tile) program, iterated over k-tiles (grid axis 2)."""
    ki = pl.program_id(2)

    @pl.when(ki == 0)
    def _init():
        m_sc[...] = jnp.full_like(m_sc, -jnp.inf)
        l_sc[...] = jnp.zeros_like(l_sc)
        acc_sc[...] = jnp.zeros_like(acc_sc)

    q = q_ref[...]          # (Bb, TQ, D)
    k = k_ref[...]          # (Bb, TK, D)
    v = v_ref[...]          # (Bb, TK, Dv)
    sf = sf_ref[...]        # (Bb, TQ, TK)

    # qk = q @ k^T without materializing a transpose: batched dot_general
    # contracting the last dims, f32 accumulation on the MXU.
    s = jnp.einsum("bqd,bkd->bqk", q, k, preferred_element_type=jnp.float32)
    s = s * sf.astype(jnp.float32)                      # elementwise scale (VPU)

    # Online (flash) softmax update.
    m_prev = m_sc[...]
    m_new = jnp.maximum(m_prev, s.max(axis=-1, keepdims=True))
    alpha = jnp.exp(m_prev - m_new)                     # rescale of carried state
    p = jnp.exp(s - m_new)                              # (Bb, TQ, TK)

    l_sc[...] = alpha * l_sc[...] + p.sum(axis=-1, keepdims=True)
    # Feed the MXU in the value dtype (bf16 stays bf16), accumulate in f32.
    acc_sc[...] = alpha * acc_sc[...] + jnp.einsum(
        "bqk,bkd->bqd", p.astype(v.dtype), v, preferred_element_type=jnp.float32)
    m_sc[...] = m_new

    # dropout_p == 0.0 -> identity.
    # TODO(synk): nonzero dropout_p would need pltpu.prng_seed/prng_random_bits masking.

    @pl.when(ki == pl.num_programs(2) - 1)
    def _finalize():
        inv_l = pl.reciprocal(l_sc[...], approx=True)   # EUP slot, ~free
        o_ref[...] = (acc_sc[...] * inv_l).astype(o_ref.dtype)


def _pick_tile(extent, preferred, align):
    """Largest multiple of `align` <= preferred dividing `extent`; else full extent.

    The full extent is always a legal Pallas block, so ragged sizes fall back to
    an untiled axis (no padding -> no masking needed for the softmax).
    """
    if extent <= preferred:
        return extent
    t = (preferred // align) * align
    while t >= align:
        if extent % t == 0:
            return t
        t -= align
    return extent


def sdpa_pallas(query, key, value, scale_factor, dropout_p=0.0):
    assert dropout_p == 0.0, "only dropout_p=0.0 supported"
    B, Lq, D = query.shape
    Bk, Lk, Dk = key.shape
    Bv, Lkv, Dv = value.shape
    assert Bk == B and Bv == B and Dk == D and Lkv == Lk
    assert scale_factor.shape == (B, Lq, Lk)

    # ---- tile selection -------------------------------------------------
    # TQ: multiple of 8 (sublane axis of q / sf tiles);
    # TK: multiple of 128 (lane axis of the sf tile, sublane axis of k / v).
    TQ = _pick_tile(Lq, 256, 8)
    TK = _pick_tile(Lk, 256, 128)
    nq = Lq // TQ
    nk = Lk // TK

    isz = lambda a: a.dtype.itemsize
    per_batch_tile_bytes = (
        TQ * D * isz(query) + TK * D * isz(key) + TQ * TK * isz(scale_factor)
        + TK * Dv * isz(value) + TQ * Dv * isz(query))

    # Tiny problems: fold the whole batch into one grid step (avoid paying
    # ~0.35us per-step overhead per batch element).
    B_blk = 1
    if nq == 1 and nk == 1 and B * per_batch_tile_bytes * 2 <= (16 << 20):
        B_blk = B
    nb = B // B_blk

    tile_bytes = B_blk * per_batch_tile_bytes
    scratch_bytes = B_blk * TQ * (Dv + 2) * 4
    # Double-buffered tiles + persistent scratch; cap below v7x's 64 MiB VMEM.
    vmem_limit = int(min(max(2 * tile_bytes + scratch_bytes + (8 << 20),
                             32 << 20), 48 << 20))

    out = pl.pallas_call(
        _flash_sdpa_kernel,
        out_shape=jax.ShapeDtypeStruct((B, Lq, Dv), query.dtype),
        grid_spec=pltpu.PrefetchScalarGridSpec(
            num_scalar_prefetch=0,
            grid=(nb, nq, nk),
            in_specs=[
                pl.BlockSpec((B_blk, TQ, D), lambda b, qi, ki: (b, qi, 0)),
                # K/V maps ignore qi -> Pallas skips re-DMA across Lq tiles.
                pl.BlockSpec((B_blk, TK, D), lambda b, qi, ki: (b, ki, 0)),
                pl.BlockSpec((B_blk, TQ, TK), lambda b, qi, ki: (b, qi, ki)),
                pl.BlockSpec((B_blk, TK, Dv), lambda b, qi, ki: (b, ki, 0)),
            ],
            out_specs=pl.BlockSpec((B_blk, TQ, Dv), lambda b, qi, ki: (b, qi, 0)),
            scratch_shapes=[
                pltpu.VMEM((B_blk, TQ, 1), jnp.float32),   # running max m
                pltpu.VMEM((B_blk, TQ, 1), jnp.float32),   # running denom l
                pltpu.VMEM((B_blk, TQ, Dv), jnp.float32),  # output accumulator
            ],
        ),
        compiler_params=pltpu.CompilerParams(
            dimension_semantics=("parallel", "parallel", "arbitrary"),
            vmem_limit_bytes=vmem_limit,
        ),
    )(query, key, scale_factor, value)
    return out


def sdpa_ref(query, key, value, scale_factor):
    qk = jnp.matmul(query, jnp.swapaxes(key, -2, -1))
    scaled = qk * scale_factor
    p = jax.nn.softmax(scaled, axis=-1)
    return jnp.matmul(p, value)


if __name__ == "__main__":
    rng = jax.random.PRNGKey(0)

    # Case 1: shapes implied by the PyTorch module (made mutually consistent):
    #   query (1,350,100), key (1,200,100), scale_factor (1,350,200), value (1,200,200)
    #   -> untiled / collapsed-grid path.
    # Case 2: aligned shapes that exercise the tiled online-softmax path
    #   (grid = (2, 2, 2), TQ = TK = 256); scale_factor shrunk by 1/sqrt(D) to
    #   keep the softmax well conditioned for the numerical comparison.
    cases = [
        dict(B=1, Lq=350, Lk=200, D=100, Dv=200, sf_scale=1.0),
        dict(B=2, Lq=512, Lk=512, D=64, Dv=128, sf_scale=0.125),
    ]
    for c in cases:
        B, Lq, Lk, D, Dv = c["B"], c["Lq"], c["Lk"], c["D"], c["Dv"]
        k0, k1, k2, k3, rng = jax.random.split(rng, 5)
        query = jax.random.normal(k0, (B, Lq, D), dtype=jnp.float32)
        key = jax.random.normal(k1, (B, Lk, D), dtype=jnp.float32)
        value = jax.random.normal(k2, (B, Lk, Dv), dtype=jnp.float32)
        scale_factor = c["sf_scale"] * jax.random.normal(
            k3, (B, Lq, Lk), dtype=jnp.float32)

        out = jax.block_until_ready(
            sdpa_pallas(query, key, value, scale_factor, dropout_p=0.0))
        ref = sdpa_ref(query, key, value, scale_factor)
        assert out.shape == (B, Lq, Dv)
        # Tolerance covers the approx (EUP) reciprocal, the online-softmax
        # reassociation, and possible MXU pass-count differences vs. XLA.
        assert jnp.allclose(out, ref, atol=1e-2, rtol=1e-2), \
            f"mismatch vs reference for case {c}"

    print("KERNEL_OK")
</pallas_src>

<mosaic_0001>
module attributes {stable_mosaic.version = 11 : i64} {
  func.func @_flash_sdpa_kernel(%arg0: i32, %arg1: i32, %arg2: i32, %arg3: memref<1x350x100xf32, #tpu.memory_space<vmem>>, %arg4: memref<1x200x100xf32, #tpu.memory_space<vmem>>, %arg5: memref<1x350x200xf32, #tpu.memory_space<vmem>>, %arg6: memref<1x200x200xf32, #tpu.memory_space<vmem>>, %arg7: memref<1x350x200xf32, #tpu.memory_space<vmem>>, %arg8: memref<1x350x1xf32, #tpu.memory_space<vmem>>, %arg9: memref<1x350x1xf32, #tpu.memory_space<vmem>>, %arg10: memref<1x350x200xf32, #tpu.memory_space<vmem>>) attributes {dimension_semantics = [#tpu.dimension_semantics<parallel>, #tpu.dimension_semantics<parallel>, #tpu.dimension_semantics<arbitrary>], iteration_bounds = array<i64: 1, 1, 1>, scalar_prefetch = 0 : i64, scratch_operands = 3 : i64, tpu.core_type = #tpu.core_type<tc>, window_params = [{transform_indices = @transform_0, window_bounds = array<i64: 1, 350, 100>}, {transform_indices = @transform_1, window_bounds = array<i64: 1, 200, 100>}, {transform_indices = @transform_2, window_bounds = array<i64: 1, 350, 200>}, {transform_indices = @transform_3, window_bounds = array<i64: 1, 200, 200>}, {transform_indices = @transform_4, window_bounds = array<i64: 1, 350, 200>}]} {
    %c0_i32 = arith.constant 0 : i32
    %0 = arith.cmpi eq, %arg2, %c0_i32 : i32
    %1 = arith.extui %0 : i1 to i32
    %c0_i32_0 = arith.constant 0 : i32
    %2 = arith.cmpi ne, %1, %c0_i32_0 : i32
    scf.if %2 {
      %cst_35 = arith.constant 0xFF800000 : f32
      %34 = vector.broadcast %cst_35 : f32 to vector<1x350x1xf32>
      %c0_36 = arith.constant 0 : index
      %c0_37 = arith.constant 0 : index
      %c0_38 = arith.constant 0 : index
      %35 = vector.load %arg8[%c0_36, %c0_37, %c0_38] : memref<1x350x1xf32, #tpu.memory_space<vmem>>, vector<1x350x1xf32>
      tpu.vector_store %arg8[%c0_36, %c0_37, %c0_38], %34 {strides = array<i32>} : memref<1x350x1xf32, #tpu.memory_space<vmem>>, vector<1x350x1xf32>,
      %cst_39 = arith.constant 0.000000e+00 : f32
      %36 = vector.broadcast %cst_39 : f32 to vector<1x350x1xf32>
      %c0_40 = arith.constant 0 : index
      %c0_41 = arith.constant 0 : index
      %c0_42 = arith.constant 0 : index
      %37 = vector.load %arg9[%c0_40, %c0_41, %c0_42] : memref<1x350x1xf32, #tpu.memory_space<vmem>>, vector<1x350x1xf32>
      tpu.vector_store %arg9[%c0_40, %c0_41, %c0_42], %36 {strides = array<i32>} : memref<1x350x1xf32, #tpu.memory_space<vmem>>, vector<1x350x1xf32>,
      %cst_43 = arith.constant 0.000000e+00 : f32
      %38 = vector.broadcast %cst_43 : f32 to vector<1x350x200xf32>
      %c0_44 = arith.constant 0 : index
      %c0_45 = arith.constant 0 : index
      %c0_46 = arith.constant 0 : index
      %39 = vector.load %arg10[%c0_44, %c0_45, %c0_46] : memref<1x350x200xf32, #tpu.memory_space<vmem>>, vector<1x350x200xf32>
      tpu.vector_store %arg10[%c0_44, %c0_45, %c0_46], %38 {strides = array<i32>} : memref<1x350x200xf32, #tpu.memory_space<vmem>>, vector<1x350x200xf32>,
    } else {
    }
    %c0 = arith.constant 0 : index
    %c0_1 = arith.constant 0 : index
    %c0_2 = arith.constant 0 : index
    %3 = vector.load %arg3[%c0, %c0_1, %c0_2] : memref<1x350x100xf32, #tpu.memory_space<vmem>>, vector<1x350x100xf32>
    %c0_3 = arith.constant 0 : index
    %c0_4 = arith.constant 0 : index
    %c0_5 = arith.constant 0 : index
    %4 = vector.load %arg4[%c0_3, %c0_4, %c0_5] : memref<1x200x100xf32, #tpu.memory_space<vmem>>, vector<1x200x100xf32>
    %c0_6 = arith.constant 0 : index
    %c0_7 = arith.constant 0 : index
    %c0_8 = arith.constant 0 : index
    %5 = vector.load %arg6[%c0_6, %c0_7, %c0_8] : memref<1x200x200xf32, #tpu.memory_space<vmem>>, vector<1x200x200xf32>
    %c0_9 = arith.constant 0 : index
    %c0_10 = arith.constant 0 : index
    %c0_11 = arith.constant 0 : index
    %6 = vector.load %arg5[%c0_9, %c0_10, %c0_11] : memref<1x350x200xf32, #tpu.memory_space<vmem>>, vector<1x350x200xf32>
    "tpu.trace_start"() <{level = 10 : i32, message = "bqd,bkd->bqk"}> : () -> ()
    %cst = arith.constant dense<0.000000e+00> : vector<1x350x200xf32>
    %7 = tpu.matmul %3, %4, %cst {dimension_numbers = #tpu.dot_dimension_numbers<[2], [2], [1], [1], [0, 0, 0, 1, 1, 1], [0], [0]>} : vector<1x350x100xf32>, vector<1x200x100xf32>, vector<1x350x200xf32> -> vector<1x350x200xf32>
    "tpu.trace_stop"() : () -> ()
    %8 = arith.mulf %7, %6 : vector<1x350x200xf32>
    %c0_12 = arith.constant 0 : index
    %c0_13 = arith.constant 0 : index
    %c0_14 = arith.constant 0 : index
    %9 = vector.load %arg8[%c0_12, %c0_13, %c0_14] : memref<1x350x1xf32, #tpu.memory_space<vmem>>, vector<1x350x1xf32>
    %cst_15 = arith.constant dense<0xFF800000> : vector<1x350xf32>
    %10 = vector.multi_reduction <maximumf>, %8, %cst_15 [2] : vector<1x350x200xf32> to vector<1x350xf32>
    %11 = vector.shape_cast %10 : vector<1x350xf32> to vector<1x350x1xf32>
    %12 = arith.maximumf %9, %11 : vector<1x350x1xf32>
    %13 = arith.subf %9, %12 : vector<1x350x1xf32>
    %14 = math.exp %13 : vector<1x350x1xf32>
    %15 = vector.broadcast %12 : vector<1x350x1xf32> to vector<1x350x200xf32>
    %16 = arith.subf %8, %15 : vector<1x350x200xf32>
    %17 = math.exp %16 : vector<1x350x200xf32>
    %c0_16 = arith.constant 0 : index
    %c0_17 = arith.constant 0 : index
    %c0_18 = arith.constant 0 : index
    %18 = vector.load %arg9[%c0_16, %c0_17, %c0_18] : memref<1x350x1xf32, #tpu.memory_space<vmem>>, vector<1x350x1xf32>
    %19 = arith.mulf %14, %18 : vector<1x350x1xf32>
    %cst_19 = arith.constant dense<0.000000e+00> : vector<1x350xf32>
    %20 = vector.multi_reduction <add>, %17, %cst_19 [2] : vector<1x350x200xf32> to vector<1x350xf32>
    %21 = vector.shape_cast %20 : vector<1x350xf32> to vector<1x350x1xf32>
    %22 = arith.addf %19, %21 : vector<1x350x1xf32>
    %c0_20 = arith.constant 0 : index
    %c0_21 = arith.constant 0 : index
    %c0_22 = arith.constant 0 : index
    %23 = vector.load %arg9[%c0_20, %c0_21, %c0_22] : memref<1x350x1xf32, #tpu.memory_space<vmem>>, vector<1x350x1xf32>
    tpu.vector_store %arg9[%c0_20, %c0_21, %c0_22], %22 {strides = array<i32>} : memref<1x350x1xf32, #tpu.memory_space<vmem>>, vector<1x350x1xf32>,
    %c0_23 = arith.constant 0 : index
    %c0_24 = arith.constant 0 : index
    %c0_25 = arith.constant 0 : index
    %24 = vector.load %arg10[%c0_23, %c0_24, %c0_25] : memref<1x350x200xf32, #tpu.memory_space<vmem>>, vector<1x350x200xf32>
    %25 = vector.broadcast %14 : vector<1x350x1xf32> to vector<1x350x200xf32>
    %26 = arith.mulf %25, %24 : vector<1x350x200xf32>
    "tpu.trace_start"() <{level = 10 : i32, message = "bqk,bkd->bqd"}> : () -> ()
    %cst_26 = arith.constant dense<0.000000e+00> : vector<1x350x200xf32>
    %27 = tpu.matmul %17, %5, %cst_26 {dimension_numbers = #tpu.dot_dimension_numbers<[2], [1], [1], [2], [0, 0, 0, 1, 1, 2], [0], [0]>} : vector<1x350x200xf32>, vector<1x200x200xf32>, vector<1x350x200xf32> -> vector<1x350x200xf32>
    "tpu.trace_stop"() : () -> ()
    %28 = arith.addf %26, %27 : vector<1x350x200xf32>
    %c0_27 = arith.constant 0 : index
    %c0_28 = arith.constant 0 : index
    %c0_29 = arith.constant 0 : index
    %29 = vector.load %arg10[%c0_27, %c0_28, %c0_29] : memref<1x350x200xf32, #tpu.memory_space<vmem>>, vector<1x350x200xf32>
    tpu.vector_store %arg10[%c0_27, %c0_28, %c0_29], %28 {strides = array<i32>} : memref<1x350x200xf32, #tpu.memory_space<vmem>>, vector<1x350x200xf32>,
    %c0_30 = arith.constant 0 : index
    %c0_31 = arith.constant 0 : index
    %c0_32 = arith.constant 0 : index
    %30 = vector.load %arg8[%c0_30, %c0_31, %c0_32] : memref<1x350x1xf32, #tpu.memory_space<vmem>>, vector<1x350x1xf32>
    tpu.vector_store %arg8[%c0_30, %c0_31, %c0_32], %12 {strides = array<i32>} : memref<1x350x1xf32, #tpu.memory_space<vmem>>, vector<1x350x1xf32>,
    %c0_i32_33 = arith.constant 0 : i32
    %31 = arith.cmpi eq, %arg2, %c0_i32_33 : i32
    %32 = arith.extui %31 : i1 to i32
    %c0_i32_34 = arith.constant 0 : i32
    %33 = arith.cmpi ne, %32, %c0_i32_34 : i32
    scf.if %33 {
      %c0_35 = arith.constant 0 : index
      %c0_36 = arith.constant 0 : index
      %c0_37 = arith.constant 0 : index
      %34 = vector.load %arg9[%c0_35, %c0_36, %c0_37] : memref<1x350x1xf32, #tpu.memory_space<vmem>>, vector<1x350x1xf32>
      %35 = tpu.reciprocal %34 {approx = true} : vector<1x350x1xf32> -> vector<1x350x1xf32>
      %c0_38 = arith.constant 0 : index
      %c0_39 = arith.constant 0 : index
      %c0_40 = arith.constant 0 : index
      %36 = vector.load %arg10[%c0_38, %c0_39, %c0_40] : memref<1x350x200xf32, #tpu.memory_space<vmem>>, vector<1x350x200xf32>
      %37 = vector.broadcast %35 : vector<1x350x1xf32> to vector<1x350x200xf32>
      %38 = arith.mulf %36, %37 : vector<1x350x200xf32>
      %c0_41 = arith.constant 0 : index
      %c0_42 = arith.constant 0 : index
      %c0_43 = arith.constant 0 : index
      %39 = vector.load %arg7[%c0_41, %c0_42, %c0_43] : memref<1x350x200xf32, #tpu.memory_space<vmem>>, vector<1x350x200xf32>
      tpu.vector_store %arg7[%c0_41, %c0_42, %c0_43], %38 {strides = array<i32>} : memref<1x350x200xf32, #tpu.memory_space<vmem>>, vector<1x350x200xf32>,
    } else {
    }
    return
  }
  func.func @transform_0(%arg0: i32, %arg1: i32, %arg2: i32) -> (i32, i32, i32) {
    %c0_i32 = arith.constant 0 : i32
    %c0_i32_0 = arith.constant 0 : i32
    return %arg0, %arg1, %c0_i32 : i32, i32, i32
  }
  func.func @transform_1(%arg0: i32, %arg1: i32, %arg2: i32) -> (i32, i32, i32) {
    %c0_i32 = arith.constant 0 : i32
    %c0_i32_0 = arith.constant 0 : i32
    return %arg0, %arg2, %c0_i32 : i32, i32, i32
  }
  func.func @transform_2(%arg0: i32, %arg1: i32, %arg2: i32) -> (i32, i32, i32) {
    %c0_i32 = arith.constant 0 : i32
    return %arg0, %arg1, %arg2 : i32, i32, i32
  }
  func.func @transform_3(%arg0: i32, %arg1: i32, %arg2: i32) -> (i32, i32, i32) {
    %c0_i32 = arith.constant 0 : i32
    %c0_i32_0 = arith.constant 0 : i32
    return %arg0, %arg2, %c0_i32 : i32, i32, i32
  }
  func.func @transform_4(%arg0: i32, %arg1: i32, %arg2: i32) -> (i32, i32, i32) {
    %c0_i32 = arith.constant 0 : i32
    %c0_i32_0 = arith.constant 0 : i32
    return %arg0, %arg1, %c0_i32 : i32, i32, i32
  }
}

</mosaic_0001>

<bundles_post_ra>
// kernel: tpu_custom_call.1
= control target key start
LH: loop header
LB: loop body
LE: loop exit
PB: predicated region body
PF: predicated region fallthrough
CT: control target
= control target key end

     0   :  { %vm408_vm0 = vcmask 818176   ;;  %v4496_v0 = vmov 0.0|0.0   ;;  %v7576_v4 = vmov 0.0   ;;  %vm112_vm2 = vcmask 588800   ;;  %s7570_s1 = inlined_call_operand.vmem [shape: f32[1,200,100], index: 1, kind: input, shape index: {}]   ;;  %s7571_s0 = inlined_call_operand.vmem [shape: f32[1,350,100], index: 0, kind: input, shape index: {}]   ;;  %s7572_s2 = inlined_call_operand.vmem [shape: f32[1,350,200], index: 2, kind: input, shape index: {}]   ;;  %s7573_s3 = inlined_call_operand.vmem [shape: f32[1,200,200], index: 3, kind: input, shape index: {}]   ;;  %s7574_s4 = inlined_call_operand.vmem [shape: f32[1,350,200], index: 4, kind: output, shape index: {}]  }
   0x1   :  { %4041 = vmatprep.subr.bf16.mxu0 %v4496_v0  ;;  %v245_v1 = vld [vmem:[%s7570_s1] sm:$0xff]  ;;  %v246_v2 = vld [vmem:[%s7570_s1 + $0x8] sm:$0xff]  ;;  %vm4533_vm1 = vmpackc.low %vm408_vm0, %vm408_vm0  ;;  %198 = vst [vmem:[#allocation4 + $0x2b0] sm:$0x3f] %v7576_v4  ;;  %680 = vmatprep.mubr.f32.mxu0 %v7576_v4  ;;  %vm21_vm3 = vcmask 7168   ;;  %vm199_vm4 = vcmask 586752  }
   0x2   :  { %v4042_v5 = vpack.c.bf16 %v246_v2, %v245_v1  ;;  %v247_v6 = vld [vmem:[%s7570_s1 + $0x10] sm:$0xff]  ;;  %v248_v7 = vld [vmem:[%s7570_s1 + $0x18] sm:$0xff]  ;;  %v249_v9 = vld [vmem:[%s7570_s1 + $0x20] sm:$0xff]  ;;  %113 = vst.msk [vmem:[#allocation4 + $0x8] sm:$0xff] %vm112_vm2, %v7576_v4  ;;  %vm1250_vm5 = vcmask 1045504   ;;  %vm65_vm6 = vcmask 5120  }
   0x3   :  { %v4046_v8 = vpack.c.bf16 %v248_v7, %v247_v6  ;;  %v250_v10 = vld [vmem:[%s7570_s1 + $0x28] sm:$0xff]  ;;  %v251_v12 = vld [vmem:[%s7570_s1 + $0x30] sm:$0xff]  ;;  %v252_v13 = vld [vmem:[%s7570_s1 + $0x38] sm:$0xff]  ;;  %115 = vst.msk [vmem:[#allocation4 + $0x18] sm:$0xff] %vm112_vm2, %v7576_v4 }
   0x4   :  { %4044 = vmatpush1.bf16.xpose.msk.msra.mxu0 %vm4533_vm1, %v4042_v5  ;;  %v4050_v11 = vpack.c.bf16 %v250_v10, %v249_v9  ;;  %v4054_v14 = vpack.c.bf16 %v252_v13, %v251_v12  ;;  %v253_v15 = vld [vmem:[%s7570_s1 + $0x40] sm:$0xff]  ;;  %v254_v16 = vld [vmem:[%s7570_s1 + $0x48] sm:$0xff]  ;;  %v255_v18 = vld [vmem:[%s7570_s1 + $0x50] sm:$0xff]  ;;  %117 = vst.msk [vmem:[#allocation4 + $0x28] sm:$0xff] %vm112_vm2, %v7576_v4 }
   0x5   :  { %4045 = vmatprep.subr.bf16.mxu0 %v4496_v0  ;;  %v4058_v17 = vpack.c.bf16 %v254_v16, %v253_v15  ;;  %v256_v19 = vld [vmem:[%s7570_s1 + $0x58] sm:$0xff]  ;;  %v257_v21 = vld [vmem:[%s7570_s1 + $0x60] sm:$0xff]  ;;  %v258_v22 = vld [vmem:[%s7570_s1 + $0x68] sm:$0xff]  ;;  %119 = vst.msk [vmem:[#allocation4 + $0x38] sm:$0xff] %vm112_vm2, %v7576_v4 }
   0x6   :  { %v4062_v20 = vpack.c.bf16 %v256_v19, %v255_v18  ;;  %v4066_v23 = vpack.c.bf16 %v258_v22, %v257_v21  ;;  %v259_v24 = vld [vmem:[%s7570_s1 + $0x70] sm:$0xff]  ;;  %v260_v25 = vld [vmem:[%s7570_s1 + $0x78] sm:$0xff]  ;;  %v261_v27 = vld [vmem:[%s7570_s1 + $0x80] sm:$0xff]  ;;  %121 = vst.msk [vmem:[#allocation4 + $0x48] sm:$0xff] %vm112_vm2, %v7576_v4 }
   0x7   :  { %v4070_v26 = vpack.c.bf16 %v260_v25, %v259_v24  ;;  %v262_v28 = vld [vmem:[%s7570_s1 + $0x88] sm:$0xff]  ;;  %v263_v30 = vld [vmem:[%s7570_s1 + $0x90] sm:$0xff]  ;;  %v264_v31 = vld [vmem:[%s7570_s1 + $0x98] sm:$0xff]  ;;  %123 = vst.msk [vmem:[#allocation4 + $0x58] sm:$0xff] %vm112_vm2, %v7576_v4 }
   0x8   :  { %v4074_v29 = vpack.c.bf16 %v262_v28, %v261_v27  ;;  %v4078_v32 = vpack.c.bf16 %v264_v31, %v263_v30  ;;  %v265_v33 = vld [vmem:[%s7570_s1 + $0xa0] sm:$0xff]  ;;  %v266_v34 = vld [vmem:[%s7570_s1 + $0xa8] sm:$0xff]  ;;  %v267_v36 = vld [vmem:[%s7570_s1 + $0xb0] sm:$0xff]  ;;  %125 = vst.msk [vmem:[#allocation4 + $0x68] sm:$0xff] %vm112_vm2, %v7576_v4 }
   0x9   :  { %v4082_v35 = vpack.c.bf16 %v266_v34, %v265_v33  ;;  %v268_v37 = vld [vmem:[%s7570_s1 + $0xb8] sm:$0xff]  ;;  %v269_v39 = vld [vmem:[%s7570_s1 + $0xc0] sm:$0xff]  ;;  %v202_v41 = vld [vmem:[%s7571_s0 + $0x8] sm:$0xff]  ;;  %127 = vst.msk [vmem:[#allocation4 + $0x78] sm:$0xff] %vm112_vm2, %v7576_v4 }
   0xa   :  { %v4086_v38 = vpack.c.bf16 %v268_v37, %v267_v36  ;;  %v201_v40 = vld [vmem:[%s7571_s0] sm:$0xff]  ;;  %v203_v42 = vld [vmem:[%s7571_s0 + $0x10] sm:$0xff]  ;;  %v204_v43 = vld [vmem:[%s7571_s0 + $0x18] sm:$0xff]  ;;  %129 = vst.msk [vmem:[#allocation4 + $0x88] sm:$0xff] %vm112_vm2, %v7576_v4 }
   0xb   :  { %v205_v44 = vld [vmem:[%s7571_s0 + $0x20] sm:$0xff]  ;;  %v206_v45 = vld [vmem:[%s7571_s0 + $0x28] sm:$0xff]  ;;  %v207_v46 = vld [vmem:[%s7571_s0 + $0x30] sm:$0xff]  ;;  %131 = vst.msk [vmem:[#allocation4 + $0x98] sm:$0xff] %vm112_vm2, %v7576_v4 }
   0xc   :  { %4048 = vmatpush1.bf16.xpose.msk.msra.mxu0 %vm4533_vm1, %v4046_v8  ;;  %v208_v47 = vld [vmem:[%s7571_s0 + $0x38] sm:$0xff]  ;;  %v209_v48 = vld [vmem:[%s7571_s0 + $0x40] sm:$0xff]  ;;  %v210_v49 = vld [vmem:[%s7571_s0 + $0x48] sm:$0xff]  ;;  %133 = vst.msk [vmem:[#allocation4 + $0xa8] sm:$0xff] %vm112_vm2, %v7576_v4 }
   0xd   :  { %4049 = vmatprep.subr.bf16.mxu0 %v4496_v0  ;;  %v211_v50 = vld [vmem:[%s7571_s0 + $0x50] sm:$0xff]  ;;  %v212_v51 = vld [vmem:[%s7571_s0 + $0x58] sm:$0xff]  ;;  %v213_v52 = vld [vmem:[%s7571_s0 + $0x60] sm:$0xff]  ;;  %135 = vst.msk [vmem:[#allocation4 + $0xb8] sm:$0xff] %vm112_vm2, %v7576_v4 }
   0xe   :  { %v214_v53 = vld [vmem:[%s7571_s0 + $0x68] sm:$0xff]  ;;  %v215_v54 = vld [vmem:[%s7571_s0 + $0x70] sm:$0xff]  ;;  %v216_v55 = vld [vmem:[%s7571_s0 + $0x78] sm:$0xff]  ;;  %137 = vst.msk [vmem:[#allocation4 + $0xc8] sm:$0xff] %vm112_vm2, %v7576_v4 }
   0xf   :  { %v217_v56 = vld [vmem:[%s7571_s0 + $0x80] sm:$0xff]  ;;  %v218_v57 = vld [vmem:[%s7571_s0 + $0x88] sm:$0xff]  ;;  %v219_v58 = vld [vmem:[%s7571_s0 + $0x90] sm:$0xff]  ;;  %139 = vst.msk [vmem:[#allocation4 + $0xd8] sm:$0xff] %vm112_vm2, %v7576_v4 }
  0x10   :  { %v220_v59 = vld [vmem:[%s7571_s0 + $0x98] sm:$0xff]  ;;  %v221_v60 = vld [vmem:[%s7571_s0 + $0xa0] sm:$0xff]  ;;  %v222_v61 = vld [vmem:[%s7571_s0 + $0xa8] sm:$0xff]  ;;  %141 = vst.msk [vmem:[#allocation4 + $0xe8] sm:$0xff] %vm112_vm2, %v7576_v4 }
  0x11   :  { %v223_v62 = vld [vmem:[%s7571_s0 + $0xb0] sm:$0xff]  ;;  %143 = vst.msk [vmem:[#allocation4 + $0xf8] sm:$0xff] %vm112_vm2, %v7576_v4  ;;  %145 = vst.msk [vmem:[#allocation4 + $0x108] sm:$0xff] %vm112_vm2, %v7576_v4  ;;  %v224_v63 = vld [vmem:[%s7571_s0 + $0xb8] sm:$0xff] }
  0x12   :  { %147 = vst.msk [vmem:[#allocation4 + $0x118] sm:$0xff] %vm112_vm2, %v7576_v4  ;;  %149 = vst.msk [vmem:[#allocation4 + $0x128] sm:$0xff] %vm112_vm2, %v7576_v4  ;;  %v226_v1 = vld [vmem:[%s7571_s0 + $0xc8] sm:$0xff]  ;;  %v227_v2 = vld [vmem:[%s7571_s0 + $0xd0] sm:$0xff] }
  0x13   :  { %151 = vst.msk [vmem:[#allocation4 + $0x138] sm:$0xff] %vm112_vm2, %v7576_v4  ;;  %153 = vst.msk [vmem:[#allocation4 + $0x148] sm:$0xff] %vm112_vm2, %v7576_v4  ;;  %v228_v3 = vld [vmem:[%s7571_s0 + $0xd8] sm:$0xff]  ;;  %v229_v5 = vld [vmem:[%s7571_s0 + $0xe0] sm:$0xff] }
  0x14   :  { %4052 = vmatpush1.bf16.xpose.msk.msra.mxu0 %vm4533_vm1, %v4050_v11  ;;  %155 = vst.msk [vmem:[#allocation4 + $0x158] sm:$0xff] %vm112_vm2, %v7576_v4  ;;  %157 = vst.msk [vmem:[#allocation4 + $0x168] sm:$0xff] %vm112_vm2, %v7576_v4  ;;  %v230_v6 = vld [vmem:[%s7571_s0 + $0xe8] sm:$0xff]  ;;  %v231_v7 = vld [vmem:[%s7571_s0 + $0xf0] sm:$0xff] }
  0x15   :  { %4053 = vmatprep.subr.bf16.mxu0 %v4496_v0  ;;  %159 = vst.msk [vmem:[#allocation4 + $0x178] sm:$0xff] %vm112_vm2, %v7576_v4  ;;  %161 = vst.msk [vmem:[#allocation4 + $0x188] sm:$0xff] %vm112_vm2, %v7576_v4  ;;  %v232_v8 = vld [vmem:[%s7571_s0 + $0xf8] sm:$0xff]  ;;  %v233_v9 = vld [vmem:[%s7571_s0 + $0x100] sm:$0xff] }
  0x16   :  { %163 = vst.msk [vmem:[#allocation4 + $0x198] sm:$0xff] %vm112_vm2, %v7576_v4  ;;  %165 = vst.msk [vmem:[#allocation4 + $0x1a8] sm:$0xff] %vm112_vm2, %v7576_v4  ;;  %v234_v10 = vld [vmem:[%s7571_s0 + $0x108] sm:$0xff]  ;;  %v235_v11 = vld [vmem:[%s7571_s0 + $0x110] sm:$0xff] }
  0x17   :  { %167 = vst.msk [vmem:[#allocation4 + $0x1b8] sm:$0xff] %vm112_vm2, %v7576_v4  ;;  %169 = vst.msk [vmem:[#allocation4 + $0x1c8] sm:$0xff] %vm112_vm2, %v7576_v4  ;;  %v236_v12 = vld [vmem:[%s7571_s0 + $0x118] sm:$0xff]  ;;  %v237_v13 = vld [vmem:[%s7571_s0 + $0x120] sm:$0xff] }
  0x18   :  { %171 = vst.msk [vmem:[#allocation4 + $0x1d8] sm:$0xff] %vm112_vm2, %v7576_v4  ;;  %173 = vst.msk [vmem:[#allocation4 + $0x1e8] sm:$0xff] %vm112_vm2, %v7576_v4  ;;  %v239_v15 = vld [vmem:[%s7571_s0 + $0x130] sm:$0xff]  ;;  %v240_v16 = vld [vmem:[%s7571_s0 + $0x138] sm:$0xff] }
  0x19   :  { %175 = vst.msk [vmem:[#allocation4 + $0x1f8] sm:$0xff] %vm112_vm2, %v7576_v4  ;;  %177 = vst.msk [vmem:[#allocation4 + $0x208] sm:$0xff] %vm112_vm2, %v7576_v4  ;;  %v242_v18 = vld [vmem:[%s7571_s0 + $0x148] sm:$0xff]  ;;  %v243_v19 = vld [vmem:[%s7571_s0 + $0x150] sm:$0xff] }
  0x1a   :  { %179 = vst.msk [vmem:[#allocation4 + $0x218] sm:$0xff] %vm112_vm2, %v7576_v4  ;;  %181 = vst.msk [vmem:[#allocation4 + $0x228] sm:$0xff] %vm112_vm2, %v7576_v4  ;;  %v321_v21 = vld [vmem:[%s7572_s2 + $0x8] sm:$0xff]  ;;  %v320_v22 = vld [vmem:[%s7572_s2] sm:$0xff] }
  0x1b   :  { %183 = vst.msk [vmem:[#allocation4 + $0x238] sm:$0xff] %vm112_vm2, %v7576_v4  ;;  %185 = vst.msk [vmem:[#allocation4 + $0x248] sm:$0xff] %vm112_vm2, %v7576_v4  ;;  %v323_v27 = vld [vmem:[%s7572_s2 + $0x18] sm:$0xff]  ;;  %v322_v28 = vld [vmem:[%s7572_s2 + $0x10] sm:$0xff] }
  0x1c   :  { %4056 = vmatpush1.bf16.xpose.msk.msra.mxu0 %vm4533_vm1, %v4054_v14  ;;  %187 = vst.msk [vmem:[#allocation4 + $0x258] sm:$0xff] %vm112_vm2, %v7576_v4  ;;  %189 = vst.msk [vmem:[#allocation4 + $0x268] sm:$0xff] %vm112_vm2, %v7576_v4  ;;  %v238_v14 = vld [vmem:[%s7571_s0 + $0x128] sm:$0xff]  ;;  %v324_v36 = vld [vmem:[%s7572_s2 + $0x20] sm:$0xff] }
  0x1d   :  { %4057 = vmatprep.subr.bf16.mxu0 %v4496_v0  ;;  %191 = vst.msk [vmem:[#allocation4 + $0x278] sm:$0xff] %vm112_vm2, %v7576_v4  ;;  %193 = vst.msk [vmem:[#allocation4 + $0x288] sm:$0xff] %vm112_vm2, %v7576_v4 }
  0x1e   :  { %195 = vst.msk [vmem:[#allocation4 + $0x298] sm:$0xff] %vm112_vm2, %v7576_v4  ;;  %197 = vst.msk [vmem:[#allocation4 + $0x2a8] sm:$0xff] %vm112_vm2, %v7576_v4 }
  0x1f   :  { %67 = vst.msk [vmem:[#allocation3] sm:$0xff] %vm21_vm3, %v7576_v4  ;;  %68 = vst.msk [vmem:[#allocation3 + $0x8] sm:$0xff] %vm21_vm3, %v7576_v4 }
  0x20   :  { %69 = vst.msk [vmem:[#allocation3 + $0x10] sm:$0xff] %vm21_vm3, %v7576_v4  ;;  %70 = vst.msk [vmem:[#allocation3 + $0x18] sm:$0xff] %vm21_vm3, %v7576_v4 }
  0x21   :  { %71 = vst.msk [vmem:[#allocation3 + $0x20] sm:$0xff] %vm21_vm3, %v7576_v4  ;;  %72 = vst.msk [vmem:[#allocation3 + $0x28] sm:$0xff] %vm21_vm3, %v7576_v4 }
  0x22   :  { %73 = vst.msk [vmem:[#allocation3 + $0x30] sm:$0xff] %vm21_vm3, %v7576_v4  ;;  %74 = vst.msk [vmem:[#allocation3 + $0x38] sm:$0xff] %vm21_vm3, %v7576_v4 }
  0x23   :  { %75 = vst.msk [vmem:[#allocation3 + $0x40] sm:$0xff] %vm21_vm3, %v7576_v4  ;;  %76 = vst.msk [vmem:[#allocation3 + $0x48] sm:$0xff] %vm21_vm3, %v7576_v4 }
  0x24   :  { %4060 = vmatpush1.bf16.xpose.msk.msra.mxu0 %vm4533_vm1, %v4058_v17  ;;  %v241_v17 = vld [vmem:[%s7571_s0 + $0x140] sm:$0xff]  ;;  %77 = vst.msk [vmem:[#allocation3 + $0x50] sm:$0xff] %vm21_vm3, %v7576_v4  ;;  %78 = vst.msk [vmem:[#allocation3 + $0x58] sm:$0xff] %vm21_vm3, %v7576_v4 }
  0x25   :  { %4061 = vmatprep.subr.bf16.mxu0 %v4496_v0  ;;  %79 = vst.msk [vmem:[#allocation3 + $0x60] sm:$0xff] %vm21_vm3, %v7576_v4  ;;  %80 = vst.msk [vmem:[#allocation3 + $0x68] sm:$0xff] %vm21_vm3, %v7576_v4 }
  0x26   :  { %81 = vst.msk [vmem:[#allocation3 + $0x70] sm:$0xff] %vm21_vm3, %v7576_v4  ;;  %82 = vst.msk [vmem:[#allocation3 + $0x78] sm:$0xff] %vm21_vm3, %v7576_v4 }
  0x27   :  { %83 = vst.msk [vmem:[#allocation3 + $0x80] sm:$0xff] %vm21_vm3, %v7576_v4  ;;  %84 = vst.msk [vmem:[#allocation3 + $0x88] sm:$0xff] %vm21_vm3, %v7576_v4 }
  0x28   :  { %85 = vst.msk [vmem:[#allocation3 + $0x90] sm:$0xff] %vm21_vm3, %v7576_v4  ;;  %86 = vst.msk [vmem:[#allocation3 + $0x98] sm:$0xff] %vm21_vm3, %v7576_v4 }
  0x29   :  { %87 = vst.msk [vmem:[#allocation3 + $0xa0] sm:$0xff] %vm21_vm3, %v7576_v4  ;;  %88 = vst.msk [vmem:[#allocation3 + $0xa8] sm:$0xff] %vm21_vm3, %v7576_v4 }
  0x2a   :  { %89 = vst.msk [vmem:[#allocation3 + $0xb0] sm:$0xff] %vm21_vm3, %v7576_v4  ;;  %90 = vst.msk [vmem:[#allocation3 + $0xb8] sm:$0xff] %vm21_vm3, %v7576_v4 }
  0x2b   :  { %91 = vst.msk [vmem:[#allocation3 + $0xc0] sm:$0xff] %vm21_vm3, %v7576_v4  ;;  %92 = vst.msk [vmem:[#allocation3 + $0xc8] sm:$0xff] %vm21_vm3, %v7576_v4 }
  0x2c   :  { %4064 = vmatpush1.bf16.xpose.msk.msra.mxu0 %vm4533_vm1, %v4062_v20  ;;  %v244_v20 = vld [vmem:[%s7571_s0 + $0x158] sm:$0x3f]  ;;  %93 = vst.msk [vmem:[#allocation3 + $0xd0] sm:$0xff] %vm21_vm3, %v7576_v4  ;;  %94 = vst.msk [vmem:[#allocation3 + $0xd8] sm:$0xff] %vm21_vm3, %v7576_v4 }
  0x2d   :  { %4065 = vmatprep.subr.bf16.mxu0 %v4496_v0  ;;  %95 = vst.msk [vmem:[#allocation3 + $0xe0] sm:$0xff] %vm21_vm3, %v7576_v4  ;;  %96 = vst.msk [vmem:[#allocation3 + $0xe8] sm:$0xff] %vm21_vm3, %v7576_v4 }
  0x2e   :  { %97 = vst.msk [vmem:[#allocation3 + $0xf0] sm:$0xff] %vm21_vm3, %v7576_v4  ;;  %98 = vst.msk [vmem:[#allocation3 + $0xf8] sm:$0xff] %vm21_vm3, %v7576_v4 }
  0x2f   :  { %99 = vst.msk [vmem:[#allocation3 + $0x100] sm:$0xff] %vm21_vm3, %v7576_v4  ;;  %100 = vst.msk [vmem:[#allocation3 + $0x108] sm:$0xff] %vm21_vm3, %v7576_v4 }
  0x30   :  { %101 = vst.msk [vmem:[#allocation3 + $0x110] sm:$0xff] %vm21_vm3, %v7576_v4  ;;  %102 = vst.msk [vmem:[#allocation3 + $0x118] sm:$0xff] %vm21_vm3, %v7576_v4 }
  0x31   :  { %103 = vst.msk [vmem:[#allocation3 + $0x120] sm:$0xff] %vm21_vm3, %v7576_v4  ;;  %104 = vst.msk [vmem:[#allocation3 + $0x128] sm:$0xff] %vm21_vm3, %v7576_v4 }
  0x32   :  { %105 = vst.msk [vmem:[#allocation3 + $0x130] sm:$0xff] %vm21_vm3, %v7576_v4  ;;  %106 = vst.msk [vmem:[#allocation3 + $0x138] sm:$0xff] %vm21_vm3, %v7576_v4 }
  0x33   :  { %107 = vst.msk [vmem:[#allocation3 + $0x140] sm:$0xff] %vm21_vm3, %v7576_v4  ;;  %108 = vst.msk [vmem:[#allocation3 + $0x148] sm:$0xff] %vm21_vm3, %v7576_v4 }
  0x34   :  { %4068 = vmatpush1.bf16.xpose.msk.msra.mxu0 %vm4533_vm1, %v4066_v23  ;;  %109 = vst.msk [vmem:[#allocation3 + $0x150] sm:$0xff] %vm21_vm3, %v7576_v4 }
  0x35   :  { %4069 = vmatprep.subr.bf16.mxu0 %v4496_v0 }
  0x3c   :  { %4072 = vmatpush1.bf16.xpose.msk.msra.mxu0 %vm4533_vm1, %v4070_v26 }
  0x3d   :  { %4073 = vmatprep.subr.bf16.mxu0 %v4496_v0 }
  0x44   :  { %4076 = vmatpush1.bf16.xpose.msk.msra.mxu0 %vm4533_vm1, %v4074_v29 }
  0x45   :  { %4077 = vmatprep.subr.bf16.mxu0 %v4496_v0 }
  0x4c   :  { %4080 = vmatpush1.bf16.xpose.msk.msra.mxu0 %vm4533_vm1, %v4078_v32 }
  0x4d   :  { %4081 = vmatprep.subr.bf16.mxu0 %v4496_v0 }
  0x54   :  { %4084 = vmatpush1.bf16.xpose.msk.msra.mxu0 %vm4533_vm1, %v4082_v35  ;;  %v325_v35 = vld [vmem:[%s7572_s2 + $0x28] sm:$0xff] }
  0x55   :  { %4085 = vmatprep.subr.bf16.mxu0 %v4496_v0  ;;  %v225_v0 = vld [vmem:[%s7571_s0 + $0xc0] sm:$0xff] }
  0x5c   :  { %4088 = vmatpush1.bf16.xpose.msk.msra.mxu0 %vm4533_vm1, %v4086_v38 }
  0x5d   :  { %664 = vmatprep.subr.mxu0 %v7576_v4 }
  0x64   :  { %3952 = vmatpush1.xpose.msk.msra.mxu0 %vm408_vm0, %v269_v39 }
  0x67   :  { %3953 = vmatmul.mubr.msk.f32.vlgmr.msra.gmra.mrb[0].mxu0 %vm408_vm0, %v201_v40 }
  0x68   :  { %686 = vmatprep.mubr.f32.mxu0 %v7576_v4 }
  0x6b   :  { %3954 = vmatmul.mubr.msk.f32.gmra.mrb[2].mxu0 %vm408_vm0, %v202_v41 }
  0x6c   :  { %692 = vmatprep.mubr.f32.mxu0 %v7576_v4 }
  0x6f   :  { %3955 = vmatmul.mubr.msk.f32.gmra.mrb[4].mxu0 %vm408_vm0, %v203_v42 }
  0x70   :  { %698 = vmatprep.mubr.f32.mxu0 %v7576_v4 }
  0x73   :  { %3956 = vmatmul.mubr.msk.f32.gmra.mrb[6].mxu0 %vm408_vm0, %v204_v43  ;;  %v4978_v43 = vld [vmem:[%s7572_s2 + $0x38] sm:$0xff] }
  0x74   :  { %704 = vmatprep.mubr.f32.mxu0 %v7576_v4 }
  0x77   :  { %3957 = vmatmul.mubr.msk.f32.gmra.mrb[8].mxu0 %vm408_vm0, %v205_v44  ;;  %v4983_v44 = vld [vmem:[%s7572_s2 + $0x30] sm:$0xff] }
  0x78   :  { %710 = vmatprep.mubr.f32.mxu0 %v7576_v4 }
  0x7b   :  { %3958 = vmatmul.mubr.msk.f32.gmra.mrb[10].mxu0 %vm408_vm0, %v206_v45 }
  0x7c   :  { %716 = vmatprep.mubr.f32.mxu0 %v7576_v4 }
  0x7f   :  { %3959 = vmatmul.mubr.msk.f32.gmra.mrb[12].mxu0 %vm408_vm0, %v207_v46 }
  0x80   :  { %722 = vmatprep.mubr.f32.mxu0 %v7576_v4 }
  0x83   :  { %3960 = vmatmul.mubr.msk.f32.gmra.mrb[14].mxu0 %vm408_vm0, %v208_v47 }
  0x84   :  { %728 = vmatprep.mubr.f32.mxu0 %v7576_v4 }
  0x87   :  { %3961 = vmatmul.mubr.msk.f32.gmra.mrb[16].mxu0 %vm408_vm0, %v209_v48 }
  0x88   :  { %734 = vmatprep.mubr.f32.mxu0 %v7576_v4 }
  0x8b   :  { %3962 = vmatmul.mubr.msk.f32.gmra.mrb[18].mxu0 %vm408_vm0, %v210_v49  ;;  %v7575_v49 = vmov -inf  }
  0x8c   :  { %740 = vmatprep.mubr.f32.mxu0 %v7576_v4  ;;  %22 = vst.msk [vmem:[#allocation2] sm:$0xff] %vm21_vm3, %v7575_v49  ;;  %23 = vst.msk [vmem:[#allocation2 + $0x8] sm:$0xff] %vm21_vm3, %v7575_v49 }
  0x8d   :  { %24 = vst.msk [vmem:[#allocation2 + $0x10] sm:$0xff] %vm21_vm3, %v7575_v49  ;;  %25 = vst.msk [vmem:[#allocation2 + $0x18] sm:$0xff] %vm21_vm3, %v7575_v49 }
  0x8e   :  { %26 = vst.msk [vmem:[#allocation2 + $0x20] sm:$0xff] %vm21_vm3, %v7575_v49  ;;  %27 = vst.msk [vmem:[#allocation2 + $0x28] sm:$0xff] %vm21_vm3, %v7575_v49 }
  0x8f   :  { %3963 = vmatmul.mubr.msk.f32.gmra.mrb[20].mxu0 %vm408_vm0, %v211_v50  ;;  %28 = vst.msk [vmem:[#allocation2 + $0x30] sm:$0xff] %vm21_vm3, %v7575_v49  ;;  %29 = vst.msk [vmem:[#allocation2 + $0x38] sm:$0xff] %vm21_vm3, %v7575_v49 }
  0x90   :  { %746 = vmatprep.mubr.f32.mxu0 %v7576_v4  ;;  %30 = vst.msk [vmem:[#allocation2 + $0x40] sm:$0xff] %vm21_vm3, %v7575_v49  ;;  %31 = vst.msk [vmem:[#allocation2 + $0x48] sm:$0xff] %vm21_vm3, %v7575_v49 }
  0x91   :  { %32 = vst.msk [vmem:[#allocation2 + $0x50] sm:$0xff] %vm21_vm3, %v7575_v49  ;;  %33 = vst.msk [vmem:[#allocation2 + $0x58] sm:$0xff] %vm21_vm3, %v7575_v49 }
  0x92   :  { %34 = vst.msk [vmem:[#allocation2 + $0x60] sm:$0xff] %vm21_vm3, %v7575_v49  ;;  %35 = vst.msk [vmem:[#allocation2 + $0x68] sm:$0xff] %vm21_vm3, %v7575_v49 }
  0x93   :  { %3964 = vmatmul.mubr.msk.f32.gmra.mrb[22].mxu0 %vm408_vm0, %v212_v51  ;;  %36 = vst.msk [vmem:[#allocation2 + $0x70] sm:$0xff] %vm21_vm3, %v7575_v49  ;;  %37 = vst.msk [vmem:[#allocation2 + $0x78] sm:$0xff] %vm21_vm3, %v7575_v49 }
  0x94   :  { %752 = vmatprep.mubr.f32.mxu0 %v7576_v4  ;;  %38 = vst.msk [vmem:[#allocation2 + $0x80] sm:$0xff] %vm21_vm3, %v7575_v49  ;;  %39 = vst.msk [vmem:[#allocation2 + $0x88] sm:$0xff] %vm21_vm3, %v7575_v49 }
  0x95   :  { %40 = vst.msk [vmem:[#allocation2 + $0x90] sm:$0xff] %vm21_vm3, %v7575_v49  ;;  %41 = vst.msk [vmem:[#allocation2 + $0x98] sm:$0xff] %vm21_vm3, %v7575_v49 }
  0x96   :  { %42 = vst.msk [vmem:[#allocation2 + $0xa0] sm:$0xff] %vm21_vm3, %v7575_v49  ;;  %43 = vst.msk [vmem:[#allocation2 + $0xa8] sm:$0xff] %vm21_vm3, %v7575_v49 }
  0x97   :  { %3965 = vmatmul.mubr.msk.f32.gmra.mrb[24].mxu0 %vm408_vm0, %v213_v52  ;;  %44 = vst.msk [vmem:[#allocation2 + $0xb0] sm:$0xff] %vm21_vm3, %v7575_v49  ;;  %45 = vst.msk [vmem:[#allocation2 + $0xb8] sm:$0xff] %vm21_vm3, %v7575_v49  ;;  %v329_v52 = vld [vmem:[%s7572_s2 + $0x48] sm:$0xff] }
  0x98   :  { %758 = vmatprep.mubr.f32.mxu0 %v7576_v4  ;;  %46 = vst.msk [vmem:[#allocation2 + $0xc0] sm:$0xff] %vm21_vm3, %v7575_v49  ;;  %47 = vst.msk [vmem:[#allocation2 + $0xc8] sm:$0xff] %vm21_vm3, %v7575_v49 }
  0x99   :  { %48 = vst.msk [vmem:[#allocation2 + $0xd0] sm:$0xff] %vm21_vm3, %v7575_v49  ;;  %49 = vst.msk [vmem:[#allocation2 + $0xd8] sm:$0xff] %vm21_vm3, %v7575_v49 }
  0x9a   :  { %50 = vst.msk [vmem:[#allocation2 + $0xe0] sm:$0xff] %vm21_vm3, %v7575_v49  ;;  %51 = vst.msk [vmem:[#allocation2 + $0xe8] sm:$0xff] %vm21_vm3, %v7575_v49 }
  0x9b   :  { %3966 = vmatmul.mubr.msk.f32.gmra.mrb[26].mxu0 %vm408_vm0, %v214_v53  ;;  %52 = vst.msk [vmem:[#allocation2 + $0xf0] sm:$0xff] %vm21_vm3, %v7575_v49  ;;  %53 = vst.msk [vmem:[#allocation2 + $0xf8] sm:$0xff] %vm21_vm3, %v7575_v49  ;;  %v328_v53 = vld [vmem:[%s7572_s2 + $0x40] sm:$0xff] }
  0x9c   :  { %764 = vmatprep.mubr.f32.mxu0 %v7576_v4  ;;  %54 = vst.msk [vmem:[#allocation2 + $0x100] sm:$0xff] %vm21_vm3, %v7575_v49  ;;  %55 = vst.msk [vmem:[#allocation2 + $0x108] sm:$0xff] %vm21_vm3, %v7575_v49 }
  0x9d   :  { %56 = vst.msk [vmem:[#allocation2 + $0x110] sm:$0xff] %vm21_vm3, %v7575_v49  ;;  %57 = vst.msk [vmem:[#allocation2 + $0x118] sm:$0xff] %vm21_vm3, %v7575_v49 }
  0x9e   :  { %58 = vst.msk [vmem:[#allocation2 + $0x120] sm:$0xff] %vm21_vm3, %v7575_v49  ;;  %59 = vst.msk [vmem:[#allocation2 + $0x128] sm:$0xff] %vm21_vm3, %v7575_v49 }
  0x9f   :  { %3967 = vmatmul.mubr.msk.f32.gmra.mrb[28].mxu0 %vm408_vm0, %v215_v54  ;;  %60 = vst.msk [vmem:[#allocation2 + $0x130] sm:$0xff] %vm21_vm3, %v7575_v49  ;;  %61 = vst.msk [vmem:[#allocation2 + $0x138] sm:$0xff] %vm21_vm3, %v7575_v49 }
  0xa0   :  { %770 = vmatprep.mubr.f32.mxu0 %v7576_v4  ;;  %62 = vst.msk [vmem:[#allocation2 + $0x140] sm:$0xff] %vm21_vm3, %v7575_v49  ;;  %63 = vst.msk [vmem:[#allocation2 + $0x148] sm:$0xff] %vm21_vm3, %v7575_v49 }
  0xa1   :  { %64 = vst.msk [vmem:[#allocation2 + $0x150] sm:$0xff] %vm21_vm3, %v7575_v49 }
  0xa3   :  { %3968 = vmatmul.mubr.msk.f32.gmra.mrb[30].mxu0 %vm408_vm0, %v216_v55 }
  0xa4   :  { %776 = vmatprep.mubr.f32.mxu0 %v7576_v4 }
  0xa7   :  { %3969 = vmatmul.mubr.msk.f32.gmra.mrb[32].mxu0 %vm408_vm0, %v217_v56 }
  0xa8   :  { %782 = vmatprep.mubr.f32.mxu0 %v7576_v4 }
  0xab   :  { %3970 = vmatmul.mubr.msk.f32.gmra.mrb[34].mxu0 %vm408_vm0, %v218_v57 }
  0xac   :  { %788 = vmatprep.mubr.f32.mxu0 %v7576_v4 }
  0xaf   :  { %3971 = vmatmul.mubr.msk.f32.gmra.mrb[36].mxu0 %vm408_vm0, %v219_v58 }
  0xb0   :  { %794 = vmatprep.mubr.f32.mxu0 %v7576_v4 }
  0xb3   :  { %3972 = vmatmul.mubr.msk.f32.gmra.mrb[38].mxu0 %vm408_vm0, %v220_v59 }
  0xb4   :  { %800 = vmatprep.mubr.f32.mxu0 %v7576_v4 }
  0xb7   :  { %3973 = vmatmul.mubr.msk.f32.gmra.mrb[40].mxu0 %vm408_vm0, %v221_v60  ;;  %v331_v60 = vld [vmem:[%s7572_s2 + $0x58] sm:$0xff] }
  0xb8   :  { %806 = vmatprep.mubr.f32.mxu0 %v7576_v4 }
  0xbb   :  { %3974 = vmatmul.mubr.msk.f32.gmra.mrb[42].mxu0 %vm408_vm0, %v222_v61  ;;  %v330_v61 = vld [vmem:[%s7572_s2 + $0x50] sm:$0xff] }
  0xbc   :  { %812 = vmatprep.mubr.f32.mxu0 %v7576_v4 }
  0xbf   :  { %3975 = vmatmul.mubr.msk.f32.gmra.mrb[44].mxu0 %vm408_vm0, %v223_v62 }
  0xc0   :  { %818 = vmatprep.mubr.f32.mxu0 %v7576_v4 }
  0xc3   :  { %3976 = vmatmul.mubr.msk.f32.gmra.mrb[46].mxu0 %vm408_vm0, %v224_v63 }
  0xc4   :  { %824 = vmatprep.mubr.f32.mxu0 %v7576_v4 }
  0xc7   :  { %3977 = vmatmul.mubr.msk.f32.gmra.mrb[48].mxu0 %vm408_vm0, %v225_v0 }
  0xc8   :  { %830 = vmatprep.mubr.f32.mxu0 %v7576_v4 }
  0xcb   :  { %3978 = vmatmul.mubr.msk.f32.gmra.mrb[50].mxu0 %vm408_vm0, %v226_v1 }
  0xcc   :  { %836 = vmatprep.mubr.f32.mxu0 %v7576_v4 }
  0xcf   :  { %3979 = vmatmul.mubr.msk.f32.gmra.mrb[52].mxu0 %vm408_vm0, %v227_v2 }
  0xd0   :  { %842 = vmatprep.mubr.f32.mxu0 %v7576_v4 }
  0xd3   :  { %3980 = vmatmul.mubr.msk.f32.gmra.mrb[54].mxu0 %vm408_vm0, %v228_v3 }
  0xd4   :  { %848 = vmatprep.mubr.f32.mxu0 %v7576_v4 }
  0xd7   :  { %3981 = vmatmul.mubr.msk.f32.gmra.mrb[56].mxu0 %vm408_vm0, %v229_v5  ;;  %v333_v5 = vld [vmem:[%s7572_s2 + $0x68] sm:$0xff] }
  0xd8   :  { %854 = vmatprep.mubr.f32.mxu0 %v7576_v4 }
  0xdb   :  { %3982 = vmatmul.mubr.msk.f32.gmra.mrb[58].mxu0 %vm408_vm0, %v230_v6  ;;  %v332_v6 = vld [vmem:[%s7572_s2 + $0x60] sm:$0xff] }
  0xdc   :  { %860 = vmatprep.mubr.f32.mxu0 %v7576_v4 }
  0xdf   :  { %3983 = vmatmul.mubr.msk.f32.gmra.mrb[60].mxu0 %vm408_vm0, %v231_v7 }
  0xe0   :  { %866 = vmatprep.mubr.f32.mxu0 %v7576_v4 }
  0xe3   :  { %3984 = vmatmul.mubr.msk.f32.gmra.mrb[62].mxu0 %vm408_vm0, %v232_v8 }
  0xe4   :  { %872 = vmatprep.mubr.f32.mxu0 %v7576_v4 }
  0xe7   :  { %3985 = vmatmul.mubr.msk.f32.gmra.mrb[64].mxu0 %vm408_vm0, %v233_v9 }
  0xe8   :  { %878 = vmatprep.mubr.f32.mxu0 %v7576_v4 }
  0xeb   :  { %3986 = vmatmul.mubr.msk.f32.gmra.mrb[66].mxu0 %vm408_vm0, %v234_v10 }
  0xec   :  { %884 = vmatprep.mubr.f32.mxu0 %v7576_v4 }
  0xef   :  { %3987 = vmatmul.mubr.msk.f32.gmra.mrb[68].mxu0 %vm408_vm0, %v235_v11 }
  0xf0   :  { %890 = vmatprep.mubr.f32.mxu0 %v7576_v4 }
  0xf3   :  { %3988 = vmatmul.mubr.msk.f32.gmra.mrb[70].mxu0 %vm408_vm0, %v236_v12 }
  0xf4   :  { %896 = vmatprep.mubr.f32.mxu0 %v7576_v4 }
  0xf7   :  { %3989 = vmatmul.mubr.msk.f32.gmra.mrb[72].mxu0 %vm408_vm0, %v237_v13  ;;  %v335_v13 = vld [vmem:[%s7572_s2 + $0x78] sm:$0xff] }
  0xf8   :  { %902 = vmatprep.mubr.f32.mxu0 %v7576_v4 }
  0xfb   :  { %3990 = vmatmul.mubr.msk.f32.gmra.mrb[74].mxu0 %vm408_vm0, %v238_v14  ;;  %v334_v14 = vld [vmem:[%s7572_s2 + $0x70] sm:$0xff] }
  0xfc   :  { %908 = vmatprep.mubr.f32.mxu0 %v7576_v4 }
  0xff   :  { %3991 = vmatmul.mubr.msk.f32.gmra.mrb[76].mxu0 %vm408_vm0, %v239_v15 }
 0x100   :  { %914 = vmatprep.mubr.f32.mxu0 %v7576_v4 }
 0x103   :  { %3992 = vmatmul.mubr.msk.f32.gmra.mrb[78].mxu0 %vm408_vm0, %v240_v16 }
 0x104   :  { %920 = vmatprep.mubr.f32.mxu0 %v7576_v4 }
 0x107   :  { %3993 = vmatmul.mubr.msk.f32.gmra.mrb[80].mxu0 %vm408_vm0, %v241_v17 }
 0x108   :  { %926 = vmatprep.mubr.f32.mxu0 %v7576_v4 }
 0x10b   :  { %3994 = vmatmul.mubr.msk.f32.gmra.mrb[82].mxu0 %vm408_vm0, %v242_v18 }
 0x10c   :  { %932 = vmatprep.mubr.f32.mxu0 %v7576_v4 }
 0x10f   :  { %3995 = vmatmul.mubr.msk.f32.gmra.mrb[84].mxu0 %vm408_vm0, %v243_v19 }
 0x110   :  { %938 = vmatprep.mubr.f32.mxu0 %v7576_v4 }
 0x113   :  { %3996 = vmatmul.mubr.msk.f32.gmra.mrb[86].mxu0 %vm408_vm0, %v244_v20 }
 0x13a   :  { %v682_v23 = vpop.f32.mrb[0].mxu0 }
 0x13b   :  { %v684_v24 = vpop.f32.mrb[1].mxu0  ;;  %v4947_v26 = vmul.f32 %v682_v23, %v320_v22  ;;  %v336_v22 = vld [vmem:[%s7572_s2 + $0x80] sm:$0xff] }
 0x13c   :  { %v4945_v25 = vmul.f32 %v684_v24, %v321_v21  ;;  %v337_v21 = vld [vmem:[%s7572_s2 + $0x88] sm:$0xff] }
 0x13e   :  { %v688_v29 = vpop.f32.mrb[2].mxu0  ;;  %v1078_v30 = vsel %vm112_vm2, %v4945_v25, -inf }
 0x13f   :  { %v690_v31 = vpop.f32.mrb[3].mxu0  ;;  %v1079_v32 = vmax.f32 %v4947_v26, %v1078_v30  ;;  %v4960_v34 = vmul.f32 %v688_v29, %v322_v28 }
 0x140   :  { %v4958_v33 = vmul.f32 %v690_v31, %v323_v27  ;;  %v339_v31 = vld [vmem:[%s7572_s2 + $0x98] sm:$0xff] }
 0x141   :  { %1080 = vmax.xlane.f32.xlu0 %v1079_v32  ;;  %v338_v32 = vld [vmem:[%s7572_s2 + $0x90] sm:$0xff] }
 0x142   :  { %v694_v37 = vpop.f32.mrb[4].mxu0  ;;  %v1082_v38 = vsel %vm112_vm2, %v4958_v33, -inf }
 0x143   :  { %v696_v39 = vpop.f32.mrb[5].mxu0  ;;  %v1083_v40 = vmax.f32 %v4960_v34, %v1082_v38  ;;  %v4973_v42 = vmul.f32 %v694_v37, %v324_v36 }
 0x144   :  { %v4971_v41 = vmul.f32 %v696_v39, %v325_v35 }
 0x145   :  { %1084 = vmax.xlane.f32.xlu0 %v1083_v40 }
 0x146   :  { %v4985_v45 = vpop.f32.mrb[6].mxu0  ;;  %v4989_v46 = vsel %vm112_vm2, %v4971_v41, -inf }
 0x147   :  { %v4991_v47 = vpop.f32.mrb[7].mxu0  ;;  %v1087_v48 = vmax.f32 %v4973_v42, %v4989_v46  ;;  %v5173_v51 = vmul.f32 %v4985_v45, %v4983_v44  ;;  %v340_v44 = vld [vmem:[%s7572_s2 + $0xa0] sm:$0xff] }
 0x148   :  { %v5169_v50 = vmul.f32 %v4991_v47, %v4978_v43  ;;  %v341_v43 = vld [vmem:[%s7572_s2 + $0xa8] sm:$0xff] }
 0x149   :  { %1088 = vmax.xlane.f32.xlu1 %v1087_v48 }
 0x14a   :  { %v706_v54 = vpop.f32.mrb[8].mxu0  ;;  %v1090_v55 = vsel %vm112_vm2, %v5169_v50, -inf }
 0x14b   :  { %v708_v56 = vpop.f32.mrb[9].mxu0  ;;  %v1091_v57 = vmax.f32 %v5173_v51, %v1090_v55  ;;  %v5189_v59 = vmul.f32 %v706_v54, %v328_v53  ;;  %v343_v54 = vld [vmem:[%s7572_s2 + $0xb8] sm:$0xff]  ;;  %v4499_v55 = vmov 0  }
 0x14c   :  { %v5187_v58 = vmul.f32 %v708_v56, %v329_v52  ;;  %4141 = vset.pattern.permute.xlu0 %v4499_v55  ;;  %v342_v56 = vld [vmem:[%s7572_s2 + $0xb0] sm:$0xff]  ;;  %4142 = vset.pattern.permute.xlu1 %v4499_v55  ;;  %v353_v55 = vld [vmem:[%s7572_s2 + $0x108] sm:$0xff] }
 0x14d   :  { %1092 = vmax.xlane.f32.xlu1 %v1091_v57 }
 0x14e   :  { %v712_v62 = vpop.f32.mrb[10].mxu0  ;;  %v1094_v63 = vsel %vm112_vm2, %v5187_v58, -inf }
 0x14f   :  { %v714_v0 = vpop.f32.mrb[11].mxu0  ;;  %v1095_v1 = vmax.f32 %v5189_v59, %v1094_v63  ;;  %v5202_v3 = vmul.f32 %v712_v62, %v330_v61 }
 0x150   :  { %v5200_v2 = vmul.f32 %v714_v0, %v331_v60 }
 0x151   :  { %7768 = vst [vmem:[#allocation6_spill] sm:$0xff] %v5202_v3  ;;  %1096 = vmax.xlane.f32.xlu0 %v1095_v1  ;;  %v345_v1 = vld [vmem:[%s7572_s2 + $0xc8] sm:$0xff] }
 0x152   :  { %7767 = vst [vmem:[#allocation5_spill] sm:$0xff] %v5200_v2  ;;  %v718_v7 = vpop.f32.mrb[12].mxu0  ;;  %v1098_v8 = vsel %vm112_vm2, %v5200_v2, -inf }
 0x153   :  { %v720_v9 = vpop.f32.mrb[13].mxu0  ;;  %v1099_v10 = vmax.f32 %v5202_v3, %v1098_v8  ;;  %v5215_v12 = vmul.f32 %v718_v7, %v332_v6 }
 0x154   :  { %v5213_v11 = vmul.f32 %v720_v9, %v333_v5  ;;  %v344_v5 = vld [vmem:[%s7572_s2 + $0xc0] sm:$0xff] }
 0x155   :  { %7770 = vst [vmem:[#allocation8_spill] sm:$0xff] %v5215_v12  ;;  %1100 = vmax.xlane.f32.xlu1 %v1099_v10 }
 0x156   :  { %7769 = vst [vmem:[#allocation7_spill] sm:$0xff] %v5213_v11  ;;  %v724_v15 = vpop.f32.mrb[14].mxu0  ;;  %v1102_v16 = vsel %vm112_vm2, %v5213_v11, -inf }
 0x157   :  { %v726_v17 = vpop.f32.mrb[15].mxu0  ;;  %v1103_v18 = vmax.f32 %v5215_v12, %v1102_v16  ;;  %v5228_v20 = vmul.f32 %v724_v15, %v334_v14  ;;  %v347_v14 = vld [vmem:[%s7572_s2 + $0xd8] sm:$0xff]  ;;  %v346_v15 = vld [vmem:[%s7572_s2 + $0xd0] sm:$0xff] }
 0x158   :  { %v5226_v19 = vmul.f32 %v726_v17, %v335_v13 }
 0x159   :  { %7772 = vst [vmem:[#allocation10_spill] sm:$0xff] %v5228_v20  ;;  %1104 = vmax.xlane.f32.xlu0 %v1103_v18 }
 0x15a   :  { %7771 = vst [vmem:[#allocation9_spill] sm:$0xff] %v5226_v19  ;;  %v730_v23 = vpop.f32.mrb[16].mxu0  ;;  %v1106_v24 = vsel %vm112_vm2, %v5226_v19, -inf }
 0x15b   :  { %v732_v27 = vpop.f32.mrb[17].mxu0  ;;  %v1107_v28 = vmax.f32 %v5228_v20, %v1106_v24  ;;  %v5241_v30 = vmul.f32 %v730_v23, %v336_v22  ;;  %v349_v24 = vld [vmem:[%s7572_s2 + $0xe8] sm:$0xff] }
 0x15c   :  { %v5239_v29 = vmul.f32 %v732_v27, %v337_v21  ;;  %v348_v27 = vld [vmem:[%s7572_s2 + $0xe0] sm:$0xff] }
 0x15d   :  { %7774 = vst [vmem:[#allocation12_spill] sm:$0xff] %v5241_v30  ;;  %1108 = vmax.xlane.f32.xlu1 %v1107_v28 }
 0x15e   :  { %7773 = vst [vmem:[#allocation11_spill] sm:$0xff] %v5239_v29  ;;  %v736_v35 = vpop.f32.mrb[18].mxu0  ;;  %v1110_v36 = vsel %vm112_vm2, %v5239_v29, -inf }
 0x15f   :  { %v738_v37 = vpop.f32.mrb[19].mxu0  ;;  %v1111_v38 = vmax.f32 %v5241_v30, %v1110_v36  ;;  %v5254_v40 = vmul.f32 %v736_v35, %v338_v32 }
 0x160   :  { %v5252_v39 = vmul.f32 %v738_v37, %v339_v31 }
 0x161   :  { %7776 = vst [vmem:[#allocation14_spill] sm:$0xff] %v5254_v40  ;;  %1112 = vmax.xlane.f32.xlu0 %v1111_v38  ;;  %v351_v38 = vld [vmem:[%s7572_s2 + $0xf8] sm:$0xff] }
 0x162   :  { %7775 = vst [vmem:[#allocation13_spill] sm:$0xff] %v5252_v39  ;;  %v742_v45 = vpop.f32.mrb[20].mxu0  ;;  %v1114_v46 = vsel %vm112_vm2, %v5252_v39, -inf  ;;  %v5936_v39 = vld [vmem:[#allocation2 + $0x78] sm:$0xff] }
 0x163   :  { %v744_v47 = vpop.f32.mrb[21].mxu0  ;;  %v1115_v48 = vmax.f32 %v5254_v40, %v1114_v46  ;;  %v5267_v53 = vmul.f32 %v742_v45, %v340_v44 }
 0x164   :  { %v5265_v52 = vmul.f32 %v744_v47, %v341_v43  ;;  %v350_v43 = vld [vmem:[%s7572_s2 + $0xf0] sm:$0xff] }
 0x165   :  { %7778 = vst [vmem:[#allocation16_spill] sm:$0xff] %v5267_v53  ;;  %1116 = vmax.xlane.f32.xlu1 %v1115_v48 }
 0x166   :  { %7777 = vst [vmem:[#allocation15_spill] sm:$0xff] %v5265_v52  ;;  %v748_v57 = vpop.f32.mrb[22].mxu0  ;;  %v1118_v60 = vsel %vm112_vm2, %v5265_v52, -inf }
 0x167   :  { %v750_v61 = vpop.f32.mrb[23].mxu0  ;;  %v1119_v62 = vmax.f32 %v5267_v53, %v1118_v60  ;;  %v5280_v0 = vmul.f32 %v748_v57, %v342_v56  ;;  %v352_v56 = vld [vmem:[%s7572_s2 + $0x100] sm:$0xff]  ;;  %v5903_v53 = vld [vmem:[#allocation2 + $0x68] sm:$0xff] }
 0x168   :  { %v5278_v63 = vmul.f32 %v750_v61, %v343_v54 }
 0x169   :  { %7780 = vst [vmem:[#allocation18_spill] sm:$0xff] %v5280_v0  ;;  %1120 = vmax.xlane.f32.xlu0 %v1119_v62 }
 0x16a   :  { %7779 = vst [vmem:[#allocation17_spill] sm:$0xff] %v5278_v63  ;;  %v754_v6 = vpop.f32.mrb[24].mxu0  ;;  %v1122_v7 = vsel %vm112_vm2, %v5278_v63, -inf }
 0x16b   :  { %v756_v8 = vpop.f32.mrb[25].mxu0  ;;  %v1123_v9 = vmax.f32 %v5280_v0, %v1122_v7  ;;  %v5293_v13 = vmul.f32 %v754_v6, %v344_v5  ;;  %v355_v6 = vld [vmem:[%s7572_s2 + $0x118] sm:$0xff]  ;;  %v354_v7 = vld [vmem:[%s7572_s2 + $0x110] sm:$0xff] }
 0x16c   :  { %v5291_v10 = vmul.f32 %v756_v8, %v345_v1 }
 0x16d   :  { %7782 = vst [vmem:[#allocation20_spill] sm:$0xff] %v5293_v13  ;;  %1124 = vmax.xlane.f32.xlu1 %v1123_v9 }
 0x16e   :  { %7781 = vst [vmem:[#allocation19_spill] sm:$0xff] %v5291_v10  ;;  %v760_v16 = vpop.f32.mrb[26].mxu0  ;;  %v1126_v17 = vsel %vm112_vm2, %v5291_v10, -inf }
 0x16f   :  { %v762_v18 = vpop.f32.mrb[27].mxu0  ;;  %v1127_v21 = vmax.f32 %v5293_v13, %v1126_v17  ;;  %v5306_v23 = vmul.f32 %v760_v16, %v346_v15  ;;  %v319_v13 = vld [vmem:[%s7573_s3 + $0x188] sm:$0xff] }
 0x170   :  { %v5304_v22 = vmul.f32 %v762_v18, %v347_v14  ;;  %v357_v18 = vld [vmem:[%s7572_s2 + $0x128] sm:$0xff] }
 0x171   :  { %7784 = vst [vmem:[#allocation22_spill] sm:$0xff] %v5306_v23  ;;  %1128 = vmax.xlane.f32.xlu0 %v1127_v21  ;;  %v356_v21 = vld [vmem:[%s7572_s2 + $0x120] sm:$0xff] }
 0x172   :  { %7783 = vst [vmem:[#allocation21_spill] sm:$0xff] %v5304_v22  ;;  %v766_v28 = vpop.f32.mrb[28].mxu0  ;;  %v1130_v31 = vsel %vm112_vm2, %v5304_v22, -inf  ;;  %v5891_v22 = vld [vmem:[#allocation2 + $0x60] sm:$0xff] }
 0x173   :  { %v768_v32 = vpop.f32.mrb[29].mxu0  ;;  %v1131_v35 = vmax.f32 %v5306_v23, %v1130_v31  ;;  %v5319_v37 = vmul.f32 %v766_v28, %v348_v27  ;;  %v315_v23 = vld [vmem:[%s7573_s3 + $0x168] sm:$0xff]  ;;  %7834 = vst [vmem:[#allocation72_spill] sm:$0xff] %v5891_v22 }
 0x174   :  { %v5317_v36 = vmul.f32 %v768_v32, %v349_v24 }
 0x175   :  { %7786 = vst [vmem:[#allocation24_spill] sm:$0xff] %v5319_v37  ;;  %1132 = vmax.xlane.f32.xlu1 %v1131_v35 }
 0x176   :  { %7785 = vst [vmem:[#allocation23_spill] sm:$0xff] %v5317_v36  ;;  %v772_v44 = vpop.f32.mrb[30].mxu0  ;;  %v1134_v45 = vsel %vm112_vm2, %v5317_v36, -inf  ;;  %v5824_v36 = vld [vmem:[#allocation2 + $0x40] sm:$0xff] }
 0x177   :  { %v774_v46 = vpop.f32.mrb[31].mxu0  ;;  %v1135_v47 = vmax.f32 %v5319_v37, %v1134_v45  ;;  %v5332_v54 = vmul.f32 %v772_v44, %v350_v43  ;;  %v358_v43 = vld [vmem:[%s7572_s2 + $0x130] sm:$0xff] }
 0x178   :  { %v5330_v48 = vmul.f32 %v774_v46, %v351_v38  ;;  %v359_v38 = vld [vmem:[%s7572_s2 + $0x138] sm:$0xff] }
 0x179   :  { %7788 = vst [vmem:[#allocation26_spill] sm:$0xff] %v5332_v54  ;;  %1136 = vmax.xlane.f32.xlu0 %v1135_v47 }
 0x17a   :  { %7787 = vst [vmem:[#allocation25_spill] sm:$0xff] %v5330_v48  ;;  %v778_v57 = vpop.f32.mrb[32].mxu0  ;;  %v1138_v60 = vsel %vm112_vm2, %v5330_v48, -inf }
 0x17b   :  { %v780_v61 = vpop.f32.mrb[33].mxu0  ;;  %v1139_v62 = vmax.f32 %v5332_v54, %v1138_v60  ;;  %v5345_v5 = vmul.f32 %v778_v57, %v352_v56  ;;  %v361_v57 = vld [vmem:[%s7572_s2 + $0x148] sm:$0xff]  ;;  %v360_v60 = vld [vmem:[%s7572_s2 + $0x140] sm:$0xff] }
 0x17c   :  { %v5343_v1 = vmul.f32 %v780_v61, %v353_v55 }
 0x17d   :  { %7790 = vst [vmem:[#allocation28_spill] sm:$0xff] %v5345_v5  ;;  %1140 = vmax.xlane.f32.xlu1 %v1139_v62 }
 0x17e   :  { %7789 = vst [vmem:[#allocation27_spill] sm:$0xff] %v5343_v1  ;;  %v784_v8 = vpop.f32.mrb[34].mxu0  ;;  %v1142_v9 = vsel %vm112_vm2, %v5343_v1, -inf }
 0x17f   :  { %v786_v14 = vpop.f32.mrb[35].mxu0  ;;  %v1143_v15 = vmax.f32 %v5345_v5, %v1142_v9  ;;  %v5358_v17 = vmul.f32 %v784_v8, %v354_v7 }
 0x180   :  { %v5356_v16 = vmul.f32 %v786_v14, %v355_v6  ;;  %v363_v14 = vld [vmem:[%s7572_s2 + $0x158] sm:$0xff] }
 0x181   :  { %7792 = vst [vmem:[#allocation30_spill] sm:$0xff] %v5358_v17  ;;  %1144 = vmax.xlane.f32.xlu0 %v1143_v15  ;;  %v362_v15 = vld [vmem:[%s7572_s2 + $0x150] sm:$0xff] }
 0x182   :  { %7791 = vst [vmem:[#allocation29_spill] sm:$0xff] %v5356_v16  ;;  %v790_v24 = vpop.f32.mrb[36].mxu0  ;;  %v1146_v27 = vsel %vm112_vm2, %v5356_v16, -inf  ;;  %v5804_v16 = vld [vmem:[#allocation2 + $0x38] sm:$0xff] }
 0x183   :  { %v792_v28 = vpop.f32.mrb[37].mxu0  ;;  %v1147_v31 = vmax.f32 %v5358_v17, %v1146_v27  ;;  %v5371_v35 = vmul.f32 %v790_v24, %v356_v21  ;;  %v305_v17 = vld [vmem:[%s7573_s3 + $0x118] sm:$0xff] }
 0x184   :  { %v5369_v32 = vmul.f32 %v792_v28, %v357_v18 }
 0x185   :  { %7794 = vst [vmem:[#allocation32_spill] sm:$0xff] %v5371_v35  ;;  %1148 = vmax.xlane.f32.xlu1 %v1147_v31 }
 0x186   :  { %7793 = vst [vmem:[#allocation31_spill] sm:$0xff] %v5369_v32  ;;  %v796_v44 = vpop.f32.mrb[38].mxu0  ;;  %v1150_v45 = vsel %vm112_vm2, %v5369_v32, -inf }
 0x187   :  { %v798_v46 = vpop.f32.mrb[39].mxu0  ;;  %v1151_v47 = vmax.f32 %v5371_v35, %v1150_v45  ;;  %v5384_v56 = vmul.f32 %v796_v44, %v358_v43  ;;  %v364_v43 = vld [vmem:[%s7572_s2 + $0x160] sm:$0xff] }
 0x188   :  { %v5382_v55 = vmul.f32 %v798_v46, %v359_v38  ;;  %v365_v38 = vld [vmem:[%s7572_s2 + $0x168] sm:$0xff] }
 0x189   :  { %7796 = vst [vmem:[#allocation34_spill] sm:$0xff] %v5384_v56  ;;  %1152 = vmax.xlane.f32.xlu0 %v1151_v47 }
 0x18a   :  { %7795 = vst [vmem:[#allocation33_spill] sm:$0xff] %v5382_v55  ;;  %v802_v61 = vpop.f32.mrb[40].mxu0  ;;  %v1154_v62 = vsel %vm112_vm2, %v5382_v55, -inf }
 0x18b   :  { %v804_v6 = vpop.f32.mrb[41].mxu0  ;;  %v1155_v7 = vmax.f32 %v5384_v56, %v1154_v62  ;;  %v5397_v9 = vmul.f32 %v802_v61, %v360_v60  ;;  %v367_v61 = vld [vmem:[%s7572_s2 + $0x178] sm:$0xff]  ;;  %v366_v62 = vld [vmem:[%s7572_s2 + $0x170] sm:$0xff] }
 0x18c   :  { %v5395_v8 = vmul.f32 %v804_v6, %v361_v57  ;;  %v301_v56 = vld [vmem:[%s7573_s3 + $0xf8] sm:$0xff] }
 0x18d   :  { %7798 = vst [vmem:[#allocation36_spill] sm:$0xff] %v5397_v9  ;;  %1156 = vmax.xlane.f32.xlu1 %v1155_v7 }
 0x18e   :  { %7797 = vst [vmem:[#allocation35_spill] sm:$0xff] %v5395_v8  ;;  %v808_v18 = vpop.f32.mrb[42].mxu0  ;;  %v1158_v21 = vsel %vm112_vm2, %v5395_v8, -inf  ;;  %v297_v8 = vld [vmem:[%s7573_s3 + $0xd8] sm:$0xff] }
 0x18f   :  { %v810_v24 = vpop.f32.mrb[43].mxu0  ;;  %v1159_v27 = vmax.f32 %v5397_v9, %v1158_v21  ;;  %v5410_v31 = vmul.f32 %v808_v18, %v362_v15 }
 0x190   :  { %v5408_v28 = vmul.f32 %v810_v24, %v363_v14  ;;  %v369_v24 = vld [vmem:[%s7572_s2 + $0x188] sm:$0xff] }
 0x191   :  { %7800 = vst [vmem:[#allocation38_spill] sm:$0xff] %v5410_v31  ;;  %1160 = vmax.xlane.f32.xlu0 %v1159_v27  ;;  %v368_v27 = vld [vmem:[%s7572_s2 + $0x180] sm:$0xff] }
 0x192   :  { %7799 = vst [vmem:[#allocation37_spill] sm:$0xff] %v5408_v28  ;;  %v814_v44 = vpop.f32.mrb[44].mxu0  ;;  %v1162_v45 = vsel %vm112_vm2, %v5408_v28, -inf }
 0x193   :  { %v816_v46 = vpop.f32.mrb[45].mxu0  ;;  %v1163_v47 = vmax.f32 %v5410_v31, %v1162_v45  ;;  %v5423_v60 = vmul.f32 %v814_v44, %v364_v43  ;;  %v295_v31 = vld [vmem:[%s7573_s3 + $0xc8] sm:$0xff] }
 0x194   :  { %v5421_v57 = vmul.f32 %v816_v46, %v365_v38 }
 0x195   :  { %7802 = vst [vmem:[#allocation40_spill] sm:$0xff] %v5423_v60  ;;  %1164 = vmax.xlane.f32.xlu1 %v1163_v47 }
 0x196   :  { %7801 = vst [vmem:[#allocation39_spill] sm:$0xff] %v5421_v57  ;;  %v820_v6 = vpop.f32.mrb[46].mxu0  ;;  %v1166_v7 = vsel %vm112_vm2, %v5421_v57, -inf }
 0x197   :  { %v822_v14 = vpop.f32.mrb[47].mxu0  ;;  %v1167_v15 = vmax.f32 %v5423_v60, %v1166_v7  ;;  %v5436_v21 = vmul.f32 %v820_v6, %v366_v62  ;;  %v370_v62 = vld [vmem:[%s7572_s2 + $0x190] sm:$0xff] }
 0x198   :  { %v5434_v18 = vmul.f32 %v822_v14, %v367_v61  ;;  %v371_v61 = vld [vmem:[%s7572_s2 + $0x198] sm:$0xff] }
 0x199   :  { %7804 = vst [vmem:[#allocation42_spill] sm:$0xff] %v5436_v21  ;;  %1168 = vmax.xlane.f32.xlu0 %v1167_v15 }
 0x19a   :  { %7803 = vst [vmem:[#allocation41_spill] sm:$0xff] %v5434_v18  ;;  %v826_v38 = vpop.f32.mrb[48].mxu0  ;;  %v1170_v43 = vsel %vm112_vm2, %v5434_v18, -inf  ;;  %v4113_v18 = vpack.c.bf16 %v297_v8, %v295_v31  ;;  %v298_v31 = vld [vmem:[%s7573_s3 + $0xe0] sm:$0xff] }
 0x19b   :  { %v828_v44 = vpop.f32.mrb[49].mxu0  ;;  %v1171_v45 = vmax.f32 %v5436_v21, %v1170_v43  ;;  %v5449_v47 = vmul.f32 %v826_v38, %v368_v27  ;;  %v373_v38 = vld [vmem:[%s7572_s2 + $0x1a8] sm:$0xff]  ;;  %v372_v43 = vld [vmem:[%s7572_s2 + $0x1a0] sm:$0xff] }
 0x19c   :  { %v5447_v46 = vmul.f32 %v828_v44, %v369_v24  ;;  %v5671_v21 = vld [vmem:[#allocation2 + $0x8] sm:$0xff] }
 0x19d   :  { %7806 = vst [vmem:[#allocation44_spill] sm:$0xff] %v5449_v47  ;;  %1172 = vmax.xlane.f32.xlu1 %v1171_v45 }
 0x19e   :  { %7805 = vst [vmem:[#allocation43_spill] sm:$0xff] %v5447_v46  ;;  %v832_v6 = vpop.f32.mrb[50].mxu0  ;;  %v1174_v7 = vsel %vm112_vm2, %v5447_v46, -inf }
 0x19f   :  { %v834_v14 = vpop.f32.mrb[51].mxu0  ;;  %v1175_v15 = vmax.f32 %v5449_v47, %v1174_v7  ;;  %v5462_v27 = vmul.f32 %v832_v6, %v370_v62  ;;  %v375_v6 = vld [vmem:[%s7572_s2 + $0x1b8] sm:$0xff] }
 0x1a0   :  { %v5460_v24 = vmul.f32 %v834_v14, %v371_v61  ;;  %v374_v14 = vld [vmem:[%s7572_s2 + $0x1b0] sm:$0xff] }
 0x1a1   :  { %7808 = vst [vmem:[#allocation46_spill] sm:$0xff] %v5462_v27  ;;  %1176 = vmax.xlane.f32.xlu0 %v1175_v15 }
 0x1a2   :  { %7807 = vst [vmem:[#allocation45_spill] sm:$0xff] %v5460_v24  ;;  %v838_v44 = vpop.f32.mrb[52].mxu0  ;;  %v1178_v45 = vsel %vm112_vm2, %v5460_v24, -inf  ;;  %v391_v24 = vld [vmem:[%s7572_s2 + $0x238] sm:$0xff] }
 0x1a3   :  { %v840_v49 = vpop.f32.mrb[53].mxu0  ;;  %v1179_v7 = vmax.f32 %v5462_v27, %v1178_v45  ;;  %v5475_v62 = vmul.f32 %v838_v44, %v372_v43  ;;  %v377_v43 = vld [vmem:[%s7572_s2 + $0x1c8] sm:$0xff]  ;;  %v376_v44 = vld [vmem:[%s7572_s2 + $0x1c0] sm:$0xff] }
 0x1a4   :  { %v5473_v61 = vmul.f32 %v840_v49, %v373_v38 }
 0x1a5   :  { %7810 = vst [vmem:[#allocation48_spill] sm:$0xff] %v5475_v62  ;;  %1180 = vmax.xlane.f32.xlu1 %v1179_v7 }
 0x1a6   :  { %7809 = vst [vmem:[#allocation47_spill] sm:$0xff] %v5473_v61  ;;  %v844_v15 = vpop.f32.mrb[54].mxu0  ;;  %v1182_v4 = vsel %vm112_vm2, %v5473_v61, -inf }
 0x1a7   :  { %v846_v46 = vpop.f32.mrb[55].mxu0  ;;  %v1183_v45 = vmax.f32 %v5475_v62, %v1182_v4  ;;  %v5488_v38 = vmul.f32 %v844_v15, %v374_v14  ;;  %v379_v14 = vld [vmem:[%s7572_s2 + $0x1d8] sm:$0xff]  ;;  %v378_v15 = vld [vmem:[%s7572_s2 + $0x1d0] sm:$0xff] }
 0x1a8   :  { %v5486_v49 = vmul.f32 %v846_v46, %v375_v6 }
 0x1a9   :  { %7812 = vst [vmem:[#allocation50_spill] sm:$0xff] %v5488_v38  ;;  %1184 = vmax.xlane.f32.xlu0 %v1183_v45 }
 0x1aa   :  { %7811 = vst [vmem:[#allocation49_spill] sm:$0xff] %v5486_v49  ;;  %v850_v7 = vpop.f32.mrb[56].mxu0  ;;  %v1186_v61 = vsel %vm112_vm2, %v5486_v49, -inf }
 0x1ab   :  { %v852_v27 = vpop.f32.mrb[57].mxu0  ;;  %v1187_v4 = vmax.f32 %v5488_v38, %v1186_v61  ;;  %v5501_v6 = vmul.f32 %v850_v7, %v376_v44  ;;  %v381_v44 = vld [vmem:[%s7572_s2 + $0x1e8] sm:$0xff]  ;;  %v380_v7 = vld [vmem:[%s7572_s2 + $0x1e0] sm:$0xff] }
 0x1ac   :  { %v5499_v46 = vmul.f32 %v852_v27, %v377_v43 }
 0x1ad   :  { %7814 = vst [vmem:[#allocation52_spill] sm:$0xff] %v5501_v6  ;;  %1188 = vmax.xlane.f32.xlu1 %v1187_v4 }
 0x1ae   :  { %7813 = vst [vmem:[#allocation51_spill] sm:$0xff] %v5499_v46  ;;  %v856_v45 = vpop.f32.mrb[58].mxu0  ;;  %v1190_v62 = vsel %vm112_vm2, %v5499_v46, -inf }
 0x1af   :  { %v858_v49 = vpop.f32.mrb[59].mxu0  ;;  %v1191_v61 = vmax.f32 %v5501_v6, %v1190_v62  ;;  %v5514_v43 = vmul.f32 %v856_v45, %v378_v15  ;;  %v383_v15 = vld [vmem:[%s7572_s2 + $0x1f8] sm:$0xff]  ;;  %v382_v45 = vld [vmem:[%s7572_s2 + $0x1f0] sm:$0xff] }
 0x1b0   :  { %v5512_v27 = vmul.f32 %v858_v49, %v379_v14 }
 0x1b1   :  { %7816 = vst [vmem:[#allocation54_spill] sm:$0xff] %v5514_v43  ;;  %1192 = vmax.xlane.f32.xlu0 %v1191_v61 }
 0x1b2   :  { %7815 = vst [vmem:[#allocation53_spill] sm:$0xff] %v5512_v27  ;;  %v862_v4 = vpop.f32.mrb[60].mxu0  ;;  %v1194_v46 = vsel %vm112_vm2, %v5512_v27, -inf }
 0x1b3   :  { %v864_v38 = vpop.f32.mrb[61].mxu0  ;;  %v1195_v62 = vmax.f32 %v5514_v43, %v1194_v46  ;;  %v5527_v14 = vmul.f32 %v862_v4, %v380_v7  ;;  %v385_v7 = vld [vmem:[%s7572_s2 + $0x208] sm:$0xff]  ;;  %v384_v4 = vld [vmem:[%s7572_s2 + $0x200] sm:$0xff] }
 0x1b4   :  { %v5525_v49 = vmul.f32 %v864_v38, %v381_v44 }
 0x1b5   :  { %7818 = vst [vmem:[#allocation56_spill] sm:$0xff] %v5527_v14  ;;  %1196 = vmax.xlane.f32.xlu1 %v1195_v62 }
 0x1b6   :  { %7817 = vst [vmem:[#allocation55_spill] sm:$0xff] %v5525_v49  ;;  %v868_v61 = vpop.f32.mrb[62].mxu0  ;;  %v1198_v6 = vsel %vm112_vm2, %v5525_v49, -inf }
 0x1b7   :  { %v870_v27 = vpop.f32.mrb[63].mxu0  ;;  %v1199_v46 = vmax.f32 %v5527_v14, %v1198_v6  ;;  %v5540_v44 = vmul.f32 %v868_v61, %v382_v45  ;;  %v387_v45 = vld [vmem:[%s7572_s2 + $0x218] sm:$0xff]  ;;  %v386_v61 = vld [vmem:[%s7572_s2 + $0x210] sm:$0xff] }
 0x1b8   :  { %v5538_v38 = vmul.f32 %v870_v27, %v383_v15 }
 0x1b9   :  { %7820 = vst [vmem:[#allocation58_spill] sm:$0xff] %v5540_v44  ;;  %1200 = vmax.xlane.f32.xlu0 %v1199_v46 }
 0x1ba   :  { %7819 = vst [vmem:[#allocation57_spill] sm:$0xff] %v5538_v38  ;;  %v874_v62 = vpop.f32.mrb[64].mxu0  ;;  %v1202_v49 = vsel %vm112_vm2, %v5538_v38, -inf }
 0x1bb   :  { %v876_v43 = vpop.f32.mrb[65].mxu0  ;;  %v1203_v6 = vmax.f32 %v5540_v44, %v1202_v49  ;;  %v5553_v15 = vmul.f32 %v874_v62, %v384_v4  ;;  %v389_v4 = vld [vmem:[%s7572_s2 + $0x228] sm:$0xff]  ;;  %v388_v62 = vld [vmem:[%s7572_s2 + $0x220] sm:$0xff] }
 0x1bc   :  { %v5551_v27 = vmul.f32 %v876_v43, %v385_v7 }
 0x1bd   :  { %7822 = vst [vmem:[#allocation60_spill] sm:$0xff] %v5553_v15  ;;  %1204 = vmax.xlane.f32.xlu1 %v1203_v6 }
 0x1be   :  { %7821 = vst [vmem:[#allocation59_spill] sm:$0xff] %v5551_v27  ;;  %v880_v46 = vpop.f32.mrb[66].mxu0  ;;  %v1206_v14 = vsel %vm112_vm2, %v5551_v27, -inf }
 0x1bf   :  { %v882_v38 = vpop.f32.mrb[67].mxu0  ;;  %v1207_v49 = vmax.f32 %v5553_v15, %v1206_v14  ;;  %v5566_v7 = vmul.f32 %v880_v46, %v386_v61  ;;  %v271_v14 = vld [vmem:[%s7573_s3 + $0x8] sm:$0xff]  ;;  %v272_v15 = vld [vmem:[%s7573_s3 + $0x10] sm:$0xff] }
 0x1c0   :  { %v5564_v43 = vmul.f32 %v882_v38, %v387_v45  ;;  %v273_v38 = vld [vmem:[%s7573_s3 + $0x18] sm:$0xff] }
 0x1c1   :  { %7824 = vst [vmem:[#allocation62_spill] sm:$0xff] %v5566_v7  ;;  %1208 = vmax.xlane.f32.xlu0 %v1207_v49  ;;  %v4089_v46 = vpack.c.bf16 %v273_v38, %v271_v14  ;;  %v270_v49 = vld [vmem:[%s7573_s3] sm:$0xff] }
 0x1c2   :  { %7823 = vst [vmem:[#allocation61_spill] sm:$0xff] %v5564_v43  ;;  %v886_v6 = vpop.f32.mrb[68].mxu0  ;;  %v1210_v27 = vsel %vm112_vm2, %v5564_v43, -inf  ;;  %v4091_v44 = vpack.c.bf16 %v272_v15, %v270_v49  ;;  %v275_v15 = vld [vmem:[%s7573_s3 + $0x28] sm:$0xff] }
 0x1c3   :  { %v888_v45 = vpop.f32.mrb[69].mxu0  ;;  %v1211_v61 = vmax.f32 %v5566_v7, %v1210_v27  ;;  %v5591_v47 = vmul.f32 %v886_v6, %v388_v62  ;;  %4090 = vmatprep.subr.bf16.mxu1 %v4089_v46  ;;  %v390_v27 = vld [vmem:[%s7572_s2 + $0x230] sm:$0xff]  ;;  %v393_v7 = vld [vmem:[%s7572_s2 + $0x248] sm:$0xff] }
 0x1c4   :  { %v5589_v43 = vmul.f32 %v888_v45, %v389_v4  ;;  %4092 = vmatpush1.bf16.msra.mxu1 %v4091_v44  ;;  %v277_v4 = vld [vmem:[%s7573_s3 + $0x38] sm:$0xff]  ;;  %v276_v44 = vld [vmem:[%s7573_s3 + $0x30] sm:$0xff] }
 0x1c5   :  { %7826 = vst [vmem:[#allocation64_spill] sm:$0xff] %v5591_v47  ;;  %1212 = vmax.xlane.f32.xlu1 %v1211_v61  ;;  %v4093_v45 = vpack.c.bf16 %v277_v4, %v275_v15  ;;  %v274_v61 = vld [vmem:[%s7573_s3 + $0x20] sm:$0xff] }
 0x1c6   :  { %7825 = vst [vmem:[#allocation63_spill] sm:$0xff] %v5589_v43  ;;  %v892_v14 = vpop.f32.mrb[70].mxu0  ;;  %v1214_v38 = vsel %vm112_vm2, %v5589_v43, -inf  ;;  %v4095_v49 = vpack.c.bf16 %v276_v44, %v274_v61  ;;  %v280_v61 = vld [vmem:[%s7573_s3 + $0x50] sm:$0xff] }
 0x1c7   :  { %v894_v62 = vpop.f32.mrb[71].mxu0  ;;  %v1215_v6 = vmax.f32 %v5591_v47, %v1214_v38  ;;  %v5616_v43 = vmul.f32 %v892_v14, %v390_v27  ;;  %4094 = vmatprep.subr.bf16.mxu1 %v4093_v45  ;;  %v392_v38 = vld [vmem:[%s7572_s2 + $0x240] sm:$0xff]  ;;  %v281_v27 = vld [vmem:[%s7573_s3 + $0x58] sm:$0xff] }
 0x1c8   :  { %v5614_v46 = vmul.f32 %v894_v62, %v391_v24  ;;  %4096 = vmatpush1.bf16.msra.mxu1 %v4095_v49  ;;  %v279_v24 = vld [vmem:[%s7573_s3 + $0x48] sm:$0xff]  ;;  %v278_v45 = vld [vmem:[%s7573_s3 + $0x40] sm:$0xff] }
 0x1c9   :  { %7828 = vst [vmem:[#allocation66_spill] sm:$0xff] %v5616_v43  ;;  %1216 = vmax.xlane.f32.xlu0 %v1215_v6  ;;  %v4097_v6 = vpack.c.bf16 %v281_v27, %v279_v24  ;;  %v5641_v49 = vld [vmem:[#allocation2] sm:$0xff]  ;;  %v4099_v47 = vpack.c.bf16 %v280_v61, %v278_v45  ;;  %v394_v27 = vld [vmem:[%s7572_s2 + $0x250] sm:$0xff] }
 0x1ca   :  { %7827 = vst [vmem:[#allocation65_spill] sm:$0xff] %v5614_v46  ;;  %v898_v15 = vpop.f32.mrb[72].mxu0  ;;  %v1218_v4 = vsel %vm112_vm2, %v5614_v46, -inf  ;;  %v282_v61 = vld [vmem:[%s7573_s3 + $0x60] sm:$0xff] }
 0x1cb   :  { %v900_v14 = vpop.f32.mrb[73].mxu0  ;;  %v1219_v62 = vmax.f32 %v5616_v43, %v1218_v4  ;;  %v5643_v46 = vmul.f32 %v898_v15, %v392_v38  ;;  %v395_v4 = vld [vmem:[%s7572_s2 + $0x258] sm:$0xff]  ;;  %4098 = vmatprep.subr.bf16.mxu1 %v4097_v6  ;;  %v283_v38 = vld [vmem:[%s7573_s3 + $0x68] sm:$0xff] }
 0x1cc   :  { %v5639_v44 = vmul.f32 %v900_v14, %v393_v7  ;;  %4100 = vmatpush1.bf16.msra.mxu1 %v4099_v47  ;;  %v285_v15 = vld [vmem:[%s7573_s3 + $0x78] sm:$0xff]  ;;  %v284_v47 = vld [vmem:[%s7573_s3 + $0x70] sm:$0xff] }
 0x1cd   :  { %7830 = vst [vmem:[#allocation68_spill] sm:$0xff] %v5643_v46  ;;  %1220 = vmax.xlane.f32.xlu1 %v1219_v62  ;;  %v4101_v45 = vpack.c.bf16 %v285_v15, %v283_v38  ;;  %v4103_v57 = vpack.c.bf16 %v284_v47, %v282_v61  ;;  %v5699_v61 = vld [vmem:[#allocation2 + $0x10] sm:$0xff] }
 0x1ce   :  { %7829 = vst [vmem:[#allocation67_spill] sm:$0xff] %v5639_v44  ;;  %v1081_v24 = vpop.xlane.xlu0 %1080  ;;  %v904_v43 = vpop.f32.mrb[74].mxu0  ;;  %v1222_v7 = vsel %vm112_vm2, %v5639_v44, -inf }
 0x1cf   :  { %v5660_v14 = vmax.f32 %v5641_v49, %v1081_v24  ;;  %v906_v62 = vpop.f32.mrb[75].mxu0  ;;  %v1223_v6 = vmax.f32 %v5643_v46, %v1222_v7  ;;  %v5675_v24 = vmul.f32 %v904_v43, %v394_v27  ;;  %4102 = vmatprep.subr.bf16.mxu1 %v4101_v45  ;;  %v286_v45 = vld [vmem:[%s7573_s3 + $0x80] sm:$0xff] }
 0x1d0   :  { %v5669_v44 = vmul.f32 %v906_v62, %v395_v4  ;;  %4104 = vmatpush1.bf16.msra.mxu1 %v4103_v57  ;;  %v287_v4 = vld [vmem:[%s7573_s3 + $0x88] sm:$0xff]  ;;  %v289_v62 = vld [vmem:[%s7573_s3 + $0x98] sm:$0xff]  ;;  %v288_v57 = vld [vmem:[%s7573_s3 + $0x90] sm:$0xff] }
 0x1d1   :  { %3305 = vst.msk [vmem:[#allocation2] sm:$0xff] %vm21_vm3, %v5660_v14  ;;  %7832 = vst [vmem:[#allocation70_spill] sm:$0xff] %v5675_v24  ;;  %1224 = vmax.xlane.f32.xlu0 %v1223_v6  ;;  %v4105_v47 = vpack.c.bf16 %v289_v62, %v287_v4  ;;  %v4107_v46 = vpack.c.bf16 %v288_v57, %v286_v45  ;;  %v293_v4 = vld [vmem:[%s7573_s3 + $0xb8] sm:$0xff]  ;;  %v292_v57 = vld [vmem:[%s7573_s3 + $0xb0] sm:$0xff]  ;;  %v1301_v19 = vsub.f32 %v5641_v49, %v5660_v14 }
 0x1d2   :  { %7831 = vst [vmem:[#allocation69_spill] sm:$0xff] %v5669_v44  ;;  %v1085_v7 = vpop.xlane.xlu0 %1084  ;;  %v1226_v38 = vsel %vm112_vm2, %v5669_v44, -inf  ;;  %v5679_v15 = vpop.f32.mrb[76].mxu0  ;;  %v291_v44 = vld [vmem:[%s7573_s3 + $0xa8] sm:$0xff] }
 0x1d3   :  { %v5688_v43 = vmax.f32 %v5671_v21, %v1085_v7  ;;  %v1227_v27 = vmax.f32 %v5675_v24, %v1226_v38  ;;  %v5691_v6 = vpop.f32.mrb[77].mxu0  ;;  %4106 = vmatprep.subr.bf16.mxu1 %v4105_v47  ;;  %v5724_v47 = vld [vmem:[#allocation2 + $0x18] sm:$0xff]  ;;  %v4109_v7 = vpack.c.bf16 %v293_v4, %v291_v44 }
 0x1d4   :  { %4108 = vmatpush1.bf16.msra.mxu1 %v4107_v46 }
 0x1d5   :  { %3306 = vst.msk [vmem:[#allocation2 + $0x8] sm:$0xff] %vm21_vm3, %v5688_v43  ;;  %1228 = vmax.xlane.f32.xlu1 %v1227_v27  ;;  %v290_v27 = vld [vmem:[%s7573_s3 + $0xa0] sm:$0xff]  ;;  %4110 = vmatprep.subr.bf16.mxu1 %v4109_v7  ;;  %v296_v7 = vld [vmem:[%s7573_s3 + $0xd0] sm:$0xff] }
 0x1d6   :  { %v1089_v38 = vpop.xlane.xlu1 %1088  ;;  %v5705_v24 = vpop.f32.mrb[78].mxu0  ;;  %v4111_v60 = vpack.c.bf16 %v292_v57, %v290_v27  ;;  %v294_v27 = vld [vmem:[%s7573_s3 + $0xc0] sm:$0xff] }
 0x1d7   :  { %v5714_v62 = vmax.f32 %v5699_v61, %v1089_v38  ;;  %v5716_v45 = vpop.f32.mrb[79].mxu0  ;;  %v5749_v57 = vld [vmem:[#allocation2 + $0x20] sm:$0xff]  ;;  %v4115_v9 = vpack.c.bf16 %v296_v7, %v294_v27  ;;  %v5772_v27 = vld [vmem:[#allocation2 + $0x28] sm:$0xff] }
 0x1d8   :  { %4112 = vmatpush1.bf16.msra.mxu1 %v4111_v60  ;;  %v299_v60 = vld [vmem:[%s7573_s3 + $0xe8] sm:$0xff] }
 0x1d9   :  { %3307 = vst.msk [vmem:[#allocation2 + $0x10] sm:$0xff] %vm21_vm3, %v5714_v62  ;;  %4114 = vmatprep.subr.bf16.mxu1 %v4113_v18  ;;  %v300_v18 = vld [vmem:[%s7573_s3 + $0xf0] sm:$0xff]  ;;  %v4117_v7 = vpack.c.bf16 %v301_v56, %v299_v60  ;;  %v302_v60 = vld [vmem:[%s7573_s3 + $0x100] sm:$0xff] }
 0x1da   :  { %v1093_v38 = vpop.xlane.xlu1 %1092  ;;  %v5730_v46 = vpop.f32.mrb[80].mxu0  ;;  %v4119_v35 = vpack.c.bf16 %v300_v18, %v298_v31  ;;  %v304_v31 = vld [vmem:[%s7573_s3 + $0x110] sm:$0xff] }
 0x1db   :  { %v5739_v44 = vmax.f32 %v5724_v47, %v1093_v38  ;;  %v5741_v4 = vpop.f32.mrb[81].mxu0  ;;  %v5795_v18 = vld [vmem:[#allocation2 + $0x30] sm:$0xff]  ;;  %v4123_v5 = vpack.c.bf16 %v304_v31, %v302_v60 }
 0x1dc   :  { %4116 = vmatpush1.bf16.msra.mxu1 %v4115_v9  ;;  %v303_v9 = vld [vmem:[%s7573_s3 + $0x108] sm:$0xff] }
 0x1dd   :  { %3308 = vst.msk [vmem:[#allocation2 + $0x18] sm:$0xff] %vm21_vm3, %v5739_v44  ;;  %4118 = vmatprep.subr.bf16.mxu1 %v4117_v7  ;;  %v4121_v7 = vpack.c.bf16 %v305_v17, %v303_v9  ;;  %v307_v17 = vld [vmem:[%s7573_s3 + $0x128] sm:$0xff]  ;;  %v309_v9 = vld [vmem:[%s7573_s3 + $0x138] sm:$0xff] }
 0x1de   :  { %v1097_v38 = vpop.xlane.xlu0 %1096  ;;  %v5753_v28 = vpop.f32.mrb[82].mxu0  ;;  %v4125_v31 = vpack.c.bf16 %v309_v9, %v307_v17  ;;  %v311_v17 = vld [vmem:[%s7573_s3 + $0x148] sm:$0xff]  ;;  %v313_v9 = vld [vmem:[%s7573_s3 + $0x158] sm:$0xff] }
 0x1df   :  { %v5762_v32 = vmax.f32 %v5749_v57, %v1097_v38  ;;  %v5764_v8 = vpop.f32.mrb[83].mxu0  ;;  %v4129_v48 = vpack.c.bf16 %v313_v9, %v311_v17  ;;  %v317_v17 = vld [vmem:[%s7573_s3 + $0x178] sm:$0xff] }
 0x1e0   :  { %4120 = vmatpush1.bf16.msra.mxu1 %v4119_v35  ;;  %v4133_v9 = vpack.c.bf16 %v317_v17, %v315_v23  ;;  %v318_v17 = vld [vmem:[%s7573_s3 + $0x180] sm:$0xff] }
 0x1e1   :  { %3309 = vst.msk [vmem:[#allocation2 + $0x20] sm:$0xff] %vm21_vm3, %v5762_v32  ;;  %4122 = vmatprep.subr.bf16.mxu1 %v4121_v7  ;;  %v308_v7 = vld [vmem:[%s7573_s3 + $0x130] sm:$0xff] }
 0x1e2   :  { %v1101_v38 = vpop.xlane.xlu1 %1100  ;;  %v5776_v55 = vpop.f32.mrb[84].mxu0 }
 0x1e3   :  { %v5785_v1 = vmax.f32 %v5772_v27, %v1101_v38  ;;  %v5787_v56 = vpop.f32.mrb[85].mxu0 }
 0x1e4   :  { %4124 = vmatpush1.bf16.msra.mxu1 %v4123_v5  ;;  %v306_v5 = vld [vmem:[%s7573_s3 + $0x120] sm:$0xff] }
 0x1e5   :  { %3310 = vst.msk [vmem:[#allocation2 + $0x28] sm:$0xff] %vm21_vm3, %v5785_v1  ;;  %v4127_v54 = vpack.c.bf16 %v308_v7, %v306_v5  ;;  %4126 = vmatprep.subr.bf16.mxu1 %v4125_v31  ;;  %v312_v31 = vld [vmem:[%s7573_s3 + $0x150] sm:$0xff]  ;;  %v5843_v7 = vld [vmem:[#allocation2 + $0x48] sm:$0xff] }
 0x1e6   :  { %v1105_v38 = vpop.xlane.xlu0 %1104  ;;  %1440 = vperm.xlu1 %4142, %v5688_v43   ;;  %v5905_v63 = vpop.f32.mrb[86].mxu0 }
 0x1e7   :  { %v5801_v35 = vmax.f32 %v5795_v18, %v1105_v38  ;;  %1435 = vperm.xlu0 %4141, %v5660_v14   ;;  %v5955_v14 = vld [vmem:[#allocation2 + $0x88] sm:$0xff] }
 0x1e8   :  { %4128 = vmatpush1.bf16.msra.mxu1 %v4127_v54 }
 0x1e9   :  { %3311 = vst.msk [vmem:[#allocation2 + $0x30] sm:$0xff] %vm21_vm3, %v5801_v35  ;;  %4130 = vmatprep.subr.bf16.mxu1 %v4129_v48  ;;  %v316_v48 = vld [vmem:[%s7573_s3 + $0x170] sm:$0xff] }
 0x1ea   :  { %v1109_v60 = vpop.xlane.xlu1 %1108  ;;  %1445 = vperm.xlu1 %4142, %v5714_v62  }
 0x1eb   :  { %v5822_v38 = vmax.f32 %v5804_v16, %v1109_v60  ;;  %v310_v60 = vld [vmem:[%s7573_s3 + $0x140] sm:$0xff] }
 0x1ec   :  { %v4131_v5 = vpack.c.bf16 %v312_v31, %v310_v60 }
 0x1ed   :  { %3312 = vst.msk [vmem:[#allocation2 + $0x38] sm:$0xff] %vm21_vm3, %v5822_v38 }
 0x1ee   :  { %v1113_v37 = vpop.xlane.xlu0 %1112  ;;  %4132 = vmatpush1.bf16.msra.mxu1 %v4131_v5  ;;  %v5865_v5 = vld [vmem:[#allocation2 + $0x50] sm:$0xff] }
 0x1ef   :  { %v5841_v54 = vmax.f32 %v5824_v36, %v1113_v37  ;;  %v314_v37 = vld [vmem:[%s7573_s3 + $0x160] sm:$0xff]  ;;  %4134 = vmatprep.subr.bf16.mxu1 %v4133_v9  ;;  %v5875_v9 = vld [vmem:[#allocation2 + $0x58] sm:$0xff] }
 0x1f0   :  { %v4135_v31 = vpack.c.bf16 %v316_v48, %v314_v37  ;;  %v397_v48 = vld [vmem:[%s7572_s2 + $0x268] sm:$0xff] }
 0x1f1   :  { %3313 = vst.msk [vmem:[#allocation2 + $0x40] sm:$0xff] %vm21_vm3, %v5841_v54 }
 0x1f2   :  { %v1117_v60 = vpop.xlane.xlu1 %1116  ;;  %4136 = vmatpush1.bf16.msra.mxu1 %v4135_v31  ;;  %v396_v31 = vld [vmem:[%s7572_s2 + $0x260] sm:$0xff] }
 0x1f3   :  { %v5860_v10 = vmax.f32 %v5843_v7, %v1117_v60  ;;  %2848 = vmatprep.subr.mxu1 %v319_v13  ;;  %v5896_v52 = vmul.f32 %v5679_v15, %v396_v31  ;;  %v5918_v31 = vld [vmem:[#allocation2 + $0x70] sm:$0xff] }
 0x1f4   :  { %7836 = vst [vmem:[#allocation74_spill] sm:$0xff] %v5918_v31 }
 0x1f5   :  { %3314 = vst.msk [vmem:[#allocation2 + $0x48] sm:$0xff] %vm21_vm3, %v5860_v10  ;;  %7835 = vst [vmem:[#allocation73_spill] sm:$0xff] %v5896_v52 }
 0x1f6   :  { %v1121_v23 = vpop.xlane.xlu0 %1120  ;;  %2849 = vmatpush1.msra.mxu1 %v318_v17 }
 0x1f7   :  { %v5873_v37 = vmax.f32 %v5865_v5, %v1121_v23  ;;  %v5889_v23 = vmul.f32 %v5691_v6, %v397_v48  ;;  %v5909_v6 = vpop.f32.mrb[87].mxu0 }
 0x1f9   :  { %3315 = vst.msk [vmem:[#allocation2 + $0x50] sm:$0xff] %vm21_vm3, %v5873_v37  ;;  %7833 = vst [vmem:[#allocation71_spill] sm:$0xff] %v5889_v23 }
 0x1fa   :  { %v1125_v60 = vpop.xlane.xlu1 %1124 }
 0x1fb   :  { %v5883_v13 = vmax.f32 %v5875_v9, %v1125_v60  ;;  %v1230_v60 = vsel %vm112_vm2, %v5889_v23, -inf  ;;  %v398_v23 = vld [vmem:[%s7572_s2 + $0x270] sm:$0xff] }
 0x1fc   :  { %v1231_v40 = vmax.f32 %v5896_v52, %v1230_v60  ;;  %v7838_v52 = vmov 0.0   ;;  %v5934_v30 = vmul.f32 %v5705_v24, %v398_v23  ;;  %v1345_v23 = vmul.f32 1.442695, %v1301_v19 }
 0x1fd   :  { %3316 = vst.msk [vmem:[#allocation2 + $0x58] sm:$0xff] %vm21_vm3, %v5883_v13 }
 0x1fe   :  { %v1129_v0 = vpop.xlane.xlu0 %1128  ;;  %200 = vst.msk [vmem:[#allocation4 + $0x2b8] sm:$0x3f] %vm199_vm4, %v7838_v52  ;;  %7840 = vst [vmem:[#allocation77_spill] sm:$0xff] %v5934_v30  ;;  %4143 = vpow2.f32 %v1345_v23 }
 0x1ff   :  { %v5899_v17 = vmax.f32 %v5891_v22, %v1129_v0  ;;  %v399_v0 = vld [vmem:[%s7572_s2 + $0x278] sm:$0xff]  ;;  %110 = vst.msk [vmem:[#allocation3 + $0x158] sm:$0x3f] %vm65_vm6, %v7838_v52 }
 0x200   :  { %v5926_v29 = vmul.f32 %v5716_v45, %v399_v0  ;;  %v6063_v22 = vld [vmem:[#allocation2 + $0xd8] sm:$0xff] }
 0x201   :  { %3317 = vst.msk [vmem:[#allocation2 + $0x60] sm:$0xff] %vm21_vm3, %v5899_v17 }
 0x202   :  { %v1133_v48 = vpop.xlane.xlu1 %1132  ;;  %7837 = vst [vmem:[#allocation75_spill] sm:$0xff] %v5926_v29 }
 0x203   :  { %v5916_v15 = vmax.f32 %v5903_v53, %v1133_v48 }
 0x205   :  { %3318 = vst.msk [vmem:[#allocation2 + $0x68] sm:$0xff] %vm21_vm3, %v5916_v15 }
 0x206   :  { %v1137_v60 = vpop.xlane.xlu0 %1136  ;;  %1232 = vmax.xlane.f32.xlu0 %v1231_v40  ;;  %v1234_v40 = vsel %vm112_vm2, %v5926_v29, -inf }
 0x207   :  { %v5931_v48 = vmax.f32 %v5918_v31, %v1137_v60  ;;  %v5947_v60 = vld [vmem:[#allocation2 + $0x80] sm:$0xff]  ;;  %v1235_v24 = vmax.f32 %v5934_v30, %v1234_v40  ;;  %v5962_v40 = vld [vmem:[#allocation2 + $0x90] sm:$0xff]  ;;  %v5972_v30 = vld [vmem:[#allocation2 + $0x98] sm:$0xff] }
 0x208   :  { %7841 = vst [vmem:[#allocation78_spill] sm:$0xff] %v5947_v60  ;;  %7843 = vst [vmem:[#allocation80_spill] sm:$0xff] %v5962_v40  ;;  %v5976_v11 = vpop.eup %4143  ;;  %v6044_v31 = vld [vmem:[#allocation2 + $0xd0] sm:$0xff] }
 0x209   :  { %7839 = vst [vmem:[#allocation76_spill] sm:$0xff] %v5931_v48  ;;  %3319 = vst.msk [vmem:[#allocation2 + $0x70] sm:$0xff] %vm21_vm3, %v5931_v48 }
 0x20a   :  { %v1141_v45 = vpop.xlane.xlu1 %1140  ;;  %7846 = vst [vmem:[#allocation82_spill] sm:$0xff] %v5976_v11  ;;  %7856 = vst [vmem:[#allocation92_spill] sm:$0xff] %v6044_v31 }
 0x20b   :  { %v5945_v0 = vmax.f32 %v5936_v39, %v1141_v45 }
 0x20d   :  { %3320 = vst.msk [vmem:[#allocation2 + $0x78] sm:$0xff] %vm21_vm3, %v5945_v0 }
 0x20e   :  { %v1145_v20 = vpop.xlane.xlu0 %1144  ;;  %1236 = vmax.xlane.f32.xlu1 %v1235_v24 }
 0x20f   :  { %v5953_v49 = vmax.f32 %v5947_v60, %v1145_v20  ;;  %v7845_v20 = vsub.f32 %v5671_v21, %v5688_v43  ;;  %v405_v60 = vld [vmem:[%s7572_s2 + $0x2a8] sm:$0xff] }
 0x211   :  { %7842 = vst [vmem:[#allocation79_spill] sm:$0xff] %v5953_v49  ;;  %3321 = vst.msk [vmem:[#allocation2 + $0x80] sm:$0xff] %vm21_vm3, %v5953_v49  ;;  %v1347_v23 = vmul.f32 1.442695, %v7845_v20  ;;  %v5990_v20 = vld [vmem:[#allocation2 + $0xa8] sm:$0xff] }
 0x212   :  { %v1149_v45 = vpop.xlane.xlu1 %1148 }
 0x213   :  { %v5960_v29 = vmax.f32 %v5955_v14, %v1149_v45  ;;  %4145 = vpow2.f32 %v1347_v23 }
 0x215   :  { %3322 = vst.msk [vmem:[#allocation2 + $0x88] sm:$0xff] %vm21_vm3, %v5960_v29 }
 0x216   :  { %v1153_v19 = vpop.xlane.xlu0 %1152 }
 0x217   :  { %v5967_v24 = vmax.f32 %v5962_v40, %v1153_v19  ;;  %v5982_v19 = vld [vmem:[#allocation2 + $0xa0] sm:$0xff] }
 0x218   :  { %7847 = vst [vmem:[#allocation83_spill] sm:$0xff] %v5982_v19  ;;  %v6015_v40 = vld [vmem:[#allocation2 + $0xc0] sm:$0xff] }
 0x219   :  { %7844 = vst [vmem:[#allocation81_spill] sm:$0xff] %v5967_v24  ;;  %3323 = vst.msk [vmem:[#allocation2 + $0x90] sm:$0xff] %vm21_vm3, %v5967_v24  ;;  %v6025_v24 = vld [vmem:[#allocation2 + $0xc8] sm:$0xff] }
 0x21a   :  { %v1157_v45 = vpop.xlane.xlu1 %1156  ;;  %7852 = vst [vmem:[#allocation88_spill] sm:$0xff] %v6015_v40 }
 0x21b   :  { %v5979_v12 = vmax.f32 %v5972_v30, %v1157_v45 }
 0x21c   :  { %2362 = vperm.xlu0 %4141, %v5976_v11   ;;  %v5998_v11 = vld [vmem:[#allocation2 + $0xb0] sm:$0xff] }
 0x21d   :  { %3324 = vst.msk [vmem:[#allocation2 + $0x98] sm:$0xff] %vm21_vm3, %v5979_v12  ;;  %7849 = vst [vmem:[#allocation85_spill] sm:$0xff] %v5998_v11 }
 0x21e   :  { %v1161_v21 = vpop.xlane.xlu0 %1160 }
 0x21f   :  { %v5987_v43 = vmax.f32 %v5982_v19, %v1161_v21  ;;  %1450 = vperm.xlu1 %4142, %v5739_v44   ;;  %v6002_v21 = vpop.eup %4145  ;;  %v6008_v19 = vld [vmem:[#allocation2 + $0xb8] sm:$0xff] }
 0x220   :  { %7850 = vst [vmem:[#allocation86_spill] sm:$0xff] %v6002_v21 }
 0x221   :  { %7848 = vst [vmem:[#allocation84_spill] sm:$0xff] %v5987_v43  ;;  %3325 = vst.msk [vmem:[#allocation2 + $0xa0] sm:$0xff] %vm21_vm3, %v5987_v43 }
 0x222   :  { %v1165_v45 = vpop.xlane.xlu1 %1164 }
 0x223   :  { %v5995_v23 = vmax.f32 %v5990_v20, %v1165_v45  ;;  %1455 = vperm.xlu1 %4142, %v5762_v32  }
 0x225   :  { %3326 = vst.msk [vmem:[#allocation2 + $0xa8] sm:$0xff] %vm21_vm3, %v5995_v23 }
 0x226   :  { %v1169_v2 = vpop.xlane.xlu0 %1168 }
 0x227   :  { %v6005_v3 = vmax.f32 %v5998_v11, %v1169_v2  ;;  %2367 = vperm.xlu1 %4142, %v6002_v21   ;;  %v401_v2 = vld [vmem:[%s7572_s2 + $0x288] sm:$0xff] }
 0x229   :  { %7851 = vst [vmem:[#allocation87_spill] sm:$0xff] %v6005_v3  ;;  %3327 = vst.msk [vmem:[#allocation2 + $0xb0] sm:$0xff] %vm21_vm3, %v6005_v3  ;;  %v6031_v3 = vmul.f32 %v5741_v4, %v401_v2  ;;  %v404_v4 = vld [vmem:[%s7572_s2 + $0x2a0] sm:$0xff]  ;;  %v6050_v2 = vmul.f32 %v5787_v56, %v405_v60 }
 0x22a   :  { %v1173_v45 = vpop.xlane.xlu1 %1172 }
 0x22b   :  { %v6013_v43 = vmax.f32 %v6008_v19, %v1173_v45  ;;  %v400_v45 = vld [vmem:[%s7572_s2 + $0x280] sm:$0xff]  ;;  %7854 = vst [vmem:[#allocation90_spill] sm:$0xff] %v6031_v3  ;;  %7857 = vst [vmem:[#allocation93_spill] sm:$0xff] %v6050_v2  ;;  %v1246_v56 = vsel %vm112_vm2, %v6050_v2, -inf  ;;  %v6083_v2 = vld [vmem:[#allocation2 + $0xe8] sm:$0xff] }
 0x22d   :  { %3328 = vst.msk [vmem:[#allocation2 + $0xb8] sm:$0xff] %vm21_vm3, %v6013_v43 }
 0x22e   :  { %v1177_v11 = vpop.xlane.xlu0 %1176 }
 0x22f   :  { %v6023_v21 = vmax.f32 %v6015_v40, %v1177_v11  ;;  %v6042_v40 = vmul.f32 %v5730_v46, %v400_v45  ;;  %v6060_v46 = vmul.f32 %v5776_v55, %v404_v4 }
 0x231   :  { %7853 = vst [vmem:[#allocation89_spill] sm:$0xff] %v6023_v21  ;;  %3329 = vst.msk [vmem:[#allocation2 + $0xc0] sm:$0xff] %vm21_vm3, %v6023_v21  ;;  %v1238_v21 = vsel %vm112_vm2, %v6031_v3, -inf }
 0x232   :  { %v1181_v49 = vpop.xlane.xlu1 %1180  ;;  %7855 = vst [vmem:[#allocation91_spill] sm:$0xff] %v6042_v40  ;;  %7858 = vst [vmem:[#allocation94_spill] sm:$0xff] %v6060_v46  ;;  %v1239_v45 = vmax.f32 %v6042_v40, %v1238_v21  ;;  %v403_v21 = vld [vmem:[%s7572_s2 + $0x298] sm:$0xff] }
 0x233   :  { %v6039_v11 = vmax.f32 %v6025_v24, %v1181_v49 }
 0x235   :  { %3330 = vst.msk [vmem:[#allocation2 + $0xc8] sm:$0xff] %vm21_vm3, %v6039_v11 }
 0x236   :  { %v1185_v49 = vpop.xlane.xlu0 %1184 }
 0x237   :  { %v6057_v48 = vmax.f32 %v6044_v31, %v1185_v49  ;;  %v1247_v49 = vmax.f32 %v6060_v46, %v1246_v56  ;;  %v6073_v31 = vld [vmem:[#allocation2 + $0xe0] sm:$0xff]  ;;  %v402_v56 = vld [vmem:[%s7572_s2 + $0x290] sm:$0xff] }
 0x238   :  { %7859 = vst [vmem:[#allocation95_spill] sm:$0xff] %v6073_v31  ;;  %v6101_v40 = vmul.f32 %v5753_v28, %v402_v56 }
 0x239   :  { %3331 = vst.msk [vmem:[#allocation2 + $0xd0] sm:$0xff] %vm21_vm3, %v6057_v48 }
 0x23a   :  { %v1189_v60 = vpop.xlane.xlu1 %1188  ;;  %7863 = vst [vmem:[#allocation99_spill] sm:$0xff] %v6101_v40 }
 0x23b   :  { %v6070_v3 = vmax.f32 %v6063_v22, %v1189_v60  ;;  %1240 = vmax.xlane.f32.xlu0 %v1239_v45  ;;  %v1304_v45 = vsub.f32 %v5724_v47, %v5739_v44  ;;  %v6093_v60 = vmul.f32 %v5764_v8, %v403_v21  ;;  %v1306_v44 = vsub.f32 %v5772_v27, %v5785_v1  ;;  %v6120_v27 = vld [vmem:[#allocation2 + $0x100] sm:$0xff] }
 0x23c   :  { %7864 = vst [vmem:[#allocation100_spill] sm:$0xff] %v6120_v27 }
 0x23d   :  { %3332 = vst.msk [vmem:[#allocation2 + $0xd8] sm:$0xff] %vm21_vm3, %v6070_v3  ;;  %7861 = vst [vmem:[#allocation97_spill] sm:$0xff] %v6093_v60  ;;  %v1351_v47 = vmul.f32 1.442695, %v1304_v45  ;;  %v1242_v8 = vsel %vm112_vm2, %v6093_v60, -inf }
 0x23e   :  { %v1193_v55 = vpop.xlane.xlu0 %1192  ;;  %v1243_v28 = vmax.f32 %v6101_v40, %v1242_v8  ;;  %v1355_v56 = vmul.f32 1.442695, %v1306_v44  ;;  %v7865_v44 = vsub.f32 %v5699_v61, %v5714_v62  ;;  %v1310_v61 = vsub.f32 %v5843_v7, %v5860_v10  ;;  %v6162_v7 = vld [vmem:[#allocation2 + $0x120] sm:$0xff] }
 0x23f   :  { %v6081_v4 = vmax.f32 %v6073_v31, %v1193_v55  ;;  %1248 = vmax.xlane.f32.xlu0 %v1247_v49  ;;  %v6098_v49 = vld [vmem:[#allocation2 + $0xf0] sm:$0xff]  ;;  %4147 = vpow2.f32 %v1351_v47  ;;  %v6129_v47 = vld [vmem:[#allocation2 + $0x108] sm:$0xff]  ;;  %7870 = vst [vmem:[#allocation105_spill] sm:$0xff] %v6162_v7 }
 0x240   :  { %7862 = vst [vmem:[#allocation98_spill] sm:$0xff] %v6098_v49  ;;  %4149 = vpow2.f32 %v1355_v56  ;;  %v1349_v8 = vmul.f32 1.442695, %v7865_v44  ;;  %v6153_v44 = vld [vmem:[#allocation2 + $0x118] sm:$0xff] }
 0x241   :  { %7860 = vst [vmem:[#allocation96_spill] sm:$0xff] %v6081_v4  ;;  %3333 = vst.msk [vmem:[#allocation2 + $0xe0] sm:$0xff] %vm21_vm3, %v6081_v4 }
 0x242   :  { %v1197_v46 = vpop.xlane.xlu1 %1196  ;;  %4151 = vpow2.f32 %v1349_v8  ;;  %v1363_v8 = vmul.f32 1.442695, %v1310_v61 }
 0x243   :  { %v6096_v55 = vmax.f32 %v6083_v2, %v1197_v46  ;;  %v6112_v46 = vld [vmem:[#allocation2 + $0xf8] sm:$0xff] }
 0x245   :  { %3334 = vst.msk [vmem:[#allocation2 + $0xe8] sm:$0xff] %vm21_vm3, %v6096_v55 }
 0x246   :  { %v1201_v31 = vpop.xlane.xlu0 %1200 }
 0x247   :  { %v6110_v21 = vmax.f32 %v6098_v49, %v1201_v31  ;;  %v1308_v31 = vsub.f32 %v5804_v16, %v5822_v38  ;;  %v6141_v16 = vld [vmem:[#allocation2 + $0x110] sm:$0xff] }
 0x248   :  { %7867 = vst [vmem:[#allocation102_spill] sm:$0xff] %v6141_v16 }
 0x249   :  { %3335 = vst.msk [vmem:[#allocation2 + $0xf0] sm:$0xff] %vm21_vm3, %v6110_v21  ;;  %v6139_v40 = vpop.eup %4147 }
 0x24a   :  { %v1205_v45 = vpop.xlane.xlu1 %1204  ;;  %7866 = vst [vmem:[#allocation101_spill] sm:$0xff] %v6139_v40 }
 0x24b   :  { %v6118_v4 = vmax.f32 %v6112_v46, %v1205_v45  ;;  %1244 = vmax.xlane.f32.xlu1 %v1243_v28  ;;  %v1359_v28 = vmul.f32 1.442695, %v1308_v31  ;;  %v6151_v31 = vpop.eup %4149 }
 0x24c   :  { %7869 = vst [vmem:[#allocation104_spill] sm:$0xff] %v6151_v31 }
 0x24d   :  { %3336 = vst.msk [vmem:[#allocation2 + $0xf8] sm:$0xff] %vm21_vm3, %v6118_v4  ;;  %4153 = vpow2.f32 %v1359_v28 }
 0x24e   :  { %v1209_v60 = vpop.xlane.xlu0 %1208  ;;  %4155 = vpow2.f32 %v1363_v8 }
 0x24f   :  { %v6127_v49 = vmax.f32 %v6120_v27, %v1209_v60 }
 0x251   :  { %3337 = vst.msk [vmem:[#allocation2 + $0x100] sm:$0xff] %vm21_vm3, %v6127_v49 }
 0x252   :  { %v1213_v45 = vpop.xlane.xlu1 %1212 }
 0x253   :  { %v6137_v56 = vmax.f32 %v6129_v47, %v1213_v45 }
 0x255   :  { %3338 = vst.msk [vmem:[#allocation2 + $0x108] sm:$0xff] %vm21_vm3, %v6137_v56  ;;  %2377 = vperm.xlu0 %4141, %v6139_v40  }
 0x256   :  { %v1217_v62 = vpop.xlane.xlu0 %1216 }
 0x257   :  { %v6149_v60 = vmax.f32 %v6141_v16, %v1217_v62  ;;  %v1312_v62 = vsub.f32 %v5875_v9, %v5883_v13  ;;  %v1314_v9 = vsub.f32 %v5903_v53, %v5916_v15 }
 0x259   :  { %7868 = vst [vmem:[#allocation103_spill] sm:$0xff] %v6149_v60  ;;  %3339 = vst.msk [vmem:[#allocation2 + $0x110] sm:$0xff] %vm21_vm3, %v6149_v60  ;;  %2387 = vperm.xlu0 %4141, %v6151_v31   ;;  %v6169_v31 = vpop.eup %4151 }
 0x25a   :  { %v1221_v45 = vpop.xlane.xlu1 %1220  ;;  %7871 = vst [vmem:[#allocation106_spill] sm:$0xff] %v6169_v31 }
 0x25b   :  { %v6159_v28 = vmax.f32 %v6153_v44, %v1221_v45  ;;  %v6174_v45 = vpop.eup %4153 }
 0x25c   :  { %1460 = vperm.xlu1 %4142, %v5785_v1   ;;  %7873 = vst [vmem:[#allocation108_spill] sm:$0xff] %v6174_v45  ;;  %v6177_v1 = vld [vmem:[#allocation2 + $0x128] sm:$0xff] }
 0x25d   :  { %3340 = vst.msk [vmem:[#allocation2 + $0x118] sm:$0xff] %vm21_vm3, %v6159_v28  ;;  %1480 = vperm.xlu0 %4141, %v5860_v10   ;;  %7874 = vst [vmem:[#allocation109_spill] sm:$0xff] %v6177_v1  ;;  %v1367_v10 = vmul.f32 1.442695, %v1312_v62 }
 0x25e   :  { %v1225_v40 = vpop.xlane.xlu0 %1224 }
 0x25f   :  { %v6172_v61 = vmax.f32 %v6162_v7, %v1225_v40  ;;  %4157 = vpow2.f32 %v1367_v10  ;;  %v1371_v40 = vmul.f32 1.442695, %v1314_v9 }
 0x260   :  { %2372 = vperm.xlu1 %4142, %v6169_v31  }
 0x261   :  { %7872 = vst [vmem:[#allocation107_spill] sm:$0xff] %v6172_v61  ;;  %3341 = vst.msk [vmem:[#allocation2 + $0x120] sm:$0xff] %vm21_vm3, %v6172_v61  ;;  %2397 = vperm.xlu0 %4141, %v6174_v45   ;;  %v6194_v61 = vpop.eup %4155  ;;  %4159 = vpow2.f32 %v1371_v40 }
 0x262   :  { %v1229_v8 = vpop.xlane.xlu1 %1228  ;;  %7875 = vst [vmem:[#allocation110_spill] sm:$0xff] %v6194_v61 }
 0x263   :  { %v6185_v16 = vmax.f32 %v6177_v1, %v1229_v8 }
 0x264   :  { %1465 = vperm.xlu1 %4142, %v5801_v35  }
 0x265   :  { %3342 = vst.msk [vmem:[#allocation2 + $0x128] sm:$0xff] %vm21_vm3, %v6185_v16  ;;  %1490 = vperm.xlu0 %4141, %v5883_v13  }
 0x266   :  { %v1436_v31 = vpop.permute.xlu0 %1435  ;;  %v1441_v7 = vpop.permute.xlu1 %1440 }
 0x267   :  { %v1653_v62 = vsub.f32 %v4947_v26, %v1436_v31  ;;  %v1654_v45 = vsub.f32 %v4945_v25, %v1436_v31  ;;  %v1655_v53 = vsub.f32 %v4960_v34, %v1441_v7  ;;  %v1656_v8 = vsub.f32 %v4958_v33, %v1441_v7 }
 0x268   :  { %v1316_v33 = vsub.f32 %v5936_v39, %v5945_v0 }
 0x269   :  { %v1741_v1 = vmul.f32 1.442695, %v1653_v62  ;;  %v1743_v60 = vmul.f32 1.442695, %v1654_v45  ;;  %v1745_v27 = vmul.f32 1.442695, %v1655_v53  ;;  %2407 = vperm.xlu0 %4141, %v6194_v61   ;;  %v6203_v31 = vpop.eup %4157 }
 0x26a   :  { %v1747_v13 = vmul.f32 1.442695, %v1656_v8  ;;  %v1446_v10 = vpop.permute.xlu1 %1445  ;;  %7876 = vst [vmem:[#allocation111_spill] sm:$0xff] %v6203_v31  ;;  %v1375_v7 = vmul.f32 1.442695, %v1316_v33 }
 0x26b   :  { %4161 = vpow2.f32 %v1741_v1  ;;  %v1657_v9 = vsub.f32 %v4973_v42, %v1446_v10  ;;  %v1658_v26 = vsub.f32 %v4971_v41, %v1446_v10  ;;  %v6206_v42 = vpop.eup %4159  ;;  %v407_v8 = vld [vmem:[%s7572_s2 + $0x2b8] sm:$0x3f] }
 0x26c   :  { %4163 = vpow2.f32 %v1743_v60  ;;  %7877 = vst [vmem:[#allocation112_spill] sm:$0xff] %v6206_v42 }
 0x26d   :  { %4165 = vpow2.f32 %v1745_v27  ;;  %v1749_v25 = vmul.f32 1.442695, %v1657_v9  ;;  %v1751_v34 = vmul.f32 1.442695, %v1658_v26  ;;  %1500 = vperm.xlu0 %4141, %v5916_v15   ;;  %v1318_v15 = vsub.f32 %v5955_v14, %v5960_v29  ;;  %v406_v14 = vld [vmem:[%s7572_s2 + $0x2b0] sm:$0x3f] }
 0x26e   :  { %4167 = vpow2.f32 %v1747_v13  ;;  %v6232_v26 = vmul.f32 %v5905_v63, %v406_v14 }
 0x26f   :  { %4169 = vpow2.f32 %v1749_v25  ;;  %v1379_v53 = vmul.f32 1.442695, %v1318_v15  ;;  %v6235_v25 = vmul.f32 %v5909_v6, %v407_v8 }
 0x270   :  { %4171 = vpow2.f32 %v1751_v34  ;;  %7878 = vst [vmem:[#allocation113_spill] sm:$0xff] %v6232_v26  ;;  %v1320_v34 = vsub.f32 %v5972_v30, %v5979_v12  ;;  %v1322_v30 = vsub.f32 %v5990_v20, %v5995_v23  ;;  %v6260_v20 = vld [vmem:[#allocation2 + $0x130] sm:$0xff] }
 0x271   :  { %2417 = vperm.xlu0 %4141, %v6203_v31   ;;  %4173 = vpow2.f32 %v1375_v7  ;;  %7879 = vst [vmem:[#allocation114_spill] sm:$0xff] %v6235_v25  ;;  %v1251_v7 = vsel %vm1250_vm5, %v6232_v26, -inf }
 0x272   :  { %4175 = vpow2.f32 %v1379_v53  ;;  %v1383_v63 = vmul.f32 1.442695, %v1320_v34  ;;  %v1387_v15 = vmul.f32 1.442695, %v1322_v30 }
 0x274   :  { %4177 = vpow2.f32 %v1383_v63 }
 0x275   :  { %v4162_v41 = vpop.eup %4161  ;;  %1510 = vperm.xlu0 %4141, %v5945_v0   ;;  %4179 = vpow2.f32 %v1387_v15 }
 0x276   :  { %v4164_v27 = vpop.eup %4163 }
 0x277   :  { %v4166_v60 = vpop.eup %4165  ;;  %3997 = vmatprep.mubr.msk.f32.mxu1 %vm112_vm2, %v4164_v27  ;;  %v2005_v39 = vsel %vm112_vm2, %v4164_v27, 0.0  ;;  %v1305_v27 = vsub.f32 %v5749_v57, %v5762_v32  ;;  %v1307_v32 = vsub.f32 %v5795_v18, %v5801_v35  ;;  %v6280_v18 = vld [vmem:[#allocation2 + $0x138] sm:$0xff]  ;;  %v1309_v35 = vsub.f32 %v5824_v36, %v5841_v54 }
 0x278   :  { %v4168_v45 = vpop.eup %4167  ;;  %2865 = vmatmul.mubr.f32.vlgmr.msra.gmra.mrb[0].mxu1 %v4162_v41  ;;  %v6213_v1 = vadd.f32 %v4162_v41, %v2005_v39 }
 0x279   :  { %v4170_v40 = vpop.eup %4169  ;;  %3998 = vmatprep.mubr.msk.f32.mxu1 %vm112_vm2, %v4168_v45  ;;  %2427 = vperm.xlu0 %4141, %v6206_v42   ;;  %v2009_v0 = vsel %vm112_vm2, %v4168_v45, 0.0  ;;  %v7883_v45 = vmov -inf   ;;  %v1361_v14 = vmul.f32 1.442695, %v1309_v35  ;;  %v7891_v35 = vld [vmem:[#allocation74_spill] sm:$0xff] }
 0x27a   :  { %v4172_v62 = vpop.eup %4171  ;;  %v6224_v13 = vadd.f32 %v4166_v60, %v2009_v0  ;;  %66 = vst.msk [vmem:[#allocation2 + $0x158] sm:$0x3f] %vm65_vm6, %v7883_v45  ;;  %v1326_v0 = vsub.f32 %v6025_v24, %v6039_v11 }
 0x27b   :  { %v2013_v10 = vsel %vm112_vm2, %v4172_v62, 0.0  ;;  %v6239_v33 = vpop.eup %4173 }
 0x27c   :  { %2871 = vmatmul.mubr.f32.gmra.mrb[2].mxu1 %v4166_v60  ;;  %v6227_v9 = vadd.f32 %v4170_v40, %v2013_v10  ;;  %7880 = vst [vmem:[#allocation115_spill] sm:$0xff] %v6239_v33  ;;  %v6249_v6 = vpop.eup %4175  ;;  %v1353_v60 = vmul.f32 1.442695, %v1305_v27 }
 0x27d   :  { %3999 = vmatprep.mubr.msk.f32.mxu1 %vm112_vm2, %v4172_v62  ;;  %1520 = vperm.xlu0 %4141, %v5960_v29   ;;  %v1253_v29 = vsel %vm199_vm4, %v6235_v25, -inf  ;;  %7881 = vst [vmem:[#allocation116_spill] sm:$0xff] %v6249_v6 }
 0x27e   :  { %v1254_v41 = vmax.f32 %v1251_v7, %v1253_v29  ;;  %v6257_v39 = vpop.eup %4177  ;;  %4181 = vpow2.f32 %v1353_v60 }
 0x27f   :  { %7882 = vst [vmem:[#allocation117_spill] sm:$0xff] %v6257_v39  ;;  %v6276_v52 = vpop.eup %4179 }
 0x280   :  { %2877 = vmatmul.mubr.f32.gmra.mrb[4].mxu1 %v4170_v40  ;;  %v1357_v40 = vmul.f32 1.442695, %v1307_v32  ;;  %7884 = vst [vmem:[#allocation118_spill] sm:$0xff] %v6276_v52 }
 0x281   :  { %2437 = vperm.xlu0 %4141, %v6239_v33  }
 0x285   :  { %1530 = vperm.xlu0 %4141, %v5979_v12   ;;  %v1324_v12 = vsub.f32 %v6008_v19, %v6013_v43 }
 0x287   :  { %v1391_v57 = vmul.f32 1.442695, %v1324_v12  ;;  %v1332_v12 = vsub.f32 %v6112_v46, %v6118_v4  ;;  %v7890_v46 = vld [vmem:[#allocation76_spill] sm:$0xff] }
 0x288   :  { %1255 = vmax.xlane.f32.xlu1 %v1254_v41  ;;  %v6284_v53 = vpop.eup %4181 }
 0x289   :  { %2447 = vperm.xlu0 %4141, %v6249_v6   ;;  %4183 = vpow2.f32 %v1391_v57  ;;  %v7933_v6 = vld [vmem:[#allocation9_spill] sm:$0xff] }
 0x28a   :  { %4185 = vpow2.f32 %v1357_v40  ;;  %v1407_v40 = vmul.f32 1.442695, %v1332_v12  ;;  %v7903_v12 = vld [vmem:[#allocation83_spill] sm:$0xff] }
 0x28d   :  { %1540 = vperm.xlu0 %4141, %v5995_v23  }
 0x291   :  { %2457 = vperm.xlu0 %4141, %v6257_v39  }
 0x293   :  { %v1233_v23 = vpop.xlane.xlu0 %1232  ;;  %v6295_v8 = vpop.eup %4183 }
 0x294   :  { %v6269_v19 = vmax.f32 %v6260_v20, %v1233_v23  ;;  %7885 = vst [vmem:[#allocation119_spill] sm:$0xff] %v6295_v8  ;;  %v6303_v41 = vpop.eup %4185 }
 0x295   :  { %1550 = vperm.xlu0 %4141, %v6013_v43   ;;  %v1395_v43 = vmul.f32 1.442695, %v1326_v0 }
 0x296   :  { %3343 = vst.msk [vmem:[#allocation2 + $0x130] sm:$0xff] %vm21_vm3, %v6269_v19 }
 0x297   :  { %4187 = vpow2.f32 %v1395_v43  ;;  %v1315_v43 = vsub.f32 %v7891_v35, %v7890_v46 }
 0x298   :  { %4189 = vpow2.f32 %v1361_v14 }
 0x299   :  { %2467 = vperm.xlu0 %4141, %v6276_v52   ;;  %1470 = vperm.xlu1 %4142, %v5822_v38   ;;  %v1328_v38 = vsub.f32 %v6063_v22, %v6070_v3  ;;  %v1311_v22 = vsub.f32 %v5865_v5, %v5873_v37  ;;  %v7932_v52 = vld [vmem:[#allocation10_spill] sm:$0xff] }
 0x29b   :  { %v1237_v62 = vpop.xlane.xlu1 %1236  ;;  %v1365_v5 = vmul.f32 1.442695, %v1311_v22 }
 0x29c   :  { %v6287_v24 = vmax.f32 %v6280_v18, %v1237_v62 }
 0x29d   :  { %1560 = vperm.xlu0 %4141, %v6039_v11   ;;  %2382 = vperm.xlu1 %4142, %v6284_v53   ;;  %v1399_v11 = vmul.f32 1.442695, %v1328_v38 }
 0x29e   :  { %3344 = vst.msk [vmem:[#allocation2 + $0x138] sm:$0xff] %vm21_vm3, %v6287_v24 }
 0x29f   :  { %v1451_v36 = vpop.permute.xlu1 %1450 }
 0x2a0   :  { %v1659_v10 = vsub.f32 %v5173_v51, %v1451_v36  ;;  %v1660_v34 = vsub.f32 %v5169_v50, %v1451_v36  ;;  %v1330_v50 = vsub.f32 %v6083_v2, %v6096_v55  ;;  %v1373_v36 = vmul.f32 1.442695, %v1315_v43 }
 0x2a1   :  { %2477 = vperm.xlu0 %4141, %v6295_v8   ;;  %1475 = vperm.xlu1 %4142, %v5841_v54   ;;  %v6311_v15 = vpop.eup %4187 }
 0x2a2   :  { %v1753_v7 = vmul.f32 1.442695, %v1659_v10  ;;  %v1755_v29 = vmul.f32 1.442695, %v1660_v34  ;;  %7886 = vst [vmem:[#allocation120_spill] sm:$0xff] %v6311_v15  ;;  %v6317_v60 = vpop.eup %4189 }
 0x2a3   :  { %v1456_v63 = vpop.permute.xlu1 %1455 }
 0x2a4   :  { %4191 = vpow2.f32 %v1753_v7  ;;  %v1661_v30 = vsub.f32 %v5189_v59, %v1456_v63  ;;  %v1662_v51 = vsub.f32 %v5187_v58, %v1456_v63  ;;  %v1403_v58 = vmul.f32 1.442695, %v1330_v50  ;;  %v7887_v59 = vld [vmem:[#allocation72_spill] sm:$0xff]  ;;  %v7895_v7 = vld [vmem:[#allocation78_spill] sm:$0xff]  ;;  %v7898_v63 = vld [vmem:[#allocation81_spill] sm:$0xff]  ;;  %v6359_v50 = vpop.permute.xlu0 %2362 }
 0x2a5   :  { %4193 = vpow2.f32 %v1755_v29  ;;  %1570 = vperm.xlu0 %4141, %v6070_v3   ;;  %2392 = vperm.xlu1 %4142, %v6303_v41   ;;  %v1313_v3 = vsub.f32 %v7887_v59, %v5899_v17  ;;  %7888 = vst [vmem:[#allocation72_spill] sm:$0xff] %v6317_v60 }
 0x2a6   :  { %4195 = vpow2.f32 %v1399_v11  ;;  %v1757_v54 = vmul.f32 1.442695, %v1661_v30  ;;  %v1759_v27 = vmul.f32 1.442695, %v1662_v51  ;;  %v7894_v11 = vld [vmem:[#allocation79_spill] sm:$0xff]  ;;  %v7899_v30 = vld [vmem:[#allocation80_spill] sm:$0xff] }
 0x2a7   :  { %v1369_v32 = vmul.f32 1.442695, %v1313_v3  ;;  %v1319_v51 = vsub.f32 %v7899_v30, %v7898_v63  ;;  %v6374_v3 = vld [vmem:[#allocation2 + $0x150] sm:$0xff]  ;;  %v6392_v43 = vpop.permute.xlu1 %2367 }
 0x2a8   :  { %4197 = vpow2.f32 %v1757_v54 }
 0x2a9   :  { %4199 = vpow2.f32 %v1759_v27  ;;  %2487 = vperm.xlu0 %4141, %v6311_v15   ;;  %1485 = vperm.xlu1 %4142, %v5873_v37   ;;  %v1381_v27 = vmul.f32 1.442695, %v1319_v51 }
 0x2aa   :  { %4201 = vpow2.f32 %v1365_v5 }
 0x2ab   :  { %4203 = vpow2.f32 %v1403_v58 }
 0x2ac   :  { %4205 = vpow2.f32 %v1369_v32 }
 0x2ad   :  { %1580 = vperm.xlu0 %4141, %v6096_v55   ;;  %2402 = vperm.xlu1 %4142, %v6317_v60   ;;  %4207 = vpow2.f32 %v1407_v40 }
 0x2ae   :  { %v4192_v2 = vpop.eup %4191  ;;  %4209 = vpow2.f32 %v1373_v36  ;;  %v6399_v36 = vld [vmem:[#allocation2 + $0x148] sm:$0xff] }
 0x2af   :  { %v4194_v45 = vpop.eup %4193 }
 0x2b0   :  { %v6323_v57 = vpop.eup %4195  ;;  %4000 = vmatprep.mubr.msk.f32.mxu1 %vm112_vm2, %v4194_v45  ;;  %v2017_v37 = vsel %vm112_vm2, %v4194_v45, 0.0 }
 0x2b1   :  { %7889 = vst [vmem:[#allocation121_spill] sm:$0xff] %v6323_v57  ;;  %2883 = vmatmul.mubr.f32.gmra.mrb[6].mxu1 %v4192_v2  ;;  %2497 = vperm.xlu0 %4141, %v6323_v57   ;;  %v6328_v23 = vadd.f32 %v4192_v2, %v2017_v37  ;;  %v7902_v2 = vld [vmem:[#allocation84_spill] sm:$0xff] }
 0x2b2   :  { %v4198_v55 = vpop.eup %4197  ;;  %1495 = vperm.xlu1 %4142, %v5899_v17   ;;  %v1334_v17 = vsub.f32 %v6129_v47, %v6137_v56  ;;  %v1321_v45 = vsub.f32 %v7903_v12, %v7902_v2 }
 0x2b3   :  { %v4200_v0 = vpop.eup %4199 }
 0x2b4   :  { %4001 = vmatprep.mubr.msk.f32.mxu1 %vm112_vm2, %v4200_v0  ;;  %v2021_v62 = vsel %vm112_vm2, %v4200_v0, 0.0  ;;  %v6335_v14 = vpop.eup %4201  ;;  %v1411_v34 = vmul.f32 1.442695, %v1334_v17  ;;  %v1385_v40 = vmul.f32 1.442695, %v1321_v45  ;;  %v7905_v0 = vld [vmem:[#allocation87_spill] sm:$0xff] }
 0x2b5   :  { %7892 = vst [vmem:[#allocation76_spill] sm:$0xff] %v6335_v14  ;;  %2889 = vmatmul.mubr.f32.gmra.mrb[8].mxu1 %v4198_v55  ;;  %1590 = vperm.xlu0 %4141, %v6118_v4   ;;  %v6338_v38 = vadd.f32 %v4198_v55, %v2021_v62  ;;  %v6343_v10 = vpop.eup %4203  ;;  %v1317_v4 = vsub.f32 %v7895_v7, %v7894_v11  ;;  %v7912_v45 = vld [vmem:[#allocation5_spill] sm:$0xff] }
 0x2b6   :  { %2412 = vperm.xlu1 %4142, %v6335_v14   ;;  %7893 = vst [vmem:[#allocation74_spill] sm:$0xff] %v6343_v10  ;;  %v6349_v29 = vpop.eup %4205  ;;  %4211 = vpow2.f32 %v1411_v34 }
 0x2b7   :  { %7896 = vst [vmem:[#allocation79_spill] sm:$0xff] %v6349_v29  ;;  %v1377_v47 = vmul.f32 1.442695, %v1317_v4  ;;  %v6353_v22 = vpop.eup %4207 }
 0x2b8   :  { %7897 = vst [vmem:[#allocation78_spill] sm:$0xff] %v6353_v22  ;;  %v6361_v54 = vpop.eup %4209 }
 0x2b9   :  { %2507 = vperm.xlu0 %4141, %v6343_v10   ;;  %4213 = vpow2.f32 %v1377_v47  ;;  %7900 = vst [vmem:[#allocation81_spill] sm:$0xff] %v6361_v54  ;;  %v7908_v47 = vld [vmem:[#allocation89_spill] sm:$0xff] }
 0x2ba   :  { %1505 = vperm.xlu1 %4142, %v7890_v46   ;;  %4215 = vpow2.f32 %v1381_v27  ;;  %v7906_v46 = vld [vmem:[#allocation85_spill] sm:$0xff] }
 0x2bb   :  { %4217 = vpow2.f32 %v1385_v40  ;;  %v1323_v35 = vsub.f32 %v7906_v46, %v7905_v0 }
 0x2bd   :  { %1600 = vperm.xlu0 %4141, %v6137_v56   ;;  %v6365_v56 = vld [vmem:[#allocation2 + $0x140] sm:$0xff]  ;;  %v1389_v34 = vmul.f32 1.442695, %v1323_v35 }
 0x2be   :  { %2422 = vperm.xlu1 %4142, %v6349_v29  }
 0x2bf   :  { %4219 = vpow2.f32 %v1389_v34 }
 0x2c0   :  { %v6367_v5 = vpop.eup %4211 }
 0x2c1   :  { %2517 = vperm.xlu0 %4141, %v6353_v22   ;;  %7901 = vst [vmem:[#allocation80_spill] sm:$0xff] %v6367_v5 }
 0x2c2   :  { %1515 = vperm.xlu1 %4142, %v7894_v11  }
 0x2c3   :  { %v6380_v37 = vpop.eup %4213 }
 0x2c4   :  { %7904 = vst [vmem:[#allocation84_spill] sm:$0xff] %v6380_v37  ;;  %v6396_v17 = vpop.eup %4215 }
 0x2c5   :  { %1610 = vperm.xlu0 %4141, %v6159_v28   ;;  %7907 = vst [vmem:[#allocation83_spill] sm:$0xff] %v6396_v17 }
 0x2c6   :  { %2432 = vperm.xlu1 %4142, %v6361_v54  }
 0x2c8   :  { %v1241_v58 = vpop.xlane.xlu0 %1240 }
 0x2c9   :  { %2527 = vperm.xlu0 %4141, %v6367_v5   ;;  %v6371_v59 = vmax.f32 %v6365_v56, %v1241_v58  ;;  %v6413_v58 = vpop.eup %4217 }
 0x2ca   :  { %1525 = vperm.xlu1 %4142, %v7898_v63   ;;  %v7909_v63 = vld [vmem:[#allocation88_spill] sm:$0xff]  ;;  %7910 = vst [vmem:[#allocation87_spill] sm:$0xff] %v6413_v58 }
 0x2cb   :  { %3345 = vst.msk [vmem:[#allocation2 + $0x140] sm:$0xff] %vm21_vm3, %v6371_v59  ;;  %v1325_v30 = vsub.f32 %v7909_v63, %v7908_v47 }
 0x2cc   :  { %v1249_v32 = vpop.xlane.xlu0 %1248 }
 0x2cd   :  { %1620 = vperm.xlu0 %4141, %v6185_v16   ;;  %v6384_v55 = vmax.f32 %v6374_v3, %v1249_v32  ;;  %v1393_v40 = vmul.f32 1.442695, %v1325_v30  ;;  %v7915_v30 = vld [vmem:[#allocation8_spill] sm:$0xff] }
 0x2ce   :  { %2442 = vperm.xlu1 %4142, %v6380_v37  }
 0x2cf   :  { %3347 = vst.msk [vmem:[#allocation2 + $0x150] sm:$0xff] %vm21_vm3, %v6384_v55 }
 0x2d2   :  { %1535 = vperm.xlu1 %4142, %v7902_v2   ;;  %v7911_v2 = vld [vmem:[#allocation6_spill] sm:$0xff] }
 0x2d4   :  { %v6394_v62 = vpop.permute.xlu0 %2377 }
 0x2d6   :  { %2452 = vperm.xlu1 %4142, %v6396_v17  }
 0x2d8   :  { %v1245_v11 = vpop.xlane.xlu1 %1244  ;;  %v6401_v7 = vpop.permute.xlu0 %2387 }
 0x2d9   :  { %v6404_v4 = vmax.f32 %v6399_v36, %v1245_v11  ;;  %v7913_v11 = vld [vmem:[#allocation92_spill] sm:$0xff] }
 0x2da   :  { %1545 = vperm.xlu1 %4142, %v7905_v0   ;;  %v1327_v63 = vsub.f32 %v7913_v11, %v6057_v48  ;;  %v7918_v11 = vld [vmem:[#allocation95_spill] sm:$0xff] }
 0x2db   :  { %3346 = vst.msk [vmem:[#allocation2 + $0x148] sm:$0xff] %vm21_vm3, %v6404_v4 }
 0x2dc   :  { %v1461_v51 = vpop.permute.xlu1 %1460  ;;  %v6411_v27 = vpop.permute.xlu0 %1480  ;;  %v1397_v22 = vmul.f32 1.442695, %v1327_v63 }
 0x2dd   :  { %v1663_v12 = vsub.f32 %v7911_v2, %v1461_v51  ;;  %v1664_v32 = vsub.f32 %v7912_v45, %v1461_v51  ;;  %v6427_v51 = vpop.eup %4219  ;;  %v7916_v45 = vld [vmem:[#allocation7_spill] sm:$0xff] }
 0x2de   :  { %2462 = vperm.xlu1 %4142, %v6413_v58   ;;  %7914 = vst [vmem:[#allocation85_spill] sm:$0xff] %v6427_v51  ;;  %v7937_v58 = vld [vmem:[#allocation11_spill] sm:$0xff] }
 0x2df   :  { %v1761_v0 = vmul.f32 1.442695, %v1663_v12  ;;  %v1763_v46 = vmul.f32 1.442695, %v1664_v32 }
 0x2e0   :  { %v6418_v35 = vpop.permute.xlu1 %2372  ;;  %v6420_v34 = vpop.permute.xlu0 %2397 }
 0x2e1   :  { %4221 = vpow2.f32 %v1761_v0 }
 0x2e2   :  { %4223 = vpow2.f32 %v1763_v46  ;;  %1555 = vperm.xlu1 %4142, %v7908_v47  }
 0x2e3   :  { %4225 = vpow2.f32 %v1393_v40  ;;  %v7917_v40 = vld [vmem:[#allocation96_spill] sm:$0xff] }
 0x2e4   :  { %v1466_v2 = vpop.permute.xlu1 %1465  ;;  %v6425_v5 = vpop.permute.xlu0 %1490  ;;  %v1329_v57 = vsub.f32 %v7918_v11, %v7917_v40 }
 0x2e5   :  { %v1665_v12 = vsub.f32 %v7915_v30, %v1466_v2  ;;  %v1666_v32 = vsub.f32 %v7916_v45, %v1466_v2 }
 0x2e6   :  { %2472 = vperm.xlu1 %4142, %v6427_v51   ;;  %v7936_v51 = vld [vmem:[#allocation12_spill] sm:$0xff] }
 0x2e7   :  { %v1765_v0 = vmul.f32 1.442695, %v1665_v12  ;;  %v1767_v46 = vmul.f32 1.442695, %v1666_v32 }
 0x2e8   :  { %v6432_v10 = vpop.permute.xlu0 %2407 }
 0x2e9   :  { %4227 = vpow2.f32 %v1765_v0 }
 0x2ea   :  { %4229 = vpow2.f32 %v1767_v46  ;;  %1565 = vperm.xlu1 %4142, %v6057_v48  }
 0x2eb   :  { %v4222_v47 = vpop.eup %4221  ;;  %4231 = vpow2.f32 %v1397_v22  ;;  %v1401_v22 = vmul.f32 1.442695, %v1329_v57 }
 0x2ec   :  { %v4224_v15 = vpop.eup %4223  ;;  %2011 = vadd.xlane.f32.xlu0 %v6224_v13  ;;  %v6438_v2 = vpop.permute.xlu0 %1500  ;;  %v7920_v13 = vld [vmem:[#allocation98_spill] sm:$0xff] }
 0x2ed   :  { %v6440_v30 = vpop.eup %4225  ;;  %4002 = vmatprep.mubr.msk.f32.mxu1 %vm112_vm2, %v4224_v15  ;;  %v2025_v63 = vsel %vm112_vm2, %v4224_v15, 0.0  ;;  %v1331_v45 = vsub.f32 %v7920_v13, %v6110_v21  ;;  %4233 = vpow2.f32 %v1401_v22  ;;  %v1336_v15 = vsub.f32 %v6153_v44, %v6159_v28  ;;  %v7923_v44 = vld [vmem:[#allocation100_spill] sm:$0xff] }
 0x2ee   :  { %7919 = vst [vmem:[#allocation89_spill] sm:$0xff] %v6440_v30  ;;  %2895 = vmatmul.mubr.f32.gmra.mrb[10].mxu1 %v4222_v47  ;;  %2482 = vperm.xlu1 %4142, %v6440_v30   ;;  %v6445_v48 = vadd.f32 %v4222_v47, %v2025_v63  ;;  %v1333_v28 = vsub.f32 %v7923_v44, %v6127_v49  ;;  %v6493_v44 = vld [vmem:[#allocation2 + $0x158] sm:$0x3f] }
 0x2ef   :  { %v1405_v57 = vmul.f32 1.442695, %v1331_v45 }
 0x2f0   :  { %2015 = vadd.xlane.f32.xlu0 %v6227_v9  ;;  %v6448_v12 = vpop.permute.xlu0 %2417  ;;  %v1409_v45 = vmul.f32 1.442695, %v1333_v28 }
 0x2f1   :  { %4235 = vpow2.f32 %v1405_v57 }
 0x2f2   :  { %1575 = vperm.xlu1 %4142, %v7917_v40   ;;  %v1415_v40 = vmul.f32 1.442695, %v1336_v15 }
 0x2f3   :  { %v4228_v32 = vpop.eup %4227 }
 0x2f4   :  { %v4230_v0 = vpop.eup %4229  ;;  %v6455_v46 = vpop.permute.xlu0 %1510  ;;  %4237 = vpow2.f32 %v1415_v40  ;;  %v7931_v40 = vld [vmem:[#allocation107_spill] sm:$0xff] }
 0x2f5   :  { %v6457_v47 = vpop.eup %4231  ;;  %4003 = vmatprep.mubr.msk.f32.mxu1 %vm112_vm2, %v4230_v0  ;;  %v2029_v9 = vsel %vm112_vm2, %v4230_v0, 0.0  ;;  %4239 = vpow2.f32 %v1409_v45 }
 0x2f6   :  { %7921 = vst [vmem:[#allocation88_spill] sm:$0xff] %v6457_v47  ;;  %2901 = vmatmul.mubr.f32.gmra.mrb[12].mxu1 %v4228_v32  ;;  %2492 = vperm.xlu1 %4142, %v6457_v47   ;;  %v6462_v11 = vadd.f32 %v4228_v32, %v2029_v9  ;;  %v7928_v9 = vld [vmem:[#allocation103_spill] sm:$0xff] }
 0x2f7   :  { %v6469_v22 = vpop.eup %4233 }
 0x2f8   :  { %v6464_v63 = vpop.permute.xlu0 %2427  ;;  %7924 = vst [vmem:[#allocation5_spill] sm:$0xff] %v6469_v22 }
 0x2f9   :  { %7922 = vst [vmem:[#allocation6_spill] sm:$0xff] %v6464_v63 }
 0x2fa   :  { %1585 = vperm.xlu1 %4142, %v6110_v21  }
 0x2fb   :  { %v6477_v15 = vpop.eup %4235 }
 0x2fc   :  { %v6471_v13 = vpop.permute.xlu0 %1520  ;;  %7926 = vst [vmem:[#allocation8_spill] sm:$0xff] %v6477_v15 }
 0x2fe   :  { %2502 = vperm.xlu1 %4142, %v6469_v22   ;;  %v6479_v0 = vpop.eup %4237  ;;  %v7935_v22 = vld [vmem:[#allocation13_spill] sm:$0xff] }
 0x2ff   :  { %7927 = vst [vmem:[#allocation7_spill] sm:$0xff] %v6479_v0  ;;  %v6487_v57 = vpop.eup %4239 }
 0x300   :  { %v6475_v32 = vpop.permute.xlu0 %2437  ;;  %7929 = vst [vmem:[#allocation96_spill] sm:$0xff] %v6487_v57 }
 0x301   :  { %7925 = vst [vmem:[#allocation92_spill] sm:$0xff] %v6475_v32 }
 0x302   :  { %1595 = vperm.xlu1 %4142, %v6127_v49  }
 0x304   :  { %v6483_v21 = vpop.permute.xlu0 %1530 }
 0x306   :  { %2512 = vperm.xlu1 %4142, %v6477_v15   ;;  %2537 = vperm.xlu0 %4141, %v6479_v0  }
 0x308   :  { %v6490_v49 = vpop.permute.xlu0 %2447 }
 0x309   :  { %7930 = vst [vmem:[#allocation95_spill] sm:$0xff] %v6490_v49 }
 0x30a   :  { %1605 = vperm.xlu1 %4142, %v7928_v9   ;;  %1630 = vperm.xlu0 %4141, %v6287_v24  }
 0x30c   :  { %v6495_v28 = vpop.permute.xlu0 %1540 }
 0x30e   :  { %2522 = vperm.xlu1 %4142, %v6487_v57  }
 0x310   :  { %v6504_v42 = vpop.permute.xlu0 %2457 }
 0x311   :  { %7934 = vst [vmem:[#allocation98_spill] sm:$0xff] %v6504_v42  ;;  %v7969_v42 = vld [vmem:[#allocation31_spill] sm:$0xff] }
 0x312   :  { %1615 = vperm.xlu1 %4142, %v7931_v40  }
 0x314   :  { %v6510_v47 = vpop.permute.xlu0 %1550 }
 0x315   :  { %v1256_v45 = vpop.xlane.xlu1 %1255 }
 0x316   :  { %v6498_v0 = vmax.f32 %v6493_v44, %v1256_v45  ;;  %v1672_v45 = vsub.f32 %v7935_v22, %v6411_v27 }
 0x318   :  { %3348 = vst.msk [vmem:[#allocation2 + $0x158] sm:$0x3f] %vm65_vm6, %v6498_v0 }
 0x319   :  { %v1471_v8 = vpop.permute.xlu1 %1470 }
 0x31a   :  { %v1667_v39 = vsub.f32 %v7932_v52, %v1471_v8  ;;  %v1668_v33 = vsub.f32 %v7933_v6, %v1471_v8  ;;  %v7938_v6 = vld [vmem:[#allocation14_spill] sm:$0xff] }
 0x31b   :  { %v1671_v8 = vsub.f32 %v7938_v6, %v6411_v27 }
 0x31c   :  { %v1769_v31 = vmul.f32 1.442695, %v1667_v39  ;;  %v1771_v57 = vmul.f32 1.442695, %v1668_v33  ;;  %v1779_v33 = vmul.f32 1.442695, %v1672_v45 }
 0x31d   :  { %v6506_v15 = vpop.permute.xlu1 %2382 }
 0x31e   :  { %4241 = vpow2.f32 %v1769_v31  ;;  %v6518_v31 = vpop.permute.xlu0 %2467 }
 0x31f   :  { %4243 = vpow2.f32 %v1771_v57  ;;  %7939 = vst [vmem:[#allocation100_spill] sm:$0xff] %v6518_v31  ;;  %v1777_v57 = vmul.f32 1.442695, %v1671_v8 }
 0x321   :  { %v1476_v30 = vpop.permute.xlu1 %1475 }
 0x322   :  { %v1669_v61 = vsub.f32 %v7936_v51, %v1476_v30  ;;  %v1670_v52 = vsub.f32 %v7937_v58, %v1476_v30  ;;  %v7940_v51 = vld [vmem:[#allocation17_spill] sm:$0xff]  ;;  %v7942_v30 = vld [vmem:[#allocation15_spill] sm:$0xff]  ;;  %v6533_v26 = vpop.permute.xlu0 %1560 }
 0x323   :  { %v1676_v29 = vsub.f32 %v7940_v51, %v6425_v5 }
 0x324   :  { %v1773_v17 = vmul.f32 1.442695, %v1669_v61  ;;  %v1775_v39 = vmul.f32 1.442695, %v1670_v52  ;;  %v7941_v61 = vld [vmem:[#allocation16_spill] sm:$0xff]  ;;  %v7943_v52 = vld [vmem:[#allocation109_spill] sm:$0xff] }
 0x325   :  { %v6516_v37 = vpop.permute.xlu1 %2392  ;;  %v1338_v6 = vsub.f32 %v7943_v52, %v6185_v16  ;;  %v1787_v14 = vmul.f32 1.442695, %v1676_v29  ;;  %v7947_v29 = vld [vmem:[#allocation19_spill] sm:$0xff] }
 0x326   :  { %4245 = vpow2.f32 %v1773_v17 }
 0x327   :  { %4247 = vpow2.f32 %v1775_v39  ;;  %v7944_v39 = vld [vmem:[#allocation18_spill] sm:$0xff] }
 0x328   :  { %v4242_v22 = vpop.eup %4241  ;;  %4249 = vpow2.f32 %v1779_v33  ;;  %v1675_v33 = vsub.f32 %v7944_v39, %v6425_v5  ;;  %v7946_v5 = vld [vmem:[#allocation20_spill] sm:$0xff] }
 0x329   :  { %v4244_v54 = vpop.eup %4243  ;;  %2023 = vadd.xlane.f32.xlu0 %v6338_v38  ;;  %v1486_v58 = vpop.permute.xlu1 %1485  ;;  %4251 = vpow2.f32 %v1777_v57 }
 0x32a   :  { %4004 = vmatprep.mubr.msk.f32.mxu1 %vm112_vm2, %v4244_v54  ;;  %v1673_v27 = vsub.f32 %v7941_v61, %v1486_v58  ;;  %v1674_v45 = vsub.f32 %v7942_v30, %v1486_v58  ;;  %v2033_v17 = vsel %vm112_vm2, %v4244_v54, 0.0  ;;  %v1419_v58 = vmul.f32 1.442695, %v1338_v6  ;;  %v7948_v6 = vld [vmem:[#allocation102_spill] sm:$0xff] }
 0x32b   :  { %2907 = vmatmul.mubr.f32.gmra.mrb[14].mxu1 %v4242_v22  ;;  %v6529_v8 = vadd.f32 %v4242_v22, %v2033_v17  ;;  %v1785_v30 = vmul.f32 1.442695, %v1675_v33  ;;  %v7945_v22 = vld [vmem:[#allocation21_spill] sm:$0xff]  ;;  %v6547_v33 = vpop.permute.xlu0 %2477 }
 0x32c   :  { %v1781_v38 = vmul.f32 1.442695, %v1673_v27  ;;  %v1783_v51 = vmul.f32 1.442695, %v1674_v45  ;;  %v1680_v57 = vsub.f32 %v7945_v22, %v6438_v2  ;;  %7949 = vst [vmem:[#allocation103_spill] sm:$0xff] %v6547_v33 }
 0x32d   :  { %v6535_v61 = vpop.permute.xlu1 %2402 }
 0x32e   :  { %4253 = vpow2.f32 %v1781_v38  ;;  %v1335_v38 = vsub.f32 %v7948_v6, %v7928_v9 }
 0x32f   :  { %4255 = vpow2.f32 %v1783_v51  ;;  %v7950_v51 = vld [vmem:[#allocation22_spill] sm:$0xff] }
 0x330   :  { %v4246_v54 = vpop.eup %4245  ;;  %4257 = vpow2.f32 %v1787_v14  ;;  %v1679_v22 = vsub.f32 %v7950_v51, %v6438_v2  ;;  %v1413_v9 = vmul.f32 1.442695, %v1335_v38  ;;  %v7953_v51 = vld [vmem:[#allocation23_spill] sm:$0xff] }
 0x331   :  { %v4248_v16 = vpop.eup %4247  ;;  %v1496_v17 = vpop.permute.xlu1 %1495  ;;  %4259 = vpow2.f32 %v1419_v58 }
 0x332   :  { %4005 = vmatprep.mubr.msk.f32.mxu1 %vm112_vm2, %v4248_v16  ;;  %v1677_v27 = vsub.f32 %v7946_v5, %v1496_v17  ;;  %v1678_v45 = vsub.f32 %v7947_v29, %v1496_v17  ;;  %v2037_v52 = vsel %vm112_vm2, %v4248_v16, 0.0  ;;  %v6543_v39 = vpop.eup %4249  ;;  %4261 = vpow2.f32 %v1785_v30  ;;  %v7951_v30 = vld [vmem:[#allocation25_spill] sm:$0xff] }
 0x333   :  { %2913 = vmatmul.mubr.f32.gmra.mrb[16].mxu1 %v4246_v54  ;;  %v6549_v14 = vadd.f32 %v4246_v54, %v2037_v52  ;;  %v1795_v16 = vmul.f32 1.442695, %v1680_v57  ;;  %v6557_v29 = vpop.eup %4251  ;;  %v1793_v54 = vmul.f32 1.442695, %v1679_v22  ;;  %v7952_v52 = vld [vmem:[#allocation24_spill] sm:$0xff] }
 0x334   :  { %v1789_v5 = vmul.f32 1.442695, %v1677_v27  ;;  %v1791_v25 = vmul.f32 1.442695, %v1678_v45  ;;  %4006 = vmatprep.mubr.msk.f32.mxu1 %vm112_vm2, %v6543_v39  ;;  %v1684_v27 = vsub.f32 %v7951_v30, %v6455_v46  ;;  %v6563_v45 = vpop.permute.xlu0 %1570 }
 0x335   :  { %v6555_v17 = vpop.permute.xlu1 %2412 }
 0x336   :  { %4263 = vpow2.f32 %v1789_v5  ;;  %2007 = vadd.xlane.f32.xlu1 %v6213_v1  ;;  %v7955_v5 = vld [vmem:[#allocation26_spill] sm:$0xff] }
 0x337   :  { %4265 = vpow2.f32 %v1791_v25  ;;  %2919 = vmatmul.mubr.f32.gmra.mrb[18].mxu1 %v6557_v29 }
 0x338   :  { %v4254_v58 = vpop.eup %4253  ;;  %4267 = vpow2.f32 %v1795_v16  ;;  %v1683_v16 = vsub.f32 %v7955_v5, %v6455_v46 }
 0x339   :  { %v4256_v2 = vpop.eup %4255  ;;  %v1506_v57 = vpop.permute.xlu1 %1505  ;;  %4269 = vpow2.f32 %v1413_v9 }
 0x33a   :  { %4007 = vmatprep.mubr.msk.f32.mxu1 %vm112_vm2, %v4256_v2  ;;  %v1681_v6 = vsub.f32 %v7952_v52, %v1506_v57  ;;  %v1682_v1 = vsub.f32 %v7953_v51, %v1506_v57  ;;  %v2045_v25 = vsel %vm112_vm2, %v4256_v2, 0.0  ;;  %v6569_v38 = vpop.eup %4257  ;;  %4271 = vpow2.f32 %v1793_v54  ;;  %v6583_v9 = vpop.permute.xlu0 %2487 }
 0x33b   :  { %7954 = vst [vmem:[#allocation107_spill] sm:$0xff] %v6569_v38  ;;  %2925 = vmatmul.mubr.f32.gmra.mrb[20].mxu1 %v4254_v58  ;;  %v6571_v22 = vadd.f32 %v4254_v58, %v2045_v25  ;;  %v6577_v52 = vpop.eup %4259  ;;  %v1803_v57 = vmul.f32 1.442695, %v1684_v27  ;;  %7958 = vst [vmem:[#allocation13_spill] sm:$0xff] %v6583_v9  ;;  %v1801_v58 = vmul.f32 1.442695, %v1683_v16 }
 0x33c   :  { %v1797_v30 = vmul.f32 1.442695, %v1681_v6  ;;  %v1799_v33 = vmul.f32 1.442695, %v1682_v1  ;;  %4008 = vmatprep.mubr.msk.f32.mxu1 %vm112_vm2, %v6569_v38  ;;  %7956 = vst [vmem:[#allocation10_spill] sm:$0xff] %v6577_v52  ;;  %v6581_v2 = vpop.eup %4261  ;;  %v7959_v6 = vld [vmem:[#allocation29_spill] sm:$0xff] }
 0x33d   :  { %v6579_v51 = vpop.permute.xlu1 %2422  ;;  %7957 = vst [vmem:[#allocation9_spill] sm:$0xff] %v6581_v2  ;;  %v1688_v1 = vsub.f32 %v7959_v6, %v6471_v13  ;;  %v7960_v25 = vld [vmem:[#allocation28_spill] sm:$0xff] }
 0x33e   :  { %4273 = vpow2.f32 %v1797_v30  ;;  %v7961_v30 = vld [vmem:[#allocation27_spill] sm:$0xff] }
 0x33f   :  { %4275 = vpow2.f32 %v1799_v33  ;;  %2931 = vmatmul.mubr.f32.gmra.mrb[22].mxu1 %v6581_v2  ;;  %2547 = vperm.xlu0 %4141, %v6577_v52  }
 0x340   :  { %v4264_v46 = vpop.eup %4263  ;;  %4277 = vpow2.f32 %v1803_v57  ;;  %v7963_v57 = vld [vmem:[#allocation30_spill] sm:$0xff] }
 0x341   :  { %v4266_v54 = vpop.eup %4265  ;;  %v1516_v27 = vpop.permute.xlu1 %1515  ;;  %4279 = vpow2.f32 %v1801_v58  ;;  %v1687_v6 = vsub.f32 %v7963_v57, %v6471_v13  ;;  %v7968_v57 = vld [vmem:[#allocation32_spill] sm:$0xff] }
 0x342   :  { %4009 = vmatprep.mubr.msk.f32.mxu1 %vm112_vm2, %v4266_v54  ;;  %v1685_v5 = vsub.f32 %v7960_v25, %v1516_v27  ;;  %v1686_v38 = vsub.f32 %v7961_v30, %v1516_v27  ;;  %v2053_v33 = vsel %vm112_vm2, %v4266_v54, 0.0  ;;  %v6593_v9 = vpop.eup %4267  ;;  %v1811_v27 = vmul.f32 1.442695, %v1688_v1  ;;  %v6604_v54 = vpop.permute.xlu0 %1580 }
 0x343   :  { %7962 = vst [vmem:[#allocation12_spill] sm:$0xff] %v6593_v9  ;;  %2937 = vmatmul.mubr.f32.gmra.mrb[24].mxu1 %v4264_v46  ;;  %1640 = vperm.xlu0 %4141, %v6404_v4   ;;  %v6596_v16 = vadd.f32 %v4264_v46, %v2053_v33  ;;  %v6602_v25 = vpop.eup %4269  ;;  %v2273_v46 = vld [vmem:[#allocation4 + $0x8] sm:$0xff] }
 0x344   :  { %v1805_v52 = vmul.f32 1.442695, %v1685_v5  ;;  %v1807_v2 = vmul.f32 1.442695, %v1686_v38  ;;  %4010 = vmatprep.mubr.msk.f32.mxu1 %vm112_vm2, %v6593_v9  ;;  %7964 = vst [vmem:[#allocation11_spill] sm:$0xff] %v6602_v25  ;;  %v6608_v31 = vpop.eup %4271  ;;  %v7967_v5 = vld [vmem:[#allocation33_spill] sm:$0xff] }
 0x345   :  { %v6606_v30 = vpop.permute.xlu1 %2432  ;;  %7966 = vst [vmem:[#allocation17_spill] sm:$0xff] %v6608_v31  ;;  %v1809_v38 = vmul.f32 1.442695, %v1687_v6  ;;  %v1692_v1 = vsub.f32 %v7967_v5, %v6483_v21  ;;  %v7971_v6 = vld [vmem:[#allocation34_spill] sm:$0xff]  ;;  %v2581_v5 = vmul.f32 %v6359_v50, %v2273_v46 }
 0x346   :  { %7965 = vst [vmem:[#allocation14_spill] sm:$0xff] %v6606_v30  ;;  %4281 = vpow2.f32 %v1805_v52  ;;  %v1691_v49 = vsub.f32 %v7971_v6, %v6483_v21  ;;  %v2275_v30 = vld [vmem:[#allocation4 + $0x18] sm:$0xff] }
 0x347   :  { %4283 = vpow2.f32 %v1807_v2  ;;  %2532 = vperm.xlu1 %4142, %v6602_v25   ;;  %2943 = vmatmul.mubr.f32.gmra.mrb[26].mxu1 %v6608_v31  ;;  %v2580_v2 = vmul.f32 0.0, %v6359_v50  ;;  %v1819_v21 = vmul.f32 1.442695, %v1692_v1  ;;  %v2582_v50 = vmul.f32 0.0, %v6392_v43  ;;  %v2277_v1 = vld [vmem:[#allocation4 + $0x28] sm:$0xff] }
 0x348   :  { %v4274_v13 = vpop.eup %4273  ;;  %4285 = vpow2.f32 %v1811_v27  ;;  %v6623_v27 = vpop.permute.xlu0 %2497 }
 0x349   :  { %v4276_v58 = vpop.eup %4275  ;;  %v1526_v33 = vpop.permute.xlu1 %1525  ;;  %7972 = vst [vmem:[#allocation15_spill] sm:$0xff] %v6623_v27  ;;  %4287 = vpow2.f32 %v1809_v38 }
 0x34a   :  { %4011 = vmatprep.mubr.msk.f32.mxu1 %vm112_vm2, %v4276_v58  ;;  %v1689_v9 = vsub.f32 %v7968_v57, %v1526_v33  ;;  %v1690_v52 = vsub.f32 %v7969_v42, %v1526_v33  ;;  %v2061_v25 = vsel %vm112_vm2, %v4276_v58, 0.0  ;;  %v6619_v31 = vpop.eup %4277 }
 0x34b   :  { %7970 = vst [vmem:[#allocation16_spill] sm:$0xff] %v6619_v31  ;;  %v2866_v60 = vpop.f32.mrb[0].mxu1  ;;  %1625 = vperm.xlu1 %4142, %v6269_v19   ;;  %2949 = vmatmul.mubr.f32.gmra.mrb[28].mxu1 %v4274_v13  ;;  %v6627_v57 = vadd.f32 %v4274_v13, %v2061_v25  ;;  %v6633_v63 = vpop.eup %4279  ;;  %v1817_v25 = vmul.f32 1.442695, %v1691_v49 }
 0x34c   :  { %v1813_v42 = vmul.f32 1.442695, %v1689_v9  ;;  %v1815_v33 = vmul.f32 1.442695, %v1690_v52  ;;  %v3129_v32 = vadd.f32 %v2866_v60, %v2580_v2  ;;  %v2868_v58 = vpop.f32.mrb[1].mxu1  ;;  %4012 = vmatprep.mubr.msk.f32.mxu1 %vm112_vm2, %v6619_v31  ;;  %7973 = vst [vmem:[#allocation109_spill] sm:$0xff] %v6633_v63  ;;  %v2583_v9 = vmul.f32 %v6392_v43, %v2275_v30 }
 0x34d   :  { %v3130_v6 = vadd.f32 %v2868_v58, %v2581_v5  ;;  %v6631_v27 = vpop.permute.xlu1 %2442  ;;  %v7974_v2 = vld [vmem:[#allocation37_spill] sm:$0xff]  ;;  %v6641_v5 = vpop.permute.xlu0 %1590  ;;  %v2584_v30 = vmul.f32 0.0, %v6418_v35 }
 0x34e   :  { %4289 = vpow2.f32 %v1813_v42  ;;  %3217 = vst [vmem:[#allocation4] sm:$0xff] %v3129_v32  ;;  %v1696_v32 = vsub.f32 %v7974_v2, %v6495_v28 }
 0x34f   :  { %4291 = vpow2.f32 %v1815_v33  ;;  %3218 = vst.msk [vmem:[#allocation4 + $0x8] sm:$0xff] %vm112_vm2, %v3130_v6  ;;  %v2872_v60 = vpop.f32.mrb[2].mxu1  ;;  %2955 = vmatmul.mubr.f32.gmra.mrb[30].mxu1 %v6633_v63  ;;  %v7975_v33 = vld [vmem:[#allocation36_spill] sm:$0xff]  ;;  %v7976_v6 = vld [vmem:[#allocation35_spill] sm:$0xff] }
 0x350   :  { %v4282_v13 = vpop.eup %4281  ;;  %v3131_v38 = vadd.f32 %v2872_v60, %v2582_v50  ;;  %v2874_v46 = vpop.f32.mrb[3].mxu1  ;;  %4293 = vpow2.f32 %v1819_v21 }
 0x351   :  { %v4284_v52 = vpop.eup %4283  ;;  %v3132_v49 = vadd.f32 %v2874_v46, %v2583_v9  ;;  %v1536_v42 = vpop.permute.xlu1 %1535  ;;  %4295 = vpow2.f32 %v1817_v25  ;;  %v2585_v9 = vmul.f32 %v6418_v35, %v2277_v1  ;;  %v7978_v46 = vld [vmem:[#allocation38_spill] sm:$0xff] }
 0x352   :  { %3219 = vst [vmem:[#allocation4 + $0x10] sm:$0xff] %v3131_v38  ;;  %4013 = vmatprep.mubr.msk.f32.mxu1 %vm112_vm2, %v4284_v52  ;;  %v1693_v58 = vsub.f32 %v7975_v33, %v1536_v42  ;;  %v1694_v43 = vsub.f32 %v7976_v6, %v1536_v42  ;;  %v2069_v50 = vsel %vm112_vm2, %v4284_v52, 0.0  ;;  %v6648_v60 = vpop.eup %4285  ;;  %v1695_v2 = vsub.f32 %v7978_v46, %v6495_v28  ;;  %v6662_v35 = vpop.permute.xlu0 %2507 }
 0x353   :  { %7977 = vst [vmem:[#allocation18_spill] sm:$0xff] %v6648_v60  ;;  %3220 = vst.msk [vmem:[#allocation4 + $0x18] sm:$0xff] %vm112_vm2, %v3132_v49  ;;  %v2878_v21 = vpop.f32.mrb[4].mxu1  ;;  %2961 = vmatmul.mubr.f32.gmra.mrb[32].mxu1 %v4282_v13  ;;  %v6652_v38 = vadd.f32 %v4282_v13, %v2069_v50  ;;  %v1827_v52 = vmul.f32 1.442695, %v1696_v32  ;;  %v6660_v49 = vpop.eup %4287  ;;  %v7981_v32 = vld [vmem:[#allocation41_spill] sm:$0xff] }
 0x354   :  { %v1821_v33 = vmul.f32 1.442695, %v1693_v58  ;;  %v1823_v42 = vmul.f32 1.442695, %v1694_v43  ;;  %v3133_v6 = vadd.f32 %v2878_v21, %v2584_v30  ;;  %v2880_v63 = vpop.f32.mrb[5].mxu1  ;;  %4014 = vmatprep.mubr.msk.f32.mxu1 %vm112_vm2, %v6648_v60  ;;  %7979 = vst [vmem:[#allocation21_spill] sm:$0xff] %v6660_v49 }
 0x355   :  { %v3134_v25 = vadd.f32 %v2880_v63, %v2585_v9  ;;  %v6658_v31 = vpop.permute.xlu1 %2452  ;;  %7980 = vst [vmem:[#allocation20_spill] sm:$0xff] %v6662_v35  ;;  %v1825_v13 = vmul.f32 1.442695, %v1695_v2  ;;  %v1700_v63 = vsub.f32 %v7981_v32, %v6510_v47  ;;  %v7982_v43 = vld [vmem:[#allocation40_spill] sm:$0xff]  ;;  %v7983_v50 = vld [vmem:[#allocation39_spill] sm:$0xff]  ;;  %v7985_v2 = vld [vmem:[#allocation42_spill] sm:$0xff] }
 0x356   :  { %4297 = vpow2.f32 %v1821_v33  ;;  %3221 = vst [vmem:[#allocation4 + $0x20] sm:$0xff] %v3133_v6 }
 0x357   :  { %4299 = vpow2.f32 %v1823_v42  ;;  %3222 = vst.msk [vmem:[#allocation4 + $0x28] sm:$0xff] %vm112_vm2, %v3134_v25  ;;  %2967 = vmatmul.mubr.f32.gmra.mrb[34].mxu1 %v6660_v49  ;;  %v1699_v42 = vsub.f32 %v7985_v2, %v6510_v47  ;;  %v1835_v32 = vmul.f32 1.442695, %v1700_v63  ;;  %v7987_v47 = vld [vmem:[#allocation45_spill] sm:$0xff] }
 0x358   :  { %v4290_v28 = vpop.eup %4289  ;;  %4301 = vpow2.f32 %v1827_v52 }
 0x359   :  { %v4292_v1 = vpop.eup %4291  ;;  %v1546_v58 = vpop.permute.xlu1 %1545  ;;  %4303 = vpow2.f32 %v1825_v13  ;;  %v1833_v13 = vmul.f32 1.442695, %v1699_v42 }
 0x35a   :  { %4015 = vmatprep.mubr.msk.f32.mxu1 %vm112_vm2, %v4292_v1  ;;  %v1697_v30 = vsub.f32 %v7982_v43, %v1546_v58  ;;  %v1698_v21 = vsub.f32 %v7983_v50, %v1546_v58  ;;  %v2077_v9 = vsel %vm112_vm2, %v4292_v1, 0.0  ;;  %v6672_v46 = vpop.eup %4293  ;;  %v6682_v58 = vpop.permute.xlu0 %1600 }
 0x35b   :  { %7984 = vst [vmem:[#allocation19_spill] sm:$0xff] %v6672_v46  ;;  %2973 = vmatmul.mubr.f32.gmra.mrb[36].mxu1 %v4290_v28  ;;  %v6674_v33 = vadd.f32 %v4290_v28, %v2077_v9  ;;  %v6680_v25 = vpop.eup %4295  ;;  %v7989_v9 = vld [vmem:[#allocation43_spill] sm:$0xff] }
 0x35c   :  { %v1829_v6 = vmul.f32 1.442695, %v1697_v30  ;;  %v1831_v52 = vmul.f32 1.442695, %v1698_v21  ;;  %4016 = vmatprep.mubr.msk.f32.mxu1 %vm112_vm2, %v6672_v46  ;;  %7986 = vst [vmem:[#allocation102_spill] sm:$0xff] %v6680_v25  ;;  %v1704_v30 = vsub.f32 %v7987_v47, %v6533_v26  ;;  %v7988_v21 = vld [vmem:[#allocation44_spill] sm:$0xff] }
 0x35d   :  { %v6684_v1 = vpop.permute.xlu1 %2462 }
 0x35e   :  { %4305 = vpow2.f32 %v1829_v6 }
 0x35f   :  { %4307 = vpow2.f32 %v1831_v52  ;;  %2979 = vmatmul.mubr.f32.gmra.mrb[38].mxu1 %v6680_v25  ;;  %v6696_v25 = vpop.permute.xlu0 %2517 }
 0x360   :  { %v4298_v28 = vpop.eup %4297  ;;  %4309 = vpow2.f32 %v1835_v32  ;;  %7991 = vst [vmem:[#allocation25_spill] sm:$0xff] %v6696_v25  ;;  %v7992_v32 = vld [vmem:[#allocation46_spill] sm:$0xff] }
 0x361   :  { %v4300_v43 = vpop.eup %4299  ;;  %v1556_v50 = vpop.permute.xlu1 %1555  ;;  %4311 = vpow2.f32 %v1833_v13  ;;  %v1703_v47 = vsub.f32 %v7992_v32, %v6533_v26  ;;  %v7996_v32 = vld [vmem:[#allocation47_spill] sm:$0xff] }
 0x362   :  { %4017 = vmatprep.mubr.msk.f32.mxu1 %vm112_vm2, %v4300_v43  ;;  %v1701_v63 = vsub.f32 %v7988_v21, %v1556_v50  ;;  %v1702_v2 = vsub.f32 %v7989_v9, %v1556_v50  ;;  %2031 = vadd.xlane.f32.xlu0 %v6462_v11  ;;  %v2085_v6 = vsel %vm112_vm2, %v4300_v43, 0.0  ;;  %v6694_v52 = vpop.eup %4301  ;;  %v1340_v11 = vsub.f32 %v6280_v18, %v6287_v24  ;;  %v7994_v9 = vld [vmem:[#allocation49_spill] sm:$0xff]  ;;  %v7995_v24 = vld [vmem:[#allocation48_spill] sm:$0xff] }
 0x363   :  { %7990 = vst [vmem:[#allocation22_spill] sm:$0xff] %v6694_v52  ;;  %2985 = vmatmul.mubr.f32.gmra.mrb[40].mxu1 %v4298_v28  ;;  %v6698_v42 = vadd.f32 %v4298_v28, %v2085_v6  ;;  %v1843_v43 = vmul.f32 1.442695, %v1704_v30  ;;  %v6708_v21 = vpop.eup %4303  ;;  %v1841_v13 = vmul.f32 1.442695, %v1703_v47  ;;  %v6713_v6 = vpop.permute.xlu0 %1610 }
 0x364   :  { %v1837_v35 = vmul.f32 1.442695, %v1701_v63  ;;  %v1839_v46 = vmul.f32 1.442695, %v1702_v2  ;;  %4018 = vmatprep.mubr.msk.f32.mxu1 %vm112_vm2, %v6694_v52  ;;  %7993 = vst [vmem:[#allocation24_spill] sm:$0xff] %v6708_v21  ;;  %v1708_v2 = vsub.f32 %v7994_v9, %v6563_v45 }
 0x365   :  { %v6706_v50 = vpop.permute.xlu1 %2472  ;;  %v1423_v63 = vmul.f32 1.442695, %v1340_v11  ;;  %v7998_v11 = vld [vmem:[#allocation50_spill] sm:$0xff] }
 0x366   :  { %4313 = vpow2.f32 %v1837_v35 }
 0x367   :  { %4315 = vpow2.f32 %v1839_v46  ;;  %2991 = vmatmul.mubr.f32.gmra.mrb[42].mxu1 %v6708_v21 }
 0x368   :  { %v4306_v28 = vpop.eup %4305  ;;  %4317 = vpow2.f32 %v1843_v43  ;;  %v1707_v43 = vsub.f32 %v7998_v11, %v6563_v45 }
 0x369   :  { %v4308_v26 = vpop.eup %4307  ;;  %v1566_v18 = vpop.permute.xlu1 %1565  ;;  %4319 = vpow2.f32 %v1841_v13 }
 0x36a   :  { %4019 = vmatprep.mubr.msk.f32.mxu1 %vm112_vm2, %v4308_v26  ;;  %v1705_v30 = vsub.f32 %v7995_v24, %v1566_v18  ;;  %v1706_v35 = vsub.f32 %v7996_v32, %v1566_v18  ;;  %v2093_v46 = vsel %vm112_vm2, %v4308_v26, 0.0  ;;  %v6719_v25 = vpop.eup %4309  ;;  %v7999_v24 = vld [vmem:[#allocation105_spill] sm:$0xff]  ;;  %4321 = vpow2.f32 %v1423_v63 }
 0x36b   :  { %7997 = vst [vmem:[#allocation23_spill] sm:$0xff] %v6719_v25  ;;  %2997 = vmatmul.mubr.f32.gmra.mrb[44].mxu1 %v4306_v28  ;;  %v6721_v47 = vadd.f32 %v4306_v28, %v2093_v46  ;;  %v1337_v52 = vsub.f32 %v7999_v24, %v7931_v40  ;;  %v1851_v18 = vmul.f32 1.442695, %v1708_v2  ;;  %v6731_v32 = vpop.eup %4311  ;;  %v6733_v28 = vpop.permute.xlu0 %2527  ;;  %v1849_v13 = vmul.f32 1.442695, %v1707_v43  ;;  %v8003_v40 = vld [vmem:[#allocation53_spill] sm:$0xff] }
 0x36c   :  { %v1845_v9 = vmul.f32 1.442695, %v1705_v30  ;;  %v1847_v21 = vmul.f32 1.442695, %v1706_v35  ;;  %4020 = vmatprep.mubr.msk.f32.mxu1 %vm112_vm2, %v6719_v25  ;;  %8001 = vst [vmem:[#allocation29_spill] sm:$0xff] %v6731_v32  ;;  %8002 = vst [vmem:[#allocation28_spill] sm:$0xff] %v6733_v28  ;;  %v1712_v63 = vsub.f32 %v8003_v40, %v6604_v54 }
 0x36d   :  { %v6729_v26 = vpop.permute.xlu1 %2482  ;;  %v1417_v35 = vmul.f32 1.442695, %v1337_v52  ;;  %v8004_v46 = vld [vmem:[#allocation52_spill] sm:$0xff]  ;;  %v8007_v52 = vld [vmem:[#allocation54_spill] sm:$0xff] }
 0x36e   :  { %8000 = vst [vmem:[#allocation26_spill] sm:$0xff] %v6729_v26  ;;  %4323 = vpow2.f32 %v1845_v9  ;;  %v8005_v9 = vld [vmem:[#allocation51_spill] sm:$0xff]  ;;  %v1711_v43 = vsub.f32 %v8007_v52, %v6604_v54 }
 0x36f   :  { %4325 = vpow2.f32 %v1847_v21  ;;  %2019 = vadd.xlane.f32.xlu1 %v6328_v23  ;;  %3003 = vmatmul.mubr.f32.gmra.mrb[46].mxu1 %v6731_v32  ;;  %v6751_v32 = vpop.permute.xlu0 %1620 }
 0x370   :  { %v4314_v45 = vpop.eup %4313  ;;  %4327 = vpow2.f32 %v1851_v18 }
 0x371   :  { %v4316_v30 = vpop.eup %4315  ;;  %v1576_v2 = vpop.permute.xlu1 %1575  ;;  %4329 = vpow2.f32 %v1849_v13  ;;  %v1857_v13 = vmul.f32 1.442695, %v1711_v43 }
 0x372   :  { %4021 = vmatprep.mubr.msk.f32.mxu1 %vm112_vm2, %v4316_v30  ;;  %v1709_v11 = vsub.f32 %v8004_v46, %v1576_v2  ;;  %v1710_v24 = vsub.f32 %v8005_v9, %v1576_v2  ;;  %v2101_v21 = vsel %vm112_vm2, %v4316_v30, 0.0  ;;  %v6743_v23 = vpop.eup %4317  ;;  %4331 = vpow2.f32 %v1417_v35  ;;  %v1918_v30 = vld [vmem:[#allocation3 + $0x8] sm:$0xff] }
 0x373   :  { %8006 = vst [vmem:[#allocation27_spill] sm:$0xff] %v6743_v23  ;;  %3009 = vmatmul.mubr.f32.gmra.mrb[48].mxu1 %v4314_v45  ;;  %v6745_v28 = vadd.f32 %v4314_v45, %v2101_v21  ;;  %v1859_v46 = vmul.f32 1.442695, %v1712_v63  ;;  %v6755_v9 = vpop.eup %4319  ;;  %v1919_v63 = vld [vmem:[#allocation3 + $0x10] sm:$0xff]  ;;  %v8012_v21 = vld [vmem:[#allocation57_spill] sm:$0xff] }
 0x374   :  { %v1853_v18 = vmul.f32 1.442695, %v1709_v11  ;;  %v1855_v40 = vmul.f32 1.442695, %v1710_v24  ;;  %4022 = vmatprep.mubr.msk.f32.mxu1 %vm112_vm2, %v6743_v23  ;;  %8009 = vst [vmem:[#allocation33_spill] sm:$0xff] %v6755_v9  ;;  %v6757_v45 = vpop.eup %4321  ;;  %v8011_v11 = vld [vmem:[#allocation86_spill] sm:$0xff]  ;;  %v1716_v52 = vsub.f32 %v8012_v21, %v6641_v5 }
 0x375   :  { %v6753_v2 = vpop.permute.xlu1 %2492  ;;  %8010 = vst [vmem:[#allocation32_spill] sm:$0xff] %v6757_v45  ;;  %v1962_v35 = vmul.f32 %v8011_v11, %v1918_v30  ;;  %v8016_v30 = vld [vmem:[#allocation106_spill] sm:$0xff] }
 0x376   :  { %8008 = vst [vmem:[#allocation30_spill] sm:$0xff] %v6753_v2  ;;  %4333 = vpow2.f32 %v1853_v18  ;;  %v1963_v11 = vmul.f32 %v8016_v30, %v1919_v63  ;;  %v8017_v21 = vld [vmem:[#allocation58_spill] sm:$0xff]  ;;  %v8022_v30 = vld [vmem:[#allocation60_spill] sm:$0xff] }
 0x377   :  { %4335 = vpow2.f32 %v1855_v40  ;;  %3015 = vmatmul.mubr.f32.gmra.mrb[50].mxu1 %v6755_v9  ;;  %v8013_v40 = vld [vmem:[#allocation56_spill] sm:$0xff]  ;;  %v8014_v9 = vld [vmem:[#allocation55_spill] sm:$0xff]  ;;  %v1715_v2 = vsub.f32 %v8017_v21, %v6641_v5 }
 0x378   :  { %v4324_v54 = vpop.eup %4323  ;;  %2557 = vperm.xlu0 %4141, %v6757_v45   ;;  %4337 = vpow2.f32 %v1859_v46  ;;  %v8023_v21 = vld [vmem:[#allocation59_spill] sm:$0xff] }
 0x379   :  { %v4326_v24 = vpop.eup %4325  ;;  %v2012_v23 = vpop.xlane.xlu0 %2011  ;;  %4339 = vpow2.f32 %v1857_v13 }
 0x37a   :  { %v1586_v25 = vpop.permute.xlu1 %1585  ;;  %v2183_v18 = vadd.f32 %v2012_v23, %v1962_v35  ;;  %4023 = vmatprep.mubr.msk.f32.mxu1 %vm112_vm2, %v4326_v24  ;;  %v2109_v43 = vsel %vm112_vm2, %v4326_v24, 0.0  ;;  %v6768_v45 = vpop.eup %4327 }
 0x37b   :  { %v1713_v49 = vsub.f32 %v8013_v40, %v1586_v25  ;;  %v1714_v60 = vsub.f32 %v8014_v9, %v1586_v25  ;;  %8015 = vst [vmem:[#allocation31_spill] sm:$0xff] %v6768_v45  ;;  %3021 = vmatmul.mubr.f32.gmra.mrb[52].mxu1 %v4324_v54  ;;  %v6771_v46 = vadd.f32 %v4324_v54, %v2109_v43  ;;  %v1867_v25 = vmul.f32 1.442695, %v1716_v52  ;;  %v6781_v63 = vpop.eup %4329 }
 0x37c   :  { %2228 = vst.msk [vmem:[#allocation3 + $0x8] sm:$0xff] %vm21_vm3, %v2183_v18  ;;  %4024 = vmatprep.mubr.msk.f32.mxu1 %vm112_vm2, %v6768_v45  ;;  %1650 = vperm.xlu0 %4141, %v6498_v0   ;;  %8019 = vst [vmem:[#allocation37_spill] sm:$0xff] %v6781_v63  ;;  %v6783_v13 = vpop.eup %4331  ;;  %v8021_v18 = vld [vmem:[#allocation61_spill] sm:$0xff] }
 0x37d   :  { %v1861_v23 = vmul.f32 1.442695, %v1713_v49  ;;  %v1863_v35 = vmul.f32 1.442695, %v1714_v60  ;;  %v2016_v9 = vpop.xlane.xlu0 %2015  ;;  %8020 = vst [vmem:[#allocation36_spill] sm:$0xff] %v6783_v13  ;;  %v2279_v49 = vld [vmem:[#allocation4 + $0x38] sm:$0xff]  ;;  %v1720_v40 = vsub.f32 %v8021_v18, %v6682_v58 }
 0x37e   :  { %v6779_v24 = vpop.permute.xlu1 %2502  ;;  %v2184_v54 = vadd.f32 %v2016_v9, %v1963_v11  ;;  %v1865_v60 = vmul.f32 1.442695, %v1715_v2  ;;  %v2586_v9 = vmul.f32 0.0, %v6394_v62  ;;  %v8024_v18 = vld [vmem:[#allocation62_spill] sm:$0xff] }
 0x37f   :  { %8018 = vst [vmem:[#allocation34_spill] sm:$0xff] %v6779_v24  ;;  %4341 = vpow2.f32 %v1861_v23  ;;  %3027 = vmatmul.mubr.f32.gmra.mrb[54].mxu1 %v6781_v63  ;;  %v2281_v24 = vld [vmem:[#allocation4 + $0x48] sm:$0xff] }
 0x380   :  { %4343 = vpow2.f32 %v1863_v35  ;;  %v4334_v5 = vpop.eup %4333  ;;  %2229 = vst.msk [vmem:[#allocation3 + $0x10] sm:$0xff] %vm21_vm3, %v2184_v54  ;;  %2542 = vperm.xlu1 %4142, %v6783_v13   ;;  %v2587_v54 = vmul.f32 %v6394_v62, %v2279_v49  ;;  %v1719_v13 = vsub.f32 %v8024_v18, %v6682_v58  ;;  %v2588_v58 = vmul.f32 0.0, %v6506_v15 }
 0x381   :  { %v4336_v52 = vpop.eup %4335  ;;  %4345 = vpow2.f32 %v1867_v25 }
 0x382   :  { %v1596_v43 = vpop.permute.xlu1 %1595  ;;  %4025 = vmatprep.mubr.msk.f32.mxu1 %vm112_vm2, %v4336_v52  ;;  %v2117_v35 = vsel %vm112_vm2, %v4336_v52, 0.0  ;;  %v6794_v2 = vpop.eup %4337  ;;  %4347 = vpow2.f32 %v1865_v60  ;;  %v1875_v52 = vmul.f32 1.442695, %v1720_v40  ;;  %v1873_v49 = vmul.f32 1.442695, %v1719_v13  ;;  %v8026_v13 = vld [vmem:[#allocation64_spill] sm:$0xff] }
 0x383   :  { %v1717_v11 = vsub.f32 %v8022_v30, %v1596_v43  ;;  %v1718_v23 = vsub.f32 %v8023_v21, %v1596_v43  ;;  %3033 = vmatmul.mubr.f32.gmra.mrb[56].mxu1 %v4334_v5  ;;  %v6798_v25 = vadd.f32 %v4334_v5, %v2117_v35  ;;  %v6805_v26 = vpop.eup %4339 }
 0x384   :  { %v2884_v30 = vpop.f32.mrb[6].mxu1  ;;  %1635 = vperm.xlu1 %4142, %v6371_v59   ;;  %4026 = vmatprep.mubr.msk.f32.mxu1 %vm112_vm2, %v6794_v2 }
 0x385   :  { %v1869_v63 = vmul.f32 1.442695, %v1717_v11  ;;  %v1871_v45 = vmul.f32 1.442695, %v1718_v23  ;;  %v3135_v43 = vadd.f32 %v2884_v30, %v2586_v9  ;;  %v2886_v21 = vpop.f32.mrb[7].mxu1  ;;  %v2589_v11 = vmul.f32 %v6506_v15, %v2281_v24  ;;  %v8025_v9 = vld [vmem:[#allocation65_spill] sm:$0xff] }
 0x386   :  { %v3136_v62 = vadd.f32 %v2886_v21, %v2587_v54  ;;  %v6807_v5 = vpop.permute.xlu1 %2512  ;;  %v1724_v54 = vsub.f32 %v8025_v9, %v6713_v6 }
 0x387   :  { %4349 = vpow2.f32 %v1869_v63  ;;  %3223 = vst [vmem:[#allocation4 + $0x30] sm:$0xff] %v3135_v43  ;;  %3039 = vmatmul.mubr.f32.gmra.mrb[58].mxu1 %v6805_v26 }
 0x388   :  { %4351 = vpow2.f32 %v1871_v45  ;;  %3224 = vst.msk [vmem:[#allocation4 + $0x38] sm:$0xff] %vm112_vm2, %v3136_v62  ;;  %v2890_v40 = vpop.f32.mrb[8].mxu1  ;;  %v8027_v62 = vld [vmem:[#allocation63_spill] sm:$0xff] }
 0x389   :  { %v4342_v60 = vpop.eup %4341  ;;  %4353 = vpow2.f32 %v1875_v52  ;;  %v3137_v35 = vadd.f32 %v2890_v40, %v2588_v58  ;;  %v2892_v63 = vpop.f32.mrb[9].mxu1 }
 0x38a   :  { %v4344_v23 = vpop.eup %4343  ;;  %v3138_v45 = vadd.f32 %v2892_v63, %v2589_v11  ;;  %v1606_v18 = vpop.permute.xlu1 %1605  ;;  %4355 = vpow2.f32 %v1873_v49  ;;  %v8029_v11 = vld [vmem:[#allocation66_spill] sm:$0xff] }
 0x38b   :  { %4027 = vmatprep.mubr.msk.f32.mxu1 %vm112_vm2, %v4344_v23  ;;  %v2125_v30 = vsel %vm112_vm2, %v4344_v23, 0.0  ;;  %v6817_v43 = vpop.eup %4345  ;;  %3225 = vst [vmem:[#allocation4 + $0x40] sm:$0xff] %v3137_v35  ;;  %v1721_v21 = vsub.f32 %v8026_v13, %v1606_v18  ;;  %v1722_v15 = vsub.f32 %v8027_v62, %v1606_v18  ;;  %v1723_v23 = vsub.f32 %v8029_v11, %v6713_v6  ;;  %v8030_v6 = vld [vmem:[#allocation69_spill] sm:$0xff]  ;;  %v8031_v13 = vld [vmem:[#allocation68_spill] sm:$0xff]  ;;  %v8032_v62 = vld [vmem:[#allocation67_spill] sm:$0xff] }
 0x38c   :  { %3045 = vmatmul.mubr.f32.gmra.mrb[60].mxu1 %v4342_v60  ;;  %v6821_v24 = vadd.f32 %v4342_v60, %v2125_v30  ;;  %3226 = vst.msk [vmem:[#allocation4 + $0x48] sm:$0xff] %vm112_vm2, %v3138_v45  ;;  %v6826_v40 = vpop.eup %4347  ;;  %v1883_v35 = vmul.f32 1.442695, %v1724_v54  ;;  %v1728_v54 = vsub.f32 %v8030_v6, %v6751_v32 }
 0x38d   :  { %4028 = vmatprep.mubr.msk.f32.mxu1 %vm112_vm2, %v6817_v43  ;;  %v1877_v52 = vmul.f32 1.442695, %v1721_v21  ;;  %v1879_v58 = vmul.f32 1.442695, %v1722_v15  ;;  %8028 = vst [vmem:[#allocation35_spill] sm:$0xff] %v6826_v40 }
 0x38e   :  { %v6830_v63 = vpop.permute.xlu1 %2522  ;;  %v1881_v9 = vmul.f32 1.442695, %v1723_v23 }
 0x38f   :  { %4357 = vpow2.f32 %v1877_v52 }
 0x390   :  { %3051 = vmatmul.mubr.f32.gmra.mrb[62].mxu1 %v6826_v40  ;;  %4359 = vpow2.f32 %v1879_v58  ;;  %v1891_v40 = vmul.f32 1.442695, %v1728_v54 }
 0x391   :  { %v4350_v60 = vpop.eup %4349  ;;  %4361 = vpow2.f32 %v1883_v35  ;;  %v8033_v35 = vld [vmem:[#allocation70_spill] sm:$0xff] }
 0x392   :  { %v4352_v49 = vpop.eup %4351  ;;  %v1616_v45 = vpop.permute.xlu1 %1615  ;;  %4363 = vpow2.f32 %v1881_v9 }
 0x393   :  { %4029 = vmatprep.mubr.msk.f32.mxu1 %vm112_vm2, %v4352_v49  ;;  %v2133_v18 = vsel %vm112_vm2, %v4352_v49, 0.0  ;;  %v6835_v30 = vpop.eup %4353  ;;  %v1725_v21 = vsub.f32 %v8031_v13, %v1616_v45  ;;  %v1726_v15 = vsub.f32 %v8032_v62, %v1616_v45  ;;  %v1727_v49 = vsub.f32 %v8033_v35, %v6751_v32  ;;  %v6878_v35 = vpop.permute.xlu0 %2537 }
 0x394   :  { %3057 = vmatmul.mubr.f32.gmra.mrb[64].mxu1 %v4350_v60  ;;  %v6841_v52 = vadd.f32 %v4350_v60, %v2133_v18  ;;  %v6845_v23 = vpop.eup %4355  ;;  %v1342_v32 = vsub.f32 %v6399_v36, %v6404_v4  ;;  %v1339_v36 = vsub.f32 %v6260_v20, %v6269_v19  ;;  %v1921_v20 = vld [vmem:[#allocation3 + $0x20] sm:$0xff] }
 0x395   :  { %4030 = vmatprep.mubr.msk.f32.mxu1 %vm112_vm2, %v6835_v30  ;;  %v1885_v58 = vmul.f32 1.442695, %v1725_v21  ;;  %v1887_v11 = vmul.f32 1.442695, %v1726_v15  ;;  %v1889_v6 = vmul.f32 1.442695, %v1727_v49  ;;  %v1965_v19 = vmul.f32 %v6284_v53, %v1921_v20 }
 0x396   :  { %v1427_v21 = vmul.f32 1.442695, %v1342_v32  ;;  %v1917_v32 = vld [vmem:[#allocation3] sm:$0xff]  ;;  %v8040_v53 = vld [vmem:[#allocation82_spill] sm:$0xff] }
 0x397   :  { %4365 = vpow2.f32 %v1885_v58 }
 0x398   :  { %3063 = vmatmul.mubr.f32.gmra.mrb[66].mxu1 %v6845_v23  ;;  %4367 = vpow2.f32 %v1887_v11  ;;  %v1421_v11 = vmul.f32 1.442695, %v1339_v36 }
 0x399   :  { %v4358_v45 = vpop.eup %4357  ;;  %4369 = vpow2.f32 %v1891_v40 }
 0x39a   :  { %v4360_v60 = vpop.eup %4359  ;;  %4371 = vpow2.f32 %v1889_v6 }
 0x39b   :  { %2039 = vadd.xlane.f32.xlu0 %v6549_v14  ;;  %v6851_v18 = vpop.eup %4361  ;;  %4031 = vmatprep.mubr.msk.f32.mxu1 %vm112_vm2, %v4360_v60  ;;  %v2141_v9 = vsel %vm112_vm2, %v4360_v60, 0.0  ;;  %4373 = vpow2.f32 %v1427_v21 }
 0x39c   :  { %8034 = vst [vmem:[#allocation38_spill] sm:$0xff] %v6851_v18  ;;  %3069 = vmatmul.mubr.f32.gmra.mrb[68].mxu1 %v4358_v45  ;;  %v6855_v13 = vadd.f32 %v4358_v45, %v2141_v9  ;;  %v6861_v54 = vpop.eup %4363  ;;  %4375 = vpow2.f32 %v1421_v11  ;;  %v1631_v45 = vpop.permute.xlu0 %1630  ;;  %v1961_v11 = vmul.f32 %v8040_v53, %v1917_v32 }
 0x39d   :  { %4032 = vmatprep.mubr.msk.f32.mxu1 %vm112_vm2, %v6851_v18  ;;  %8035 = vst [vmem:[#allocation41_spill] sm:$0xff] %v6861_v54 }
 0x3a0   :  { %3075 = vmatmul.mubr.f32.gmra.mrb[70].mxu1 %v6861_v54 }
 0x3a1   :  { %v4366_v40 = vpop.eup %4365 }
 0x3a2   :  { %v4368_v14 = vpop.eup %4367 }
 0x3a3   :  { %4033 = vmatprep.mubr.msk.f32.mxu1 %vm112_vm2, %v4368_v14  ;;  %v2149_v62 = vsel %vm112_vm2, %v4368_v14, 0.0  ;;  %v6868_v58 = vpop.eup %4369 }
 0x3a4   :  { %v6866_v15 = vadd.f32 %v4366_v40, %v2149_v62  ;;  %8036 = vst [vmem:[#allocation40_spill] sm:$0xff] %v6868_v58  ;;  %3081 = vmatmul.mubr.f32.gmra.mrb[72].mxu1 %v4366_v40  ;;  %v6874_v4 = vpop.eup %4371  ;;  %v2590_v40 = vmul.f32 0.0, %v6401_v7 }
 0x3a5   :  { %4034 = vmatprep.mubr.msk.f32.mxu1 %vm112_vm2, %v6868_v58  ;;  %8037 = vst [vmem:[#allocation39_spill] sm:$0xff] %v6874_v4  ;;  %v6880_v49 = vpop.eup %4373 }
 0x3a6   :  { %8038 = vst [vmem:[#allocation42_spill] sm:$0xff] %v6880_v49  ;;  %v6884_v9 = vpop.eup %4375 }
 0x3a7   :  { %8039 = vst [vmem:[#allocation45_spill] sm:$0xff] %v6884_v9 }
 0x3a8   :  { %2027 = vadd.xlane.f32.xlu1 %v6445_v48  ;;  %3087 = vmatmul.mubr.f32.gmra.mrb[74].mxu1 %v6874_v4  ;;  %v2283_v48 = vld [vmem:[#allocation4 + $0x58] sm:$0xff] }
 0x3a9   :  { %v2591_v21 = vmul.f32 %v6401_v7, %v2283_v48 }
 0x3b1   :  { %2567 = vperm.xlu0 %4141, %v6880_v49  }
 0x3b6   :  { %v2024_v6 = vpop.xlane.xlu0 %2023 }
 0x3b7   :  { %v2186_v60 = vadd.f32 %v2024_v6, %v1965_v19 }
 0x3b9   :  { %2231 = vst.msk [vmem:[#allocation3 + $0x20] sm:$0xff] %vm21_vm3, %v2186_v60  ;;  %2552 = vperm.xlu1 %4142, %v6884_v9   ;;  %v2285_v60 = vld [vmem:[#allocation4 + $0x68] sm:$0xff]  ;;  %v2592_v9 = vmul.f32 0.0, %v6516_v37 }
 0x3ba   :  { %v2593_v7 = vmul.f32 %v6516_v37, %v2285_v60 }
 0x3bd   :  { %1645 = vperm.xlu1 %4142, %v6384_v55  }
 0x3c1   :  { %v2896_v14 = vpop.f32.mrb[10].mxu1 }
 0x3c2   :  { %v3139_v62 = vadd.f32 %v2896_v14, %v2590_v40  ;;  %v2898_v36 = vpop.f32.mrb[11].mxu1  ;;  %v8041_v14 = vld [vmem:[#allocation75_spill] sm:$0xff] }
 0x3c3   :  { %v3140_v20 = vadd.f32 %v2898_v36, %v2591_v21  ;;  %v2008_v19 = vpop.xlane.xlu1 %2007  ;;  %v1732_v32 = vsub.f32 %v8041_v14, %v1631_v45  ;;  %v1923_v14 = vld [vmem:[#allocation3 + $0x30] sm:$0xff] }
 0x3c4   :  { %3227 = vst [vmem:[#allocation4 + $0x50] sm:$0xff] %v3139_v62  ;;  %v2182_v6 = vadd.f32 %v2008_v19, %v1961_v11  ;;  %v8042_v62 = vld [vmem:[#allocation73_spill] sm:$0xff]  ;;  %v8043_v11 = vld [vmem:[#allocation71_spill] sm:$0xff] }
 0x3c5   :  { %3228 = vst.msk [vmem:[#allocation4 + $0x58] sm:$0xff] %vm112_vm2, %v3140_v20  ;;  %v8044_v19 = vld [vmem:[#allocation77_spill] sm:$0xff]  ;;  %v1899_v18 = vmul.f32 1.442695, %v1732_v32  ;;  %v1967_v32 = vmul.f32 %v6303_v41, %v1923_v14  ;;  %v8047_v14 = vld [vmem:[#allocation91_spill] sm:$0xff] }
 0x3c6   :  { %2227 = vst.msk [vmem:[#allocation3] sm:$0xff] %vm21_vm3, %v2182_v6  ;;  %v1731_v6 = vsub.f32 %v8044_v19, %v1631_v45  ;;  %v2594_v19 = vmul.f32 0.0, %v6420_v34 }
 0x3c7   :  { %v6894_v49 = vpop.permute.xlu1 %2532 }
 0x3c8   :  { %v1897_v37 = vmul.f32 1.442695, %v1731_v6 }
 0x3c9   :  { %v2902_v4 = vpop.f32.mrb[12].mxu1 }
 0x3ca   :  { %v3141_v48 = vadd.f32 %v2902_v4, %v2592_v9  ;;  %v2904_v40 = vpop.f32.mrb[13].mxu1  ;;  %v1344_v4 = vsub.f32 %v6493_v44, %v6498_v0  ;;  %v1341_v0 = vsub.f32 %v6365_v56, %v6371_v59 }
 0x3cb   :  { %v3142_v21 = vadd.f32 %v2904_v40, %v2593_v7  ;;  %v1626_v36 = vpop.permute.xlu1 %1625 }
 0x3cc   :  { %3229 = vst [vmem:[#allocation4 + $0x60] sm:$0xff] %v3141_v48  ;;  %v1729_v53 = vsub.f32 %v8042_v62, %v1626_v36  ;;  %v1730_v20 = vsub.f32 %v8043_v11, %v1626_v36  ;;  %v1431_v9 = vmul.f32 1.442695, %v1344_v4  ;;  %v8045_v36 = vld [vmem:[#allocation101_spill] sm:$0xff] }
 0x3cd   :  { %3230 = vst.msk [vmem:[#allocation4 + $0x68] sm:$0xff] %vm112_vm2, %v3142_v21 }
 0x3ce   :  { %v1893_v58 = vmul.f32 1.442695, %v1729_v53  ;;  %v1895_v54 = vmul.f32 1.442695, %v1730_v20  ;;  %v2287_v53 = vld [vmem:[#allocation4 + $0x78] sm:$0xff] }
 0x3d0   :  { %4377 = vpow2.f32 %v1893_v58  ;;  %2047 = vadd.xlane.f32.xlu0 %v6571_v22  ;;  %v1425_v22 = vmul.f32 1.442695, %v1341_v0 }
 0x3d1   :  { %4379 = vpow2.f32 %v1895_v54  ;;  %v6922_v54 = vpop.permute.xlu0 %2547 }
 0x3d2   :  { %4381 = vpow2.f32 %v1899_v18 }
 0x3d3   :  { %4383 = vpow2.f32 %v1897_v37  ;;  %v2595_v37 = vmul.f32 %v6420_v34, %v2287_v53  ;;  %v2596_v34 = vmul.f32 0.0, %v6535_v61 }
 0x3d4   :  { %4385 = vpow2.f32 %v1431_v9 }
 0x3d5   :  { %4387 = vpow2.f32 %v1425_v22  ;;  %v1641_v40 = vpop.permute.xlu0 %1640 }
 0x3da   :  { %v4378_v60 = vpop.eup %4377 }
 0x3db   :  { %v4380_v7 = vpop.eup %4379 }
 0x3dc   :  { %4035 = vmatprep.mubr.msk.f32.mxu1 %vm112_vm2, %v4380_v7  ;;  %v2157_v45 = vsel %vm112_vm2, %v4380_v7, 0.0  ;;  %v6908_v48 = vpop.eup %4381  ;;  %v2289_v7 = vld [vmem:[#allocation4 + $0x88] sm:$0xff] }
 0x3dd   :  { %3093 = vmatmul.mubr.f32.gmra.mrb[76].mxu1 %v4378_v60  ;;  %v6910_v58 = vadd.f32 %v4378_v60, %v2157_v45  ;;  %v6916_v44 = vpop.eup %4383  ;;  %v8046_v45 = vld [vmem:[#allocation97_spill] sm:$0xff] }
 0x3de   :  { %4036 = vmatprep.mubr.msk.f32.mxu1 %vm112_vm2, %v6908_v48  ;;  %v6920_v18 = vpop.eup %4385  ;;  %v1736_v0 = vsub.f32 %v8046_v45, %v1641_v40 }
 0x3df   :  { %v6926_v59 = vpop.eup %4387 }
 0x3e1   :  { %3099 = vmatmul.mubr.f32.gmra.mrb[78].mxu1 %v6916_v44  ;;  %2035 = vadd.xlane.f32.xlu1 %v6529_v8  ;;  %v1920_v8 = vld [vmem:[#allocation3 + $0x18] sm:$0xff] }
 0x3e2   :  { %v1964_v62 = vmul.f32 %v8045_v36, %v1920_v8  ;;  %v2597_v36 = vmul.f32 %v6535_v61, %v2289_v7 }
 0x3e6   :  { %2577 = vperm.xlu0 %4141, %v6920_v18  }
 0x3ef   :  { %v2032_v21 = vpop.xlane.xlu0 %2031 }
 0x3f0   :  { %v2188_v56 = vadd.f32 %v2032_v21, %v1967_v32  ;;  %v8048_v21 = vld [vmem:[#allocation90_spill] sm:$0xff] }
 0x3f2   :  { %2233 = vst.msk [vmem:[#allocation3 + $0x30] sm:$0xff] %vm21_vm3, %v2188_v56  ;;  %2562 = vperm.xlu1 %4142, %v6926_v59  }
 0x3fc   :  { %v2020_v11 = vpop.xlane.xlu1 %2019 }
 0x3fd   :  { %v2185_v20 = vadd.f32 %v2020_v11, %v1964_v62  ;;  %v8049_v62 = vld [vmem:[#allocation99_spill] sm:$0xff] }
 0x3fe   :  { %v2908_v6 = vpop.f32.mrb[14].mxu1  ;;  %v1735_v53 = vsub.f32 %v8049_v62, %v1641_v40 }
 0x3ff   :  { %2230 = vst.msk [vmem:[#allocation3 + $0x18] sm:$0xff] %vm21_vm3, %v2185_v20  ;;  %v3143_v41 = vadd.f32 %v2908_v6, %v2594_v19  ;;  %v2910_v4 = vpop.f32.mrb[15].mxu1 }
 0x400   :  { %v3144_v9 = vadd.f32 %v2910_v4, %v2595_v37  ;;  %v6934_v60 = vpop.permute.xlu1 %2542  ;;  %v2291_v37 = vld [vmem:[#allocation4 + $0x98] sm:$0xff]  ;;  %v1905_v40 = vmul.f32 1.442695, %v1735_v53 }
 0x401   :  { %3231 = vst [vmem:[#allocation4 + $0x70] sm:$0xff] %v3143_v41  ;;  %v1907_v41 = vmul.f32 1.442695, %v1736_v0  ;;  %v2599_v61 = vmul.f32 %v6432_v10, %v2291_v37  ;;  %v2600_v0 = vmul.f32 0.0, %v6555_v17 }
 0x402   :  { %3232 = vst.msk [vmem:[#allocation4 + $0x78] sm:$0xff] %vm112_vm2, %v3144_v9  ;;  %v2598_v9 = vmul.f32 0.0, %v6432_v10  ;;  %v2295_v10 = vld [vmem:[#allocation4 + $0xb8] sm:$0xff] }
 0x403   :  { %v2603_v62 = vmul.f32 %v6448_v12, %v2295_v10 }
 0x404   :  { %v1636_v22 = vpop.permute.xlu1 %1635 }
 0x405   :  { %v1733_v32 = vsub.f32 %v8047_v14, %v1636_v22  ;;  %v1734_v56 = vsub.f32 %v8048_v21, %v1636_v22  ;;  %2055 = vadd.xlane.f32.xlu0 %v6596_v16  ;;  %v2293_v22 = vld [vmem:[#allocation4 + $0xa8] sm:$0xff] }
 0x406   :  { %v2914_v8 = vpop.f32.mrb[16].mxu1 }
 0x407   :  { %v1901_v11 = vmul.f32 1.442695, %v1733_v32  ;;  %v1903_v20 = vmul.f32 1.442695, %v1734_v56  ;;  %v3145_v19 = vadd.f32 %v2914_v8, %v2596_v34  ;;  %v2916_v6 = vpop.f32.mrb[17].mxu1  ;;  %v2601_v32 = vmul.f32 %v6555_v17, %v2293_v22 }
 0x408   :  { %v3146_v4 = vadd.f32 %v2916_v6, %v2597_v36  ;;  %v2602_v8 = vmul.f32 0.0, %v6448_v12  ;;  %v2041_v36 = vsel %vm112_vm2, %v6543_v39, 0.0  ;;  %v1343_v6 = vsub.f32 %v6374_v3, %v6384_v55 }
 0x409   :  { %4389 = vpow2.f32 %v1901_v11  ;;  %3233 = vst [vmem:[#allocation4 + $0x80] sm:$0xff] %v3145_v19  ;;  %2063 = vadd.xlane.f32.xlu0 %v6627_v57  ;;  %v2604_v39 = vmul.f32 0.0, %v6579_v51 }
 0x40a   :  { %4391 = vpow2.f32 %v1903_v20  ;;  %3234 = vst.msk [vmem:[#allocation4 + $0x88] sm:$0xff] %vm112_vm2, %v3146_v4  ;;  %v2920_v16 = vpop.f32.mrb[18].mxu1  ;;  %v2297_v20 = vld [vmem:[#allocation4 + $0xc8] sm:$0xff]  ;;  %v2299_v4 = vld [vmem:[#allocation4 + $0xd8] sm:$0xff] }
 0x40b   :  { %v3147_v7 = vadd.f32 %v2920_v16, %v2598_v9  ;;  %v2922_v45 = vpop.f32.mrb[19].mxu1  ;;  %4393 = vpow2.f32 %v1907_v41  ;;  %v2605_v3 = vmul.f32 %v6579_v51, %v2297_v20  ;;  %v1429_v9 = vmul.f32 1.442695, %v1343_v6  ;;  %v2305_v6 = vld [vmem:[#allocation4 + $0x108] sm:$0xff] }
 0x40c   :  { %v3148_v14 = vadd.f32 %v2922_v45, %v2599_v61  ;;  %4395 = vpow2.f32 %v1905_v40 }
 0x40d   :  { %3235 = vst [vmem:[#allocation4 + $0x90] sm:$0xff] %v3147_v7  ;;  %2071 = vadd.xlane.f32.xlu0 %v6652_v38  ;;  %4397 = vpow2.f32 %v1429_v9  ;;  %v8053_v9 = vld [vmem:[#allocation72_spill] sm:$0xff] }
 0x40e   :  { %3236 = vst.msk [vmem:[#allocation4 + $0x98] sm:$0xff] %vm112_vm2, %v3148_v14  ;;  %v2926_v57 = vpop.f32.mrb[20].mxu1  ;;  %v2301_v14 = vld [vmem:[#allocation4 + $0xe8] sm:$0xff] }
 0x40f   :  { %v3149_v21 = vadd.f32 %v2926_v57, %v2600_v0  ;;  %v2928_v56 = vpop.f32.mrb[21].mxu1  ;;  %v8051_v57 = vld [vmem:[#allocation14_spill] sm:$0xff] }
 0x410   :  { %v3150_v34 = vadd.f32 %v2928_v56, %v2601_v32  ;;  %v2608_v32 = vmul.f32 0.0, %v8051_v57  ;;  %v2609_v56 = vmul.f32 %v8051_v57, %v2301_v14  ;;  %v2309_v57 = vld [vmem:[#allocation4 + $0x128] sm:$0xff] }
 0x411   :  { %3237 = vst [vmem:[#allocation4 + $0xa0] sm:$0xff] %v3149_v21  ;;  %2079 = vadd.xlane.f32.xlu0 %v6674_v33  ;;  %v2042_v33 = vadd.f32 %v6557_v29, %v2041_v36  ;;  %v6985_v21 = vpop.permute.xlu0 %2557 }
 0x412   :  { %3238 = vst.msk [vmem:[#allocation4 + $0xa8] sm:$0xff] %vm112_vm2, %v3150_v34  ;;  %v2932_v38 = vpop.f32.mrb[22].mxu1 }
 0x413   :  { %v6958_v53 = vpop.eup %4389  ;;  %v3151_v17 = vadd.f32 %v2932_v38, %v2602_v8  ;;  %v2934_v11 = vpop.f32.mrb[23].mxu1  ;;  %v2303_v8 = vld [vmem:[#allocation4 + $0xf8] sm:$0xff] }
 0x414   :  { %v6960_v19 = vpop.eup %4391  ;;  %v3152_v37 = vadd.f32 %v2934_v11, %v2603_v62  ;;  %v8052_v38 = vld [vmem:[#allocation92_spill] sm:$0xff] }
 0x415   :  { %3239 = vst [vmem:[#allocation4 + $0xb0] sm:$0xff] %v3151_v17  ;;  %4037 = vmatprep.mubr.msk.f32.mxu1 %vm112_vm2, %v6960_v19  ;;  %2087 = vadd.xlane.f32.xlu0 %v6698_v42  ;;  %v6969_v12 = vpop.eup %4393  ;;  %v8050_v42 = vld [vmem:[#allocation6_spill] sm:$0xff]  ;;  %v2610_v62 = vmul.f32 0.0, %v8052_v38 }
 0x416   :  { %3240 = vst.msk [vmem:[#allocation4 + $0xb8] sm:$0xff] %vm112_vm2, %v3152_v37  ;;  %3105 = vmatmul.mubr.f32.gmra.mrb[80].mxu1 %v6958_v53  ;;  %2043 = vadd.xlane.f32.xlu1 %v2042_v33  ;;  %v2938_v41 = vpop.f32.mrb[24].mxu1  ;;  %v6976_v61 = vpop.eup %4395  ;;  %v2606_v40 = vmul.f32 0.0, %v8050_v42  ;;  %v2607_v7 = vmul.f32 %v8050_v42, %v2299_v4  ;;  %v2307_v42 = vld [vmem:[#allocation4 + $0x118] sm:$0xff] }
 0x417   :  { %v3153_v55 = vadd.f32 %v2938_v41, %v2604_v39  ;;  %4038 = vmatprep.mubr.msk.f32.mxu1 %vm112_vm2, %v6969_v12  ;;  %v2940_v29 = vpop.f32.mrb[25].mxu1  ;;  %v6993_v37 = vpop.permute.xlu0 %1650  ;;  %v1925_v39 = vld [vmem:[#allocation3 + $0x40] sm:$0xff]  ;;  %v2612_v41 = vmul.f32 0.0, %v6631_v27 }
 0x418   :  { %v3154_v16 = vadd.f32 %v2940_v29, %v2605_v3  ;;  %v6997_v3 = vpop.eup %4397 }
 0x419   :  { %3241 = vst [vmem:[#allocation4 + $0xc0] sm:$0xff] %v3153_v55  ;;  %2095 = vadd.xlane.f32.xlu0 %v6721_v47  ;;  %v2613_v55 = vmul.f32 %v6631_v27, %v2305_v6  ;;  %v2313_v6 = vld [vmem:[#allocation4 + $0x148] sm:$0xff] }
 0x41a   :  { %3242 = vst.msk [vmem:[#allocation4 + $0xc8] sm:$0xff] %vm112_vm2, %v3154_v16  ;;  %3111 = vmatmul.mubr.f32.gmra.mrb[82].mxu1 %v6976_v61  ;;  %v2944_v51 = vpop.f32.mrb[26].mxu1  ;;  %v1969_v16 = vmul.f32 %v8053_v9, %v1925_v39 }
 0x41b   :  { %v3155_v45 = vadd.f32 %v2944_v51, %v2606_v40  ;;  %v2946_v22 = vpop.f32.mrb[27].mxu1 }
 0x41c   :  { %v3156_v0 = vadd.f32 %v2946_v22, %v2607_v7 }
 0x41d   :  { %3243 = vst [vmem:[#allocation4 + $0xd0] sm:$0xff] %v3155_v45  ;;  %2103 = vadd.xlane.f32.xlu0 %v6745_v28  ;;  %v2611_v28 = vmul.f32 %v8052_v38, %v2303_v8  ;;  %v8054_v45 = vld [vmem:[#allocation95_spill] sm:$0xff]  ;;  %v2311_v8 = vld [vmem:[#allocation4 + $0x138] sm:$0xff]  ;;  %v8055_v38 = vld [vmem:[#allocation98_spill] sm:$0xff] }
 0x41e   :  { %3244 = vst.msk [vmem:[#allocation4 + $0xd8] sm:$0xff] %vm112_vm2, %v3156_v0  ;;  %v2950_v47 = vpop.f32.mrb[28].mxu1  ;;  %v2615_v27 = vmul.f32 %v8054_v45, %v2307_v42 }
 0x41f   :  { %v3157_v10 = vadd.f32 %v2950_v47, %v2608_v32  ;;  %v2952_v34 = vpop.f32.mrb[29].mxu1  ;;  %v2616_v47 = vmul.f32 0.0, %v6658_v31 }
 0x420   :  { %v3158_v36 = vadd.f32 %v2952_v34, %v2609_v56 }
 0x421   :  { %3245 = vst [vmem:[#allocation4 + $0xe0] sm:$0xff] %v3157_v10  ;;  %2111 = vadd.xlane.f32.xlu0 %v6771_v46 }
 0x422   :  { %3246 = vst.msk [vmem:[#allocation4 + $0xe8] sm:$0xff] %vm112_vm2, %v3158_v36  ;;  %v2956_v17 = vpop.f32.mrb[30].mxu1 }
 0x423   :  { %v3159_v11 = vadd.f32 %v2956_v17, %v2610_v62  ;;  %v2958_v20 = vpop.f32.mrb[31].mxu1  ;;  %v2618_v62 = vmul.f32 0.0, %v8055_v38  ;;  %v1922_v17 = vld [vmem:[#allocation3 + $0x28] sm:$0xff] }
 0x424   :  { %v3160_v33 = vadd.f32 %v2958_v20, %v2611_v28 }
 0x425   :  { %3247 = vst [vmem:[#allocation4 + $0xf0] sm:$0xff] %v3159_v11  ;;  %2119 = vadd.xlane.f32.xlu0 %v6798_v25  ;;  %v2614_v25 = vmul.f32 0.0, %v8054_v45 }
 0x426   :  { %3248 = vst.msk [vmem:[#allocation4 + $0xf8] sm:$0xff] %vm112_vm2, %v3160_v33  ;;  %v2962_v46 = vpop.f32.mrb[32].mxu1 }
 0x427   :  { %v3161_v29 = vadd.f32 %v2962_v46, %v2612_v41  ;;  %2572 = vperm.xlu1 %4142, %v6997_v3   ;;  %v2964_v4 = vpop.f32.mrb[33].mxu1  ;;  %v2620_v46 = vmul.f32 0.0, %v6684_v1 }
 0x428   :  { %v3162_v40 = vadd.f32 %v2964_v4, %v2613_v55  ;;  %v2040_v51 = vpop.xlane.xlu0 %2039 }
 0x429   :  { %3249 = vst [vmem:[#allocation4 + $0x100] sm:$0xff] %v3161_v29  ;;  %v2190_v7 = vadd.f32 %v2040_v51, %v1969_v16  ;;  %2127 = vadd.xlane.f32.xlu0 %v6821_v24  ;;  %v2617_v24 = vmul.f32 %v6658_v31, %v2309_v57  ;;  %v8056_v31 = vld [vmem:[#allocation104_spill] sm:$0xff]  ;;  %v2621_v29 = vmul.f32 %v6684_v1, %v2313_v6  ;;  %v8062_v6 = vld [vmem:[#allocation103_spill] sm:$0xff] }
 0x42a   :  { %3250 = vst.msk [vmem:[#allocation4 + $0x108] sm:$0xff] %vm112_vm2, %v3162_v40  ;;  %v2968_v22 = vpop.f32.mrb[34].mxu1  ;;  %v1966_v39 = vmul.f32 %v8056_v31, %v1922_v17  ;;  %v2315_v16 = vld [vmem:[#allocation4 + $0x158] sm:$0xff]  ;;  %v2165_v40 = vsel %vm112_vm2, %v6960_v19, 0.0  ;;  %v8058_v19 = vld [vmem:[#allocation114_spill] sm:$0xff] }
 0x42b   :  { %2235 = vst.msk [vmem:[#allocation3 + $0x40] sm:$0xff] %vm21_vm3, %v2190_v7  ;;  %v3163_v14 = vadd.f32 %v2968_v22, %v2614_v25  ;;  %v2970_v0 = vpop.f32.mrb[35].mxu1  ;;  %v8057_v7 = vld [vmem:[#allocation100_spill] sm:$0xff]  ;;  %v1740_v57 = vsub.f32 %v8058_v19, %v6993_v37 }
 0x42c   :  { %v3164_v32 = vadd.f32 %v2970_v0, %v2615_v27  ;;  %v2623_v1 = vmul.f32 %v8057_v7, %v2315_v16  ;;  %v2166_v27 = vadd.f32 %v6958_v53, %v2165_v40 }
 0x42d   :  { %3251 = vst [vmem:[#allocation4 + $0x110] sm:$0xff] %v3163_v14  ;;  %2135 = vadd.xlane.f32.xlu0 %v6841_v52  ;;  %v2619_v52 = vmul.f32 %v8055_v38, %v2311_v8  ;;  %v2317_v14 = vld [vmem:[#allocation4 + $0x168] sm:$0xff]  ;;  %v2319_v38 = vld [vmem:[#allocation4 + $0x178] sm:$0xff] }
 0x42e   :  { %3252 = vst.msk [vmem:[#allocation4 + $0x118] sm:$0xff] %vm112_vm2, %v3164_v32  ;;  %v2974_v56 = vpop.f32.mrb[36].mxu1  ;;  %v2625_v8 = vmul.f32 %v6706_v50, %v2317_v14 }
 0x42f   :  { %v3165_v10 = vadd.f32 %v2974_v56, %v2616_v47  ;;  %v2976_v34 = vpop.f32.mrb[37].mxu1  ;;  %v2624_v47 = vmul.f32 0.0, %v6706_v50 }
 0x430   :  { %v3166_v36 = vadd.f32 %v2976_v34, %v2617_v24  ;;  %v8060_v24 = vld [vmem:[#allocation93_spill] sm:$0xff] }
 0x431   :  { %3253 = vst [vmem:[#allocation4 + $0x120] sm:$0xff] %v3165_v10  ;;  %2143 = vadd.xlane.f32.xlu0 %v6855_v13 }
 0x432   :  { %3254 = vst.msk [vmem:[#allocation4 + $0x128] sm:$0xff] %vm112_vm2, %v3166_v36  ;;  %v2980_v28 = vpop.f32.mrb[38].mxu1 }
 0x433   :  { %v3167_v11 = vadd.f32 %v2980_v28, %v2618_v62  ;;  %v2982_v20 = vpop.f32.mrb[39].mxu1  ;;  %v8061_v62 = vld [vmem:[#allocation113_spill] sm:$0xff] }
 0x434   :  { %v3168_v33 = vadd.f32 %v2982_v20, %v2619_v52  ;;  %v1739_v17 = vsub.f32 %v8061_v62, %v6993_v37  ;;  %v1915_v20 = vmul.f32 1.442695, %v1740_v57  ;;  %v8063_v37 = vld [vmem:[#allocation26_spill] sm:$0xff]  ;;  %v8067_v57 = vld [vmem:[#allocation12_spill] sm:$0xff] }
 0x435   :  { %3255 = vst [vmem:[#allocation4 + $0x130] sm:$0xff] %v3167_v11  ;;  %v2028_v41 = vpop.xlane.xlu1 %2027  ;;  %2151 = vadd.xlane.f32.xlu0 %v6866_v15  ;;  %v2622_v15 = vmul.f32 0.0, %v8057_v7 }
 0x436   :  { %3256 = vst.msk [vmem:[#allocation4 + $0x138] sm:$0xff] %vm112_vm2, %v3168_v33  ;;  %v2187_v13 = vadd.f32 %v2028_v41, %v1966_v39  ;;  %v2986_v55 = vpop.f32.mrb[40].mxu1  ;;  %v2626_v33 = vmul.f32 0.0, %v8062_v6  ;;  %v2627_v39 = vmul.f32 %v8062_v6, %v2319_v38 }
 0x437   :  { %v3169_v4 = vadd.f32 %v2986_v55, %v2620_v46  ;;  %v2988_v9 = vpop.f32.mrb[41].mxu1  ;;  %v2321_v46 = vld [vmem:[#allocation4 + $0x188] sm:$0xff] }
 0x438   :  { %2232 = vst.msk [vmem:[#allocation3 + $0x28] sm:$0xff] %vm21_vm3, %v2187_v13  ;;  %v3170_v42 = vadd.f32 %v2988_v9, %v2621_v29  ;;  %v1913_v13 = vmul.f32 1.442695, %v1739_v17  ;;  %v2628_v29 = vmul.f32 0.0, %v8063_v37  ;;  %v2629_v16 = vmul.f32 %v8063_v37, %v2321_v46 }
 0x439   :  { %3257 = vst [vmem:[#allocation4 + $0x140] sm:$0xff] %v3169_v4  ;;  %v7024_v51 = vpop.permute.xlu1 %2552  ;;  %2159 = vadd.xlane.f32.xlu0 %v6910_v58  ;;  %v8059_v58 = vld [vmem:[#allocation94_spill] sm:$0xff] }
 0x43a   :  { %3258 = vst.msk [vmem:[#allocation4 + $0x148] sm:$0xff] %vm112_vm2, %v3170_v42  ;;  %v2992_v45 = vpop.f32.mrb[42].mxu1  ;;  %v3353_v4 = vld [vmem:[#allocation3 + $0x8] sm:$0xff]  ;;  %v8064_v42 = vld [vmem:[#allocation107_spill] sm:$0xff] }
 0x43b   :  { %v3171_v25 = vadd.f32 %v2992_v45, %v2622_v15  ;;  %v2994_v22 = vpop.f32.mrb[43].mxu1  ;;  %v2049_v40 = vsel %vm112_vm2, %v8064_v42, 0.0  ;;  %v2323_v45 = vld [vmem:[#allocation4 + $0x198] sm:$0xff] }
 0x43c   :  { %v3172_v0 = vadd.f32 %v2994_v22, %v2623_v1 }
 0x43d   :  { %3259 = vst [vmem:[#allocation4 + $0x150] sm:$0xff] %v3171_v25  ;;  %v1646_v32 = vpop.permute.xlu1 %1645  ;;  %2167 = vadd.xlane.f32.xlu0 %v2166_v27  ;;  %v8065_v25 = vld [vmem:[#allocation13_spill] sm:$0xff] }
 0x43e   :  { %3260 = vst.msk [vmem:[#allocation4 + $0x158] sm:$0xff] %vm112_vm2, %v3172_v0  ;;  %v1737_v56 = vsub.f32 %v8059_v58, %v1646_v32  ;;  %v1738_v10 = vsub.f32 %v8060_v24, %v1646_v32  ;;  %v2998_v34 = vpop.f32.mrb[44].mxu1  ;;  %v2630_v22 = vmul.f32 0.0, %v8065_v25  ;;  %v8066_v27 = vld [vmem:[#allocation9_spill] sm:$0xff]  ;;  %v2631_v19 = vmul.f32 %v8065_v25, %v2323_v45 }
 0x43f   :  { %v3173_v53 = vadd.f32 %v2998_v34, %v2624_v47  ;;  %v3000_v36 = vpop.f32.mrb[45].mxu1  ;;  %v2050_v14 = vadd.f32 %v8066_v27, %v2049_v40  ;;  %v2057_v32 = vsel %vm112_vm2, %v8067_v57, 0.0  ;;  %v2329_v40 = vld [vmem:[#allocation4 + $0x1c8] sm:$0xff] }
 0x440   :  { %v1909_v28 = vmul.f32 1.442695, %v1737_v56  ;;  %v1911_v52 = vmul.f32 1.442695, %v1738_v10  ;;  %v3174_v11 = vadd.f32 %v3000_v36, %v2625_v8  ;;  %v2325_v56 = vld [vmem:[#allocation4 + $0x1a8] sm:$0xff]  ;;  %v8069_v36 = vld [vmem:[#allocation17_spill] sm:$0xff] }
 0x441   :  { %3261 = vst [vmem:[#allocation4 + $0x160] sm:$0xff] %v3173_v53  ;;  %v8068_v8 = vld [vmem:[#allocation30_spill] sm:$0xff]  ;;  %v2058_v38 = vadd.f32 %v8069_v36, %v2057_v32  ;;  %v2331_v32 = vld [vmem:[#allocation4 + $0x1d8] sm:$0xff]  ;;  %v1927_v36 = vld [vmem:[#allocation3 + $0x50] sm:$0xff] }
 0x442   :  { %4399 = vpow2.f32 %v1909_v28  ;;  %3262 = vst.msk [vmem:[#allocation4 + $0x168] sm:$0xff] %vm112_vm2, %v3174_v11  ;;  %v3004_v31 = vpop.f32.mrb[46].mxu1  ;;  %v2632_v53 = vmul.f32 0.0, %v8068_v8  ;;  %v2633_v17 = vmul.f32 %v8068_v8, %v2325_v56  ;;  %v8070_v28 = vld [vmem:[#allocation16_spill] sm:$0xff]  ;;  %v8078_v8 = vld [vmem:[#allocation102_spill] sm:$0xff] }
 0x443   :  { %4401 = vpow2.f32 %v1911_v52  ;;  %v3175_v50 = vadd.f32 %v3004_v31, %v2626_v33  ;;  %v3006_v41 = vpop.f32.mrb[47].mxu1  ;;  %v2065_v52 = vsel %vm112_vm2, %v8070_v28, 0.0  ;;  %v2327_v33 = vld [vmem:[#allocation4 + $0x1b8] sm:$0xff] }
 0x444   :  { %v3176_v55 = vadd.f32 %v3006_v41, %v2627_v39  ;;  %4403 = vpow2.f32 %v1915_v20  ;;  %v8071_v39 = vld [vmem:[#allocation15_spill] sm:$0xff]  ;;  %v8072_v41 = vld [vmem:[#allocation109_spill] sm:$0xff]  ;;  %v8077_v56 = vld [vmem:[#allocation20_spill] sm:$0xff] }
 0x445   :  { %3263 = vst [vmem:[#allocation4 + $0x170] sm:$0xff] %v3175_v50  ;;  %4405 = vpow2.f32 %v1913_v13  ;;  %v2634_v50 = vmul.f32 0.0, %v8071_v39  ;;  %v2066_v46 = vadd.f32 %v8072_v41, %v2065_v52  ;;  %v2635_v37 = vmul.f32 %v8071_v39, %v2327_v33 }
 0x446   :  { %3264 = vst.msk [vmem:[#allocation4 + $0x178] sm:$0xff] %vm112_vm2, %v3176_v55  ;;  %v3010_v9 = vpop.f32.mrb[48].mxu1  ;;  %4407 = vrcp.f32 %v3353_v4  ;;  %v2640_v41 = vmul.f32 0.0, %v6807_v5 }
 0x447   :  { %v3177_v7 = vadd.f32 %v3010_v9, %v2628_v29  ;;  %v3012_v15 = vpop.f32.mrb[49].mxu1  ;;  %v8073_v29 = vld [vmem:[#allocation18_spill] sm:$0xff] }
 0x448   :  { %v3178_v1 = vadd.f32 %v3012_v15, %v2629_v16  ;;  %v2073_v4 = vsel %vm112_vm2, %v8073_v29, 0.0  ;;  %v8074_v15 = vld [vmem:[#allocation34_spill] sm:$0xff] }
 0x449   :  { %3265 = vst [vmem:[#allocation4 + $0x180] sm:$0xff] %v3177_v7  ;;  %v2636_v45 = vmul.f32 0.0, %v8074_v15  ;;  %v2637_v27 = vmul.f32 %v8074_v15, %v2329_v40 }
 0x44a   :  { %3266 = vst.msk [vmem:[#allocation4 + $0x188] sm:$0xff] %vm112_vm2, %v3178_v1  ;;  %v3016_v0 = vpop.f32.mrb[50].mxu1  ;;  %v8075_v1 = vld [vmem:[#allocation21_spill] sm:$0xff] }
 0x44b   :  { %v3179_v47 = vadd.f32 %v3016_v0, %v2630_v22  ;;  %2051 = vadd.xlane.f32.xlu1 %v2050_v14  ;;  %v3018_v58 = vpop.f32.mrb[51].mxu1  ;;  %v2074_v25 = vadd.f32 %v8075_v1, %v2073_v4  ;;  %v8076_v14 = vld [vmem:[#allocation19_spill] sm:$0xff] }
 0x44c   :  { %v7054_v24 = vpop.eup %4399  ;;  %v3180_v10 = vadd.f32 %v3018_v58, %v2631_v19  ;;  %v2081_v0 = vsel %vm112_vm2, %v8076_v14, 0.0  ;;  %v7086_v58 = vpop.permute.xlu0 %2567  ;;  %v8085_v14 = vld [vmem:[#allocation27_spill] sm:$0xff] }
 0x44d   :  { %v7056_v34 = vpop.eup %4401  ;;  %3267 = vst [vmem:[#allocation4 + $0x190] sm:$0xff] %v3179_v47 }
 0x44e   :  { %3268 = vst.msk [vmem:[#allocation4 + $0x198] sm:$0xff] %vm112_vm2, %v3180_v10  ;;  %4039 = vmatprep.mubr.msk.f32.mxu1 %vm112_vm2, %v7056_v34  ;;  %v3022_v62 = vpop.f32.mrb[52].mxu1  ;;  %v7066_v11 = vpop.eup %4403  ;;  %v2638_v10 = vmul.f32 0.0, %v8077_v56 }
 0x44f   :  { %v3181_v20 = vadd.f32 %v3022_v62, %v2632_v53  ;;  %3117 = vmatmul.mubr.f32.gmra.mrb[84].mxu1 %v7054_v24  ;;  %2059 = vadd.xlane.f32.xlu1 %v2058_v38  ;;  %v3024_v6 = vpop.f32.mrb[53].mxu1  ;;  %v7073_v13 = vpop.eup %4405  ;;  %v2082_v53 = vadd.f32 %v8078_v8, %v2081_v0  ;;  %v2639_v62 = vmul.f32 %v8077_v56, %v2331_v32  ;;  %v2105_v0 = vsel %vm112_vm2, %v8085_v14, 0.0  ;;  %v2337_v32 = vld [vmem:[#allocation4 + $0x208] sm:$0xff]  ;;  %v2343_v14 = vld [vmem:[#allocation4 + $0x238] sm:$0xff] }
 0x450   :  { %v3182_v31 = vadd.f32 %v3024_v6, %v2633_v17  ;;  %4040 = vmatprep.mubr.msk.f32.mxu1 %vm112_vm2, %v7066_v11  ;;  %v4408_v9 = vpop.eup %4407  ;;  %v8079_v17 = vld [vmem:[#allocation22_spill] sm:$0xff]  ;;  %v2644_v56 = vmul.f32 0.0, %v6830_v63 }
 0x451   :  { %3269 = vst [vmem:[#allocation4 + $0x1a0] sm:$0xff] %v3181_v20  ;;  %v2089_v28 = vsel %vm112_vm2, %v8079_v17, 0.0  ;;  %v2333_v6 = vld [vmem:[#allocation4 + $0x1e8] sm:$0xff] }
 0x452   :  { %3270 = vst.msk [vmem:[#allocation4 + $0x1a8] sm:$0xff] %vm112_vm2, %v3182_v31  ;;  %v3028_v55 = vpop.f32.mrb[54].mxu1  ;;  %v8080_v31 = vld [vmem:[#allocation76_spill] sm:$0xff]  ;;  %v2641_v4 = vmul.f32 %v6807_v5, %v2333_v6 }
 0x453   :  { %v3183_v16 = vadd.f32 %v3028_v55, %v2634_v50  ;;  %3123 = vmatmul.mubr.f32.gmra.mrb[86].mxu1 %v7073_v13  ;;  %2067 = vadd.xlane.f32.xlu1 %v2066_v46  ;;  %v3030_v42 = vpop.f32.mrb[55].mxu1  ;;  %v1971_v39 = vmul.f32 %v8080_v31, %v1927_v36  ;;  %v8081_v46 = vld [vmem:[#allocation24_spill] sm:$0xff]  ;;  %v2645_v36 = vmul.f32 %v6830_v63, %v2337_v32  ;;  %v8089_v31 = vld [vmem:[#allocation37_spill] sm:$0xff]  ;;  %v2121_v63 = vsel %vm112_vm2, %v6794_v2, 0.0  ;;  %v2345_v32 = vld [vmem:[#allocation4 + $0x248] sm:$0xff] }
 0x454   :  { %v3184_v7 = vadd.f32 %v3030_v42, %v2635_v37  ;;  %3535 = vperm.xlu0 %4141, %v4408_v9   ;;  %v2090_v55 = vadd.f32 %v8081_v46, %v2089_v28  ;;  %v8082_v9 = vld [vmem:[#allocation23_spill] sm:$0xff]  ;;  %v8088_v6 = vld [vmem:[#allocation28_spill] sm:$0xff]  ;;  %v2648_v2 = vmul.f32 0.0, %v6894_v49 }
 0x455   :  { %3271 = vst [vmem:[#allocation4 + $0x1b0] sm:$0xff] %v3183_v16  ;;  %v2097_v16 = vsel %vm112_vm2, %v8082_v9, 0.0  ;;  %v1924_v46 = vld [vmem:[#allocation3 + $0x38] sm:$0xff] }
 0x456   :  { %3272 = vst.msk [vmem:[#allocation4 + $0x1b8] sm:$0xff] %vm112_vm2, %v3184_v7  ;;  %v3034_v22 = vpop.f32.mrb[56].mxu1  ;;  %v2335_v7 = vld [vmem:[#allocation4 + $0x1f8] sm:$0xff] }
 0x457   :  { %v3185_v19 = vadd.f32 %v3034_v22, %v2636_v45  ;;  %2075 = vadd.xlane.f32.xlu1 %v2074_v25  ;;  %v3036_v57 = vpop.f32.mrb[57].mxu1  ;;  %v8083_v45 = vld [vmem:[#allocation25_spill] sm:$0xff] }
 0x458   :  { %v3186_v47 = vadd.f32 %v3036_v57, %v2637_v27  ;;  %v2642_v1 = vmul.f32 0.0, %v8083_v45  ;;  %v8084_v25 = vld [vmem:[#allocation29_spill] sm:$0xff]  ;;  %v2643_v5 = vmul.f32 %v8083_v45, %v2335_v7  ;;  %v2129_v7 = vsel %vm112_vm2, %v6817_v43, 0.0 }
 0x459   :  { %3273 = vst [vmem:[#allocation4 + $0x1c0] sm:$0xff] %v3185_v19  ;;  %v2098_v22 = vadd.f32 %v8084_v25, %v2097_v16  ;;  %v2122_v16 = vadd.f32 %v6805_v26, %v2121_v63 }
 0x45a   :  { %3274 = vst.msk [vmem:[#allocation4 + $0x1c8] sm:$0xff] %vm112_vm2, %v3186_v47  ;;  %v3040_v38 = vpop.f32.mrb[58].mxu1 }
 0x45b   :  { %v3187_v52 = vadd.f32 %v3040_v38, %v2638_v10  ;;  %2083 = vadd.xlane.f32.xlu1 %v2082_v53  ;;  %v3042_v20 = vpop.f32.mrb[59].mxu1  ;;  %v8086_v10 = vld [vmem:[#allocation33_spill] sm:$0xff]  ;;  %v8087_v38 = vld [vmem:[#allocation31_spill] sm:$0xff] }
 0x45c   :  { %v3188_v33 = vadd.f32 %v3042_v20, %v2639_v62  ;;  %v2106_v8 = vadd.f32 %v8086_v10, %v2105_v0  ;;  %v2113_v62 = vsel %vm112_vm2, %v8087_v38, 0.0 }
 0x45d   :  { %3275 = vst [vmem:[#allocation4 + $0x1d0] sm:$0xff] %v3187_v52  ;;  %v2048_v50 = vpop.xlane.xlu0 %2047  ;;  %v2339_v52 = vld [vmem:[#allocation4 + $0x218] sm:$0xff] }
 0x45e   :  { %3276 = vst.msk [vmem:[#allocation4 + $0x1d8] sm:$0xff] %vm112_vm2, %v3188_v33  ;;  %v2192_v37 = vadd.f32 %v2048_v50, %v1971_v39  ;;  %v2646_v33 = vmul.f32 0.0, %v8088_v6  ;;  %v2114_v39 = vadd.f32 %v8089_v31, %v2113_v62  ;;  %v2347_v62 = vld [vmem:[#allocation4 + $0x258] sm:$0xff] }
 0x45f   :  { %v3046_v29 = vpop.f32.mrb[60].mxu1  ;;  %2091 = vadd.xlane.f32.xlu1 %v2090_v55  ;;  %v3355_v31 = vld [vmem:[#allocation3 + $0x18] sm:$0xff] }
 0x460   :  { %v3189_v42 = vadd.f32 %v3046_v29, %v2640_v41  ;;  %v3048_v40 = vpop.f32.mrb[61].mxu1  ;;  %2237 = vst.msk [vmem:[#allocation3 + $0x50] sm:$0xff] %vm21_vm3, %v2192_v37  ;;  %v2647_v41 = vmul.f32 %v8088_v6, %v2339_v52  ;;  %4409 = vrcp.f32 %v3355_v31 }
 0x461   :  { %v3190_v15 = vadd.f32 %v3048_v40, %v2641_v4  ;;  %v8090_v4 = vld [vmem:[#allocation108_spill] sm:$0xff] }
 0x462   :  { %3277 = vst [vmem:[#allocation4 + $0x1e0] sm:$0xff] %v3189_v42  ;;  %v1968_v9 = vmul.f32 %v8090_v4, %v1924_v46  ;;  %v2341_v42 = vld [vmem:[#allocation4 + $0x228] sm:$0xff]  ;;  %v8095_v46 = vld [vmem:[#allocation39_spill] sm:$0xff] }
 0x463   :  { %3278 = vst.msk [vmem:[#allocation4 + $0x1e8] sm:$0xff] %vm112_vm2, %v3190_v15  ;;  %v3052_v27 = vpop.f32.mrb[62].mxu1  ;;  %2099 = vadd.xlane.f32.xlu1 %v2098_v22  ;;  %v2173_v15 = vsel %vm112_vm2, %v7056_v34, 0.0  ;;  %v2649_v25 = vmul.f32 %v6894_v49, %v2341_v42  ;;  %v2137_v34 = vsel %vm112_vm2, %v6835_v30, 0.0  ;;  %v2652_v30 = vmul.f32 0.0, %v6934_v60 }
 0x464   :  { %v3191_v19 = vadd.f32 %v3052_v27, %v2642_v1  ;;  %v3054_v57 = vpop.f32.mrb[63].mxu1  ;;  %v8091_v27 = vld [vmem:[#allocation35_spill] sm:$0xff]  ;;  %v2174_v0 = vadd.f32 %v7054_v24, %v2173_v15  ;;  %v2138_v10 = vadd.f32 %v6845_v23, %v2137_v34  ;;  %v8094_v23 = vld [vmem:[#allocation40_spill] sm:$0xff] }
 0x465   :  { %v3192_v47 = vadd.f32 %v3054_v57, %v2643_v5  ;;  %v2130_v5 = vadd.f32 %v8091_v27, %v2129_v7  ;;  %v2651_v57 = vmul.f32 %v6878_v35, %v2343_v14  ;;  %v2153_v6 = vsel %vm112_vm2, %v8094_v23, 0.0  ;;  %v8096_v15 = vld [vmem:[#allocation79_spill] sm:$0xff] }
 0x466   :  { %3279 = vst [vmem:[#allocation4 + $0x1f0] sm:$0xff] %v3191_v19  ;;  %v2650_v19 = vmul.f32 0.0, %v6878_v35  ;;  %v2154_v63 = vadd.f32 %v8095_v46, %v2153_v6 }
 0x467   :  { %3280 = vst.msk [vmem:[#allocation4 + $0x1f8] sm:$0xff] %vm112_vm2, %v3192_v47  ;;  %v3058_v53 = vpop.f32.mrb[64].mxu1  ;;  %2107 = vadd.xlane.f32.xlu1 %v2106_v8  ;;  %v8092_v8 = vld [vmem:[#allocation38_spill] sm:$0xff] }
 0x468   :  { %v3193_v17 = vadd.f32 %v3058_v53, %v2644_v56  ;;  %v3060_v28 = vpop.f32.mrb[65].mxu1  ;;  %v2145_v53 = vsel %vm112_vm2, %v8092_v8, 0.0  ;;  %v1926_v8 = vld [vmem:[#allocation3 + $0x48] sm:$0xff] }
 0x469   :  { %v3194_v20 = vadd.f32 %v3060_v28, %v2645_v36  ;;  %v2653_v36 = vmul.f32 %v6934_v60, %v2345_v32  ;;  %v8093_v28 = vld [vmem:[#allocation41_spill] sm:$0xff] }
 0x46a   :  { %3281 = vst [vmem:[#allocation4 + $0x200] sm:$0xff] %v3193_v17  ;;  %v2146_v52 = vadd.f32 %v8093_v28, %v2145_v53  ;;  %v8100_v53 = vld [vmem:[#allocation87_spill] sm:$0xff] }
 0x46b   :  { %3282 = vst.msk [vmem:[#allocation4 + $0x208] sm:$0xff] %vm112_vm2, %v3194_v20  ;;  %v3064_v50 = vpop.f32.mrb[66].mxu1  ;;  %2115 = vadd.xlane.f32.xlu1 %v2114_v39  ;;  %v2655_v39 = vmul.f32 %v6922_v54, %v2347_v62 }
 0x46c   :  { %v3195_v55 = vadd.f32 %v3064_v50, %v2646_v33  ;;  %v3066_v37 = vpop.f32.mrb[67].mxu1  ;;  %v2654_v33 = vmul.f32 0.0, %v6922_v54 }
 0x46d   :  { %v3196_v29 = vadd.f32 %v3066_v37, %v2647_v41  ;;  %v2161_v37 = vsel %vm112_vm2, %v6908_v48, 0.0  ;;  %v1929_v48 = vld [vmem:[#allocation3 + $0x60] sm:$0xff] }
 0x46e   :  { %3283 = vst [vmem:[#allocation4 + $0x210] sm:$0xff] %v3195_v55  ;;  %v2036_v40 = vpop.xlane.xlu1 %2035  ;;  %v2162_v4 = vadd.f32 %v6916_v44, %v2161_v37  ;;  %v8104_v37 = vld [vmem:[#allocation88_spill] sm:$0xff] }
 0x46f   :  { %3284 = vst.msk [vmem:[#allocation4 + $0x218] sm:$0xff] %vm112_vm2, %v3196_v29  ;;  %v2189_v45 = vadd.f32 %v2036_v40, %v1968_v9  ;;  %2123 = vadd.xlane.f32.xlu1 %v2122_v16  ;;  %v3070_v1 = vpop.f32.mrb[68].mxu1  ;;  %v3357_v29 = vld [vmem:[#allocation3 + $0x28] sm:$0xff]  ;;  %v3352_v9 = vld [vmem:[#allocation3] sm:$0xff]  ;;  %v4410_v16 = vpop.eup %4409 }
 0x470   :  { %v3197_v22 = vadd.f32 %v3070_v1, %v2648_v2  ;;  %v3072_v26 = vpop.f32.mrb[69].mxu1  ;;  %4411 = vrcp.f32 %v3357_v29  ;;  %v7154_v40 = vpop.permute.xlu0 %2577  ;;  %v1973_v2 = vmul.f32 %v8096_v15, %v1929_v48  ;;  %v1931_v1 = vld [vmem:[#allocation3 + $0x70] sm:$0xff] }
 0x471   :  { %2234 = vst.msk [vmem:[#allocation3 + $0x38] sm:$0xff] %vm21_vm3, %v2189_v45  ;;  %v3198_v43 = vadd.f32 %v3072_v26, %v2649_v25 }
 0x472   :  { %3285 = vst [vmem:[#allocation4 + $0x220] sm:$0xff] %v3197_v22  ;;  %v8097_v22 = vld [vmem:[#allocation81_spill] sm:$0xff] }
 0x473   :  { %2131 = vadd.xlane.f32.xlu1 %v2130_v5  ;;  %2175 = vadd.xlane.f32.xlu0 %v2174_v0  ;;  %3286 = vst.msk [vmem:[#allocation4 + $0x228] sm:$0xff] %vm112_vm2, %v3198_v43  ;;  %v3076_v49 = vpop.f32.mrb[70].mxu1  ;;  %v1975_v26 = vmul.f32 %v8097_v22, %v1931_v1  ;;  %v1933_v5 = vld [vmem:[#allocation3 + $0x80] sm:$0xff]  ;;  %v8098_v0 = vld [vmem:[#allocation84_spill] sm:$0xff]  ;;  %v1947_v22 = vld [vmem:[#allocation3 + $0xf0] sm:$0xff] }
 0x474   :  { %v3199_v47 = vadd.f32 %v3076_v49, %v2650_v19  ;;  %v3078_v56 = vpop.f32.mrb[71].mxu1  ;;  %v1977_v43 = vmul.f32 %v8098_v0, %v1933_v5  ;;  %v1935_v19 = vld [vmem:[#allocation3 + $0x90] sm:$0xff]  ;;  %v2169_v5 = vsel %vm112_vm2, %v6969_v12, 0.0  ;;  %v8107_v12 = vld [vmem:[#allocation96_spill] sm:$0xff] }
 0x475   :  { %v3200_v24 = vadd.f32 %v3078_v56, %v2651_v57  ;;  %v8099_v57 = vld [vmem:[#allocation83_spill] sm:$0xff]  ;;  %v1937_v56 = vld [vmem:[#allocation3 + $0xa0] sm:$0xff] }
 0x476   :  { %3287 = vst [vmem:[#allocation4 + $0x230] sm:$0xff] %v3199_v47  ;;  %v1979_v32 = vmul.f32 %v8099_v57, %v1935_v19 }
 0x477   :  { %2139 = vadd.xlane.f32.xlu1 %v2138_v10  ;;  %3288 = vst.msk [vmem:[#allocation4 + $0x238] sm:$0xff] %vm112_vm2, %v3200_v24  ;;  %v3082_v38 = vpop.f32.mrb[72].mxu1  ;;  %v7163_v10 = vpop.permute.xlu1 %2562 }
 0x478   :  { %v3201_v35 = vadd.f32 %v3082_v38, %v2652_v30  ;;  %v3084_v17 = vpop.f32.mrb[73].mxu1  ;;  %v3359_v54 = vld [vmem:[#allocation3 + $0x38] sm:$0xff]  ;;  %v1981_v30 = vmul.f32 %v8100_v53, %v1937_v56  ;;  %v8101_v38 = vld [vmem:[#allocation110_spill] sm:$0xff]  ;;  %v1951_v53 = vld [vmem:[#allocation3 + $0x110] sm:$0xff] }
 0x479   :  { %v3202_v20 = vadd.f32 %v3084_v17, %v2653_v36  ;;  %4413 = vrcp.f32 %v3359_v54  ;;  %v1970_v62 = vmul.f32 %v8101_v38, %v1926_v8  ;;  %v1945_v54 = vld [vmem:[#allocation3 + $0xe0] sm:$0xff]  ;;  %v8108_v38 = vld [vmem:[#allocation11_spill] sm:$0xff] }
 0x47a   :  { %3289 = vst [vmem:[#allocation4 + $0x240] sm:$0xff] %v3201_v35  ;;  %4415 = vrcp.f32 %v3352_v9  ;;  %v4412_v42 = vpop.eup %4411  ;;  %v1939_v35 = vld [vmem:[#allocation3 + $0xb0] sm:$0xff]  ;;  %v2656_v9 = vmul.f32 0.0, %v7024_v51 }
 0x47b   :  { %2147 = vadd.xlane.f32.xlu1 %v2146_v52  ;;  %3290 = vst.msk [vmem:[#allocation4 + $0x248] sm:$0xff] %vm112_vm2, %v3202_v20  ;;  %v3088_v60 = vpop.f32.mrb[74].mxu1  ;;  %v8102_v20 = vld [vmem:[#allocation85_spill] sm:$0xff] }
 0x47c   :  { %v3203_v50 = vadd.f32 %v3088_v60, %v2654_v33  ;;  %v3090_v41 = vpop.f32.mrb[75].mxu1  ;;  %v1983_v23 = vmul.f32 %v8102_v20, %v1939_v35  ;;  %v1941_v33 = vld [vmem:[#allocation3 + $0xc0] sm:$0xff] }
 0x47d   :  { %v3204_v55 = vadd.f32 %v3090_v41, %v2655_v39  ;;  %v8103_v39 = vld [vmem:[#allocation89_spill] sm:$0xff]  ;;  %v1943_v41 = vld [vmem:[#allocation3 + $0xd0] sm:$0xff] }
 0x47e   :  { %3291 = vst [vmem:[#allocation4 + $0x250] sm:$0xff] %v3203_v50  ;;  %v1985_v60 = vmul.f32 %v8103_v39, %v1941_v33  ;;  %v1987_v29 = vmul.f32 %v8104_v37, %v1943_v41  ;;  %v1953_v35 = vld [vmem:[#allocation3 + $0x120] sm:$0xff]  ;;  %v3442_v37 = vld [vmem:[#allocation4 + $0x10] sm:$0xff] }
 0x47f   :  { %2155 = vadd.xlane.f32.xlu1 %v2154_v63  ;;  %3292 = vst.msk [vmem:[#allocation4 + $0x258] sm:$0xff] %vm112_vm2, %v3204_v55  ;;  %v2349_v63 = vld [vmem:[#allocation4 + $0x268] sm:$0xff]  ;;  %v8110_v33 = vld [vmem:[#allocation45_spill] sm:$0xff] }
 0x483   :  { %2163 = vadd.xlane.f32.xlu1 %v2162_v4  ;;  %v4414_v7 = vpop.eup %4413 }
 0x484   :  { %v4416_v44 = vpop.eup %4415 }
 0x489   :  { %3545 = vperm.xlu0 %4141, %v4410_v16  }
 0x48d   :  { %3555 = vperm.xlu0 %4141, %v4412_v42   ;;  %v2657_v42 = vmul.f32 %v7024_v51, %v2349_v63 }
 0x491   :  { %3565 = vperm.xlu0 %4141, %v4414_v7   ;;  %v2351_v7 = vld [vmem:[#allocation4 + $0x278] sm:$0xff] }
 0x492   :  { %v2056_v45 = vpop.xlane.xlu0 %2055  ;;  %v2659_v51 = vmul.f32 %v6985_v21, %v2351_v7 }
 0x493   :  { %v2194_v25 = vadd.f32 %v2056_v45, %v1973_v2  ;;  %v8105_v45 = vld [vmem:[#allocation5_spill] sm:$0xff] }
 0x494   :  { %3530 = vperm.xlu1 %4142, %v4416_v44   ;;  %v1989_v1 = vmul.f32 %v8105_v45, %v1945_v54  ;;  %v8112_v45 = vld [vmem:[#allocation112_spill] sm:$0xff] }
 0x495   :  { %2239 = vst.msk [vmem:[#allocation3 + $0x60] sm:$0xff] %vm21_vm3, %v2194_v25 }
 0x496   :  { %v2064_v27 = vpop.xlane.xlu0 %2063 }
 0x497   :  { %v2196_v14 = vadd.f32 %v2064_v27, %v1975_v26  ;;  %v2658_v26 = vmul.f32 0.0, %v6985_v21 }
 0x499   :  { %2241 = vst.msk [vmem:[#allocation3 + $0x70] sm:$0xff] %vm21_vm3, %v2196_v14 }
 0x49a   :  { %v2072_v34 = vpop.xlane.xlu0 %2071 }
 0x49b   :  { %v2198_v49 = vadd.f32 %v2072_v34, %v1977_v43  ;;  %v8106_v34 = vld [vmem:[#allocation8_spill] sm:$0xff] }
 0x49c   :  { %v1991_v19 = vmul.f32 %v8106_v34, %v1947_v22 }
 0x49d   :  { %2243 = vst.msk [vmem:[#allocation3 + $0x80] sm:$0xff] %vm21_vm3, %v2198_v49 }
 0x49e   :  { %v2080_v47 = vpop.xlane.xlu0 %2079 }
 0x49f   :  { %v2200_v24 = vadd.f32 %v2080_v47, %v1979_v32  ;;  %v2170_v32 = vadd.f32 %v6976_v61, %v2169_v5  ;;  %v1949_v47 = vld [vmem:[#allocation3 + $0x100] sm:$0xff]  ;;  %v1995_v61 = vmul.f32 %v8108_v38, %v1951_v53  ;;  %v2177_v53 = vsel %vm1250_vm5, %v7073_v13, 0.0 }
 0x4a0   :  { %v1993_v21 = vmul.f32 %v8107_v12, %v1949_v47  ;;  %v2660_v12 = vmul.f32 0.0, %v7163_v10  ;;  %v2662_v13 = vmul.f32 0.0, %v7086_v58 }
 0x4a1   :  { %2245 = vst.msk [vmem:[#allocation3 + $0x90] sm:$0xff] %vm21_vm3, %v2200_v24 }
 0x4a2   :  { %v2088_v36 = vpop.xlane.xlu0 %2087 }
 0x4a3   :  { %v2202_v17 = vadd.f32 %v2088_v36, %v1981_v30  ;;  %v2044_v28 = vpop.xlane.xlu1 %2043  ;;  %v3354_v30 = vld [vmem:[#allocation3 + $0x10] sm:$0xff] }
 0x4a4   :  { %v2191_v52 = vadd.f32 %v2044_v28, %v1970_v62  ;;  %v8109_v28 = vld [vmem:[#allocation36_spill] sm:$0xff] }
 0x4a5   :  { %2247 = vst.msk [vmem:[#allocation3 + $0xa0] sm:$0xff] %vm21_vm3, %v2202_v17 }
 0x4a6   :  { %2236 = vst.msk [vmem:[#allocation3 + $0x48] sm:$0xff] %vm21_vm3, %v2191_v52  ;;  %v2096_v6 = vpop.xlane.xlu0 %2095  ;;  %v1997_v52 = vmul.f32 %v8109_v28, %v1953_v35 }
 0x4a7   :  { %v2204_v31 = vadd.f32 %v2096_v6, %v1983_v23  ;;  %v1955_v23 = vld [vmem:[#allocation3 + $0x130] sm:$0xff]  ;;  %v7199_v54 = vpop.permute.xlu1 %2572 }
 0x4a9   :  { %2249 = vst.msk [vmem:[#allocation3 + $0xb0] sm:$0xff] %vm21_vm3, %v2204_v31  ;;  %v1999_v31 = vmul.f32 %v8110_v33, %v1955_v23 }
 0x4aa   :  { %v2104_v50 = vpop.xlane.xlu0 %2103 }
 0x4ab   :  { %v2206_v46 = vadd.f32 %v2104_v50, %v1985_v60  ;;  %v1957_v60 = vld [vmem:[#allocation3 + $0x140] sm:$0xff] }
 0x4ad   :  { %v3361_v55 = vld [vmem:[#allocation3 + $0x48] sm:$0xff]  ;;  %2251 = vst.msk [vmem:[#allocation3 + $0xc0] sm:$0xff] %vm21_vm3, %v2206_v46  ;;  %v2001_v46 = vmul.f32 %v6926_v59, %v1957_v60  ;;  %v8111_v59 = vld [vmem:[#allocation111_spill] sm:$0xff] }
 0x4ae   :  { %4417 = vrcp.f32 %v3361_v55  ;;  %v2112_v4 = vpop.xlane.xlu0 %2111 }
 0x4af   :  { %v2208_v16 = vadd.f32 %v2112_v4, %v1987_v29  ;;  %4419 = vrcp.f32 %v3354_v30  ;;  %v3443_v29 = vld [vmem:[#allocation4 + $0x18] sm:$0xff]  ;;  %v2178_v30 = vsel %vm199_vm4, %v7066_v11, 0.0 }
 0x4b0   :  { %v3094_v48 = vpop.f32.mrb[76].mxu1  ;;  %v1940_v11 = vld [vmem:[#allocation3 + $0xb8] sm:$0xff] }
 0x4b1   :  { %2253 = vst.msk [vmem:[#allocation3 + $0xd0] sm:$0xff] %vm21_vm3, %v2208_v16  ;;  %v3205_v15 = vadd.f32 %v3094_v48, %v2656_v9  ;;  %v3096_v2 = vpop.f32.mrb[77].mxu1 }
 0x4b2   :  { %v3206_v44 = vadd.f32 %v3096_v2, %v2657_v42  ;;  %v2120_v25 = vpop.xlane.xlu0 %2119  ;;  %v1928_v42 = vld [vmem:[#allocation3 + $0x58] sm:$0xff] }
 0x4b3   :  { %3293 = vst [vmem:[#allocation4 + $0x260] sm:$0xff] %v3205_v15  ;;  %v2210_v27 = vadd.f32 %v2120_v25, %v1989_v1  ;;  %v1972_v48 = vmul.f32 %v8111_v59, %v1928_v42  ;;  %v1930_v15 = vld [vmem:[#allocation3 + $0x68] sm:$0xff]  ;;  %v1932_v25 = vld [vmem:[#allocation3 + $0x78] sm:$0xff]  ;;  %v3358_v59 = vld [vmem:[#allocation3 + $0x30] sm:$0xff] }
 0x4b4   :  { %3294 = vst.msk [vmem:[#allocation4 + $0x268] sm:$0xff] %vm112_vm2, %v3206_v44  ;;  %v3100_v14 = vpop.f32.mrb[78].mxu1  ;;  %v1974_v1 = vmul.f32 %v8112_v45, %v1930_v15 }
 0x4b5   :  { %2255 = vst.msk [vmem:[#allocation3 + $0xe0] sm:$0xff] %vm21_vm3, %v2210_v27  ;;  %v3207_v0 = vadd.f32 %v3100_v14, %v2658_v26  ;;  %v3102_v43 = vpop.f32.mrb[79].mxu1  ;;  %v8113_v26 = vld [vmem:[#allocation115_spill] sm:$0xff] }
 0x4b6   :  { %v3208_v49 = vadd.f32 %v3102_v43, %v2659_v51  ;;  %v2128_v57 = vpop.xlane.xlu0 %2127  ;;  %v1976_v27 = vmul.f32 %v8113_v26, %v1932_v25  ;;  %v1934_v51 = vld [vmem:[#allocation3 + $0x88] sm:$0xff]  ;;  %v8114_v43 = vld [vmem:[#allocation116_spill] sm:$0xff]  ;;  %v3360_v25 = vld [vmem:[#allocation3 + $0x40] sm:$0xff] }
 0x4b7   :  { %3295 = vst [vmem:[#allocation4 + $0x270] sm:$0xff] %v3207_v0  ;;  %v2212_v56 = vadd.f32 %v2128_v57, %v1991_v19  ;;  %v1978_v34 = vmul.f32 %v8114_v43, %v1934_v51  ;;  %v3362_v43 = vld [vmem:[#allocation3 + $0x50] sm:$0xff] }
 0x4b8   :  { %v4418_v24 = vpop.eup %4417  ;;  %3296 = vst.msk [vmem:[#allocation4 + $0x278] sm:$0xff] %vm112_vm2, %v3208_v49  ;;  %2171 = vadd.xlane.f32.xlu1 %v2170_v32  ;;  %v1936_v49 = vld [vmem:[#allocation3 + $0x98] sm:$0xff]  ;;  %v2353_v32 = vld [vmem:[#allocation4 + $0x288] sm:$0xff] }
 0x4b9   :  { %2257 = vst.msk [vmem:[#allocation3 + $0xf0] sm:$0xff] %vm21_vm3, %v2212_v56  ;;  %3575 = vperm.xlu0 %4141, %v4418_v24   ;;  %v4420_v41 = vpop.eup %4419  ;;  %v8115_v56 = vld [vmem:[#allocation117_spill] sm:$0xff] }
 0x4ba   :  { %v2136_v8 = vpop.xlane.xlu0 %2135  ;;  %v1980_v24 = vmul.f32 %v8115_v56, %v1936_v49 }
 0x4bb   :  { %v2214_v36 = vadd.f32 %v2136_v8, %v1993_v21  ;;  %v1938_v8 = vld [vmem:[#allocation3 + $0xa8] sm:$0xff] }
 0x4bd   :  { %2259 = vst.msk [vmem:[#allocation3 + $0x100] sm:$0xff] %vm21_vm3, %v2214_v36  ;;  %v2661_v36 = vmul.f32 %v7163_v10, %v2353_v32  ;;  %v1959_v32 = vld [vmem:[#allocation3 + $0x150] sm:$0xff] }
 0x4be   :  { %v2144_v62 = vpop.xlane.xlu0 %2143 }
 0x4bf   :  { %v2216_v17 = vadd.f32 %v2144_v62, %v1995_v61  ;;  %v2355_v62 = vld [vmem:[#allocation4 + $0x298] sm:$0xff] }
 0x4c0   :  { %v2663_v10 = vmul.f32 %v7086_v58, %v2355_v62  ;;  %v1950_v62 = vld [vmem:[#allocation3 + $0x108] sm:$0xff] }
 0x4c1   :  { %2261 = vst.msk [vmem:[#allocation3 + $0x110] sm:$0xff] %vm21_vm3, %v2216_v17 }
 0x4c2   :  { %v2152_v20 = vpop.xlane.xlu0 %2151 }
 0x4c3   :  { %v2218_v6 = vadd.f32 %v2152_v20, %v1997_v52  ;;  %v8116_v20 = vld [vmem:[#allocation118_spill] sm:$0xff] }
 0x4c4   :  { %v1982_v23 = vmul.f32 %v8116_v20, %v1938_v8  ;;  %v2003_v8 = vmul.f32 %v6997_v3, %v1959_v32  ;;  %v8122_v3 = vld [vmem:[#allocation80_spill] sm:$0xff] }
 0x4c5   :  { %2263 = vst.msk [vmem:[#allocation3 + $0x120] sm:$0xff] %vm21_vm3, %v2218_v6  ;;  %v2179_v6 = vadd.f32 %v2178_v30, %v2177_v53  ;;  %v8121_v53 = vld [vmem:[#allocation78_spill] sm:$0xff]  ;;  %v3455_v32 = vld [vmem:[#allocation4 + $0x78] sm:$0xff] }
 0x4c6   :  { %v2160_v39 = vpop.xlane.xlu0 %2159 }
 0x4c7   :  { %v2220_v50 = vadd.f32 %v2160_v39, %v1999_v31 }
 0x4c9   :  { %2265 = vst.msk [vmem:[#allocation3 + $0x130] sm:$0xff] %vm21_vm3, %v2220_v50  ;;  %3540 = vperm.xlu1 %4142, %v4420_v41  }
 0x4ca   :  { %v2168_v63 = vpop.xlane.xlu0 %2167 }
 0x4cb   :  { %v2222_v55 = vadd.f32 %v2168_v63, %v2001_v46  ;;  %v3356_v63 = vld [vmem:[#allocation3 + $0x20] sm:$0xff] }
 0x4cd   :  { %2267 = vst.msk [vmem:[#allocation3 + $0x140] sm:$0xff] %vm21_vm3, %v2222_v55 }
 0x4d3   :  { %v3536_v4 = vpop.permute.xlu0 %3535 }
 0x4d4   :  { %v3750_v9 = vmul.f32 %v3536_v4, %v3442_v37  ;;  %v3751_v16 = vmul.f32 %v3536_v4, %v3443_v29  ;;  %v8117_v37 = vld [vmem:[#allocation119_spill] sm:$0xff] }
 0x4d5   :  { %v1984_v29 = vmul.f32 %v8117_v37, %v1940_v11  ;;  %v1952_v11 = vld [vmem:[#allocation3 + $0x118] sm:$0xff]  ;;  %v3446_v37 = vld [vmem:[#allocation4 + $0x30] sm:$0xff] }
 0x4d6   :  { %3838 = vst [vmem:[%s7574_s4 + $0x10] sm:$0xff] %v3750_v9  ;;  %3839 = vst.msk [vmem:[%s7574_s4 + $0x18] sm:$0xff] %vm112_vm2, %v3751_v16  ;;  %v1942_v9 = vld [vmem:[#allocation3 + $0xc8] sm:$0xff] }
 0x4d8   :  { %v2052_v7 = vpop.xlane.xlu1 %2051 }
 0x4d9   :  { %v2193_v2 = vadd.f32 %v2052_v7, %v1972_v48  ;;  %v8118_v48 = vld [vmem:[#allocation120_spill] sm:$0xff] }
 0x4da   :  { %v1986_v7 = vmul.f32 %v8118_v48, %v1942_v9 }
 0x4db   :  { %2238 = vst.msk [vmem:[#allocation3 + $0x58] sm:$0xff] %vm21_vm3, %v2193_v2  ;;  %v1944_v2 = vld [vmem:[#allocation3 + $0xd8] sm:$0xff] }
 0x4dc   :  { %v2060_v44 = vpop.xlane.xlu1 %2059 }
 0x4dd   :  { %v2195_v22 = vadd.f32 %v2060_v44, %v1974_v1 }
 0x4df   :  { %2240 = vst.msk [vmem:[#allocation3 + $0x68] sm:$0xff] %vm21_vm3, %v2195_v22  ;;  %v8119_v22 = vld [vmem:[#allocation121_spill] sm:$0xff] }
 0x4e0   :  { %v2068_v5 = vpop.xlane.xlu1 %2067  ;;  %v1988_v26 = vmul.f32 %v8119_v22, %v1944_v2 }
 0x4e1   :  { %v2197_v14 = vadd.f32 %v2068_v5, %v1976_v27  ;;  %v1946_v5 = vld [vmem:[#allocation3 + $0xe8] sm:$0xff] }
 0x4e2   :  { %v3363_v0 = vld [vmem:[#allocation3 + $0x58] sm:$0xff] }
 0x4e3   :  { %4421 = vrcp.f32 %v3363_v0  ;;  %2242 = vst.msk [vmem:[#allocation3 + $0x78] sm:$0xff] %vm21_vm3, %v2197_v14 }
 0x4e4   :  { %v2076_v19 = vpop.xlane.xlu1 %2075 }
 0x4e5   :  { %v2199_v57 = vadd.f32 %v2076_v19, %v1978_v34  ;;  %v8120_v34 = vld [vmem:[#allocation74_spill] sm:$0xff] }
 0x4e6   :  { %v3365_v47 = vld [vmem:[#allocation3 + $0x68] sm:$0xff]  ;;  %v1990_v19 = vmul.f32 %v8120_v34, %v1946_v5  ;;  %v8125_v34 = vld [vmem:[#allocation32_spill] sm:$0xff] }
 0x4e7   :  { %4423 = vrcp.f32 %v3365_v47  ;;  %2244 = vst.msk [vmem:[#allocation3 + $0x88] sm:$0xff] %vm21_vm3, %v2199_v57  ;;  %v1948_v47 = vld [vmem:[#allocation3 + $0xf8] sm:$0xff] }
 0x4e8   :  { %v2084_v21 = vpop.xlane.xlu1 %2083  ;;  %v1992_v30 = vmul.f32 %v8121_v53, %v1948_v47 }
 0x4e9   :  { %v3106_v38 = vpop.f32.mrb[80].mxu1  ;;  %v2201_v61 = vadd.f32 %v2084_v21, %v1980_v24  ;;  %v3364_v21 = vld [vmem:[#allocation3 + $0x60] sm:$0xff] }
 0x4ea   :  { %v3367_v35 = vld [vmem:[#allocation3 + $0x78] sm:$0xff]  ;;  %v7223_v17 = vadd.f32 %v3106_v38, %v2660_v12  ;;  %v3108_v28 = vpop.f32.mrb[81].mxu1 }
 0x4eb   :  { %4425 = vrcp.f32 %v3367_v35  ;;  %2246 = vst.msk [vmem:[#allocation3 + $0x98] sm:$0xff] %vm21_vm3, %v2201_v61  ;;  %v3210_v52 = vadd.f32 %v3108_v28, %v2661_v36 }
 0x4ec   :  { %v2092_v33 = vpop.xlane.xlu1 %2091 }
 0x4ed   :  { %v4422_v31 = vpop.eup %4421  ;;  %3298 = vst.msk [vmem:[#allocation4 + $0x288] sm:$0xff] %vm112_vm2, %v3210_v52  ;;  %v3112_v39 = vpop.f32.mrb[82].mxu1  ;;  %v2203_v60 = vadd.f32 %v2092_v33, %v1982_v23  ;;  %2180 = vadd.xlane.f32.xlu1 %v2179_v6  ;;  %v3366_v23 = vld [vmem:[#allocation3 + $0x70] sm:$0xff]  ;;  %v1994_v6 = vmul.f32 %v8122_v3, %v1950_v62 }
 0x4ee   :  { %v3369_v50 = vld [vmem:[#allocation3 + $0x88] sm:$0xff]  ;;  %v7230_v41 = vadd.f32 %v3112_v39, %v2662_v13  ;;  %v3114_v46 = vpop.f32.mrb[83].mxu1  ;;  %3585 = vperm.xlu0 %4141, %v4422_v31  }
 0x4ef   :  { %4427 = vrcp.f32 %v3369_v50  ;;  %2248 = vst.msk [vmem:[#allocation3 + $0xa8] sm:$0xff] %vm21_vm3, %v2203_v60  ;;  %v3212_v55 = vadd.f32 %v3114_v46, %v2663_v10  ;;  %v8123_v60 = vld [vmem:[#allocation7_spill] sm:$0xff]  ;;  %v1954_v46 = vld [vmem:[#allocation3 + $0x128] sm:$0xff] }
 0x4f0   :  { %v2100_v4 = vpop.xlane.xlu1 %2099  ;;  %4429 = vrcp.f32 %v3356_v63  ;;  %v1996_v50 = vmul.f32 %v8123_v60, %v1952_v11  ;;  %v3378_v11 = vld [vmem:[#allocation3 + $0xd0] sm:$0xff]  ;;  %v3380_v60 = vld [vmem:[#allocation3 + $0xe0] sm:$0xff] }
 0x4f1   :  { %v4424_v58 = vpop.eup %4423  ;;  %3300 = vst.msk [vmem:[#allocation4 + $0x298] sm:$0xff] %vm112_vm2, %v3212_v55  ;;  %v2205_v16 = vadd.f32 %v2100_v4, %v1984_v29  ;;  %v3368_v55 = vld [vmem:[#allocation3 + $0x80] sm:$0xff]  ;;  %v3447_v29 = vld [vmem:[#allocation4 + $0x38] sm:$0xff] }
 0x4f2   :  { %v3371_v42 = vld [vmem:[#allocation3 + $0x98] sm:$0xff]  ;;  %3595 = vperm.xlu0 %4141, %v4424_v58  }
 0x4f3   :  { %4431 = vrcp.f32 %v3371_v42  ;;  %2250 = vst.msk [vmem:[#allocation3 + $0xb8] sm:$0xff] %vm21_vm3, %v2205_v16 }
 0x4f4   :  { %v2108_v15 = vpop.xlane.xlu1 %2107  ;;  %4433 = vrcp.f32 %v3358_v59 }
 0x4f5   :  { %v4426_v45 = vpop.eup %4425  ;;  %v2207_v1 = vadd.f32 %v2108_v15, %v1986_v7  ;;  %v3370_v7 = vld [vmem:[#allocation3 + $0x90] sm:$0xff]  ;;  %v8124_v15 = vld [vmem:[#allocation10_spill] sm:$0xff] }
 0x4f6   :  { %v3373_v44 = vld [vmem:[#allocation3 + $0xa8] sm:$0xff]  ;;  %3605 = vperm.xlu0 %4141, %v4426_v45   ;;  %v1998_v2 = vmul.f32 %v8124_v15, %v1954_v46  ;;  %v2664_v46 = vmul.f32 0.0, %v7199_v54 }
 0x4f7   :  { %4435 = vrcp.f32 %v3373_v44  ;;  %2252 = vst.msk [vmem:[#allocation3 + $0xc8] sm:$0xff] %vm21_vm3, %v2207_v1  ;;  %v3450_v1 = vld [vmem:[#allocation4 + $0x50] sm:$0xff]  ;;  %v3451_v44 = vld [vmem:[#allocation4 + $0x58] sm:$0xff] }
 0x4f8   :  { %v2116_v27 = vpop.xlane.xlu1 %2115  ;;  %4437 = vrcp.f32 %v3360_v25 }
 0x4f9   :  { %v4428_v51 = vpop.eup %4427  ;;  %v2209_v14 = vadd.f32 %v2116_v27, %v1988_v26  ;;  %v1956_v26 = vld [vmem:[#allocation3 + $0x138] sm:$0xff] }
 0x4fa   :  { %v3375_v0 = vld [vmem:[#allocation3 + $0xb8] sm:$0xff]  ;;  %3615 = vperm.xlu0 %4141, %v4428_v51   ;;  %v4430_v49 = vpop.eup %4429 }
 0x4fb   :  { %4439 = vrcp.f32 %v3375_v0  ;;  %2254 = vst.msk [vmem:[#allocation3 + $0xd8] sm:$0xff] %vm21_vm3, %v2209_v14 }
 0x4fc   :  { %v2124_v57 = vpop.xlane.xlu1 %2123  ;;  %4441 = vrcp.f32 %v3362_v43  ;;  %v3372_v43 = vld [vmem:[#allocation3 + $0xa0] sm:$0xff] }
 0x4fd   :  { %v4432_v56 = vpop.eup %4431  ;;  %v2211_v24 = vadd.f32 %v2124_v57, %v1990_v19  ;;  %v2000_v19 = vmul.f32 %v8125_v34, %v1956_v26  ;;  %v3454_v57 = vld [vmem:[#allocation4 + $0x70] sm:$0xff] }
 0x4fe   :  { %v3377_v12 = vld [vmem:[#allocation3 + $0xc8] sm:$0xff]  ;;  %3550 = vperm.xlu1 %4142, %v4430_v49   ;;  %3625 = vperm.xlu0 %4141, %v4432_v56   ;;  %v4434_v36 = vpop.eup %4433 }
 0x4ff   :  { %4443 = vrcp.f32 %v3377_v12  ;;  %2256 = vst.msk [vmem:[#allocation3 + $0xe8] sm:$0xff] %vm21_vm3, %v2211_v24 }
 0x500   :  { %v2176_v38 = vpop.xlane.xlu0 %2175  ;;  %v2132_v61 = vpop.xlane.xlu1 %2131  ;;  %4445 = vrcp.f32 %v3364_v21 }
 0x501   :  { %v4436_v35 = vpop.eup %4435  ;;  %v2224_v28 = vadd.f32 %v2176_v38, %v2003_v8  ;;  %v2213_v52 = vadd.f32 %v2132_v61, %v1992_v30  ;;  %v3374_v30 = vld [vmem:[#allocation3 + $0xb0] sm:$0xff]  ;;  %v3441_v38 = vld [vmem:[#allocation4 + $0x8] sm:$0xff] }
 0x502   :  { %v3379_v20 = vld [vmem:[#allocation3 + $0xd8] sm:$0xff]  ;;  %3560 = vperm.xlu1 %4142, %v4434_v36   ;;  %3635 = vperm.xlu0 %4141, %v4436_v35   ;;  %v4438_v13 = vpop.eup %4437  ;;  %v3440_v36 = vld [vmem:[#allocation4] sm:$0xff] }
 0x503   :  { %4447 = vrcp.f32 %v3379_v20  ;;  %2269 = vst.msk [vmem:[#allocation3 + $0x150] sm:$0xff] %vm21_vm3, %v2224_v28  ;;  %2258 = vst.msk [vmem:[#allocation3 + $0xf8] sm:$0xff] %vm21_vm3, %v2213_v52 }
 0x504   :  { %v2140_v33 = vpop.xlane.xlu1 %2139  ;;  %4449 = vrcp.f32 %v3366_v23  ;;  %v3376_v23 = vld [vmem:[#allocation3 + $0xc0] sm:$0xff] }
 0x505   :  { %v4440_v31 = vpop.eup %4439  ;;  %v2215_v10 = vadd.f32 %v2140_v33, %v1994_v6 }
 0x506   :  { %v3381_v39 = vld [vmem:[#allocation3 + $0xe8] sm:$0xff]  ;;  %3570 = vperm.xlu1 %4142, %v4438_v13   ;;  %3645 = vperm.xlu0 %4141, %v4440_v31   ;;  %v4442_v63 = vpop.eup %4441 }
 0x507   :  { %4451 = vrcp.f32 %v3381_v39  ;;  %2260 = vst.msk [vmem:[#allocation3 + $0x108] sm:$0xff] %vm21_vm3, %v2215_v10  ;;  %v2357_v10 = vld [vmem:[#allocation4 + $0x2a8] sm:$0xff] }
 0x508   :  { %v3546_v4 = vpop.permute.xlu0 %3545  ;;  %v2148_v9 = vpop.xlane.xlu1 %2147  ;;  %4453 = vrcp.f32 %v3368_v55  ;;  %v2665_v55 = vmul.f32 %v7199_v54, %v2357_v10 }
 0x509   :  { %v4444_v58 = vpop.eup %4443  ;;  %v3754_v16 = vmul.f32 %v3546_v4, %v3446_v37  ;;  %v3755_v42 = vmul.f32 %v3546_v4, %v3447_v29  ;;  %v2217_v59 = vadd.f32 %v2148_v9, %v1996_v50  ;;  %v2359_v29 = vld [vmem:[#allocation4 + $0x2b8] sm:$0x3f] }
 0x50a   :  { %v3383_v48 = vld [vmem:[#allocation3 + $0xf8] sm:$0xff]  ;;  %3580 = vperm.xlu1 %4142, %v4442_v63   ;;  %3655 = vperm.xlu0 %4141, %v4444_v58   ;;  %v4446_v45 = vpop.eup %4445  ;;  %v2358_v63 = vld [vmem:[#allocation4 + $0x2b0] sm:$0x3f] }
 0x50b   :  { %3842 = vst [vmem:[%s7574_s4 + $0x30] sm:$0xff] %v3754_v16  ;;  %3843 = vst.msk [vmem:[%s7574_s4 + $0x38] sm:$0xff] %vm112_vm2, %v3755_v42  ;;  %4455 = vrcp.f32 %v3383_v48  ;;  %v3382_v16 = vld [vmem:[#allocation3 + $0xf0] sm:$0xff]  ;;  %v2666_v48 = vmul.f32 %v7154_v40, %v2358_v63 }
 0x50c   :  { %2262 = vst.msk [vmem:[#allocation3 + $0x118] sm:$0xff] %vm21_vm3, %v2217_v59  ;;  %v3556_v25 = vpop.permute.xlu0 %3555  ;;  %v2156_v22 = vpop.xlane.xlu1 %2155  ;;  %4457 = vrcp.f32 %v3370_v7  ;;  %v2667_v7 = vmul.f32 %v7154_v40, %v2359_v29  ;;  %v3388_v40 = vld [vmem:[#allocation3 + $0x120] sm:$0xff]  ;;  %v3474_v29 = vld [vmem:[#allocation4 + $0x110] sm:$0xff] }
 0x50d   :  { %v4448_v27 = vpop.eup %4447  ;;  %v3758_v5 = vmul.f32 %v3556_v25, %v3450_v1  ;;  %v3759_v51 = vmul.f32 %v3556_v25, %v3451_v44  ;;  %v2219_v14 = vadd.f32 %v2156_v22, %v1998_v2  ;;  %v3386_v25 = vld [vmem:[#allocation3 + $0x110] sm:$0xff] }
 0x50e   :  { %v3385_v0 = vld [vmem:[#allocation3 + $0x108] sm:$0xff]  ;;  %3590 = vperm.xlu1 %4142, %v4446_v45   ;;  %3665 = vperm.xlu0 %4141, %v4448_v27   ;;  %v4450_v49 = vpop.eup %4449  ;;  %v3384_v45 = vld [vmem:[#allocation3 + $0x100] sm:$0xff]  ;;  %v3390_v27 = vld [vmem:[#allocation3 + $0x130] sm:$0xff] }
 0x50f   :  { %4459 = vrcp.f32 %v3385_v0  ;;  %3846 = vst [vmem:[%s7574_s4 + $0x50] sm:$0xff] %v3758_v5  ;;  %3847 = vst.msk [vmem:[%s7574_s4 + $0x58] sm:$0xff] %vm112_vm2, %v3759_v51  ;;  %v3392_v51 = vld [vmem:[#allocation3 + $0x140] sm:$0xff]  ;;  %v3459_v0 = vld [vmem:[#allocation4 + $0x98] sm:$0xff] }
 0x510   :  { %2264 = vst.msk [vmem:[#allocation3 + $0x128] sm:$0xff] %vm21_vm3, %v2219_v14  ;;  %v3566_v47 = vpop.permute.xlu0 %3565  ;;  %v2164_v56 = vpop.xlane.xlu1 %2163  ;;  %4461 = vrcp.f32 %v3372_v43  ;;  %v3458_v14 = vld [vmem:[#allocation4 + $0x90] sm:$0xff] }
 0x511   :  { %v4452_v24 = vpop.eup %4451  ;;  %v3762_v12 = vmul.f32 %v3566_v47, %v3454_v57  ;;  %v3763_v21 = vmul.f32 %v3566_v47, %v3455_v32  ;;  %v2221_v8 = vadd.f32 %v2164_v56, %v2000_v19  ;;  %v3394_v57 = vld [vmem:[#allocation3 + $0x150] sm:$0xff]  ;;  %v1958_v56 = vld [vmem:[#allocation3 + $0x148] sm:$0xff] }
 0x512   :  { %3600 = vperm.xlu1 %4142, %v4450_v49   ;;  %3675 = vperm.xlu0 %4141, %v4452_v24   ;;  %v4454_v62 = vpop.eup %4453  ;;  %v8126_v24 = vld [vmem:[#allocation42_spill] sm:$0xff] }
 0x513   :  { %v3387_v53 = vld [vmem:[#allocation3 + $0x118] sm:$0xff]  ;;  %3850 = vst [vmem:[%s7574_s4 + $0x70] sm:$0xff] %v3762_v12  ;;  %3851 = vst.msk [vmem:[%s7574_s4 + $0x78] sm:$0xff] %vm112_vm2, %v3763_v21  ;;  %v2002_v12 = vmul.f32 %v8126_v24, %v1958_v56 }
 0x514   :  { %4463 = vrcp.f32 %v3387_v53  ;;  %2266 = vst.msk [vmem:[#allocation3 + $0x138] sm:$0xff] %vm21_vm3, %v2221_v8  ;;  %v3531_v61 = vpop.permute.xlu1 %3530 }
 0x515   :  { %v3748_v35 = vmul.f32 %v3531_v61, %v3440_v36  ;;  %v3749_v28 = vmul.f32 %v3531_v61, %v3441_v38  ;;  %v4456_v52 = vpop.eup %4455  ;;  %4465 = vrcp.f32 %v3374_v30  ;;  %v3444_v36 = vld [vmem:[#allocation4 + $0x20] sm:$0xff]  ;;  %v3445_v38 = vld [vmem:[#allocation4 + $0x28] sm:$0xff] }
 0x516   :  { %3610 = vperm.xlu1 %4142, %v4454_v62   ;;  %3685 = vperm.xlu0 %4141, %v4456_v52   ;;  %v4458_v3 = vpop.eup %4457 }
 0x517   :  { %v3389_v20 = vld [vmem:[#allocation3 + $0x128] sm:$0xff]  ;;  %3836 = vst [vmem:[%s7574_s4] sm:$0xff] %v3748_v35  ;;  %3837 = vst.msk [vmem:[%s7574_s4 + $0x8] sm:$0xff] %vm112_vm2, %v3749_v28 }
 0x518   :  { %4467 = vrcp.f32 %v3389_v20  ;;  %v3462_v20 = vld [vmem:[#allocation4 + $0xb0] sm:$0xff] }
 0x519   :  { %v4460_v6 = vpop.eup %4459  ;;  %4469 = vrcp.f32 %v3376_v23  ;;  %v3463_v23 = vld [vmem:[#allocation4 + $0xb8] sm:$0xff] }
 0x51a   :  { %3620 = vperm.xlu1 %4142, %v4458_v3   ;;  %3695 = vperm.xlu0 %4141, %v4460_v6   ;;  %v4462_v33 = vpop.eup %4461 }
 0x51b   :  { %v3391_v13 = vld [vmem:[#allocation3 + $0x138] sm:$0xff] }
 0x51c   :  { %4471 = vrcp.f32 %v3391_v13 }
 0x51d   :  { %4473 = vrcp.f32 %v3378_v11  ;;  %v3467_v11 = vld [vmem:[#allocation4 + $0xd8] sm:$0xff] }
 0x51e   :  { %v4464_v31 = vpop.eup %4463  ;;  %3630 = vperm.xlu1 %4142, %v4462_v33   ;;  %4475 = vrcp.f32 %v3380_v60  ;;  %v3466_v33 = vld [vmem:[#allocation4 + $0xd0] sm:$0xff] }
 0x51f   :  { %3705 = vperm.xlu0 %4141, %v4464_v31   ;;  %v4466_v39 = vpop.eup %4465  ;;  %4477 = vrcp.f32 %v3382_v16  ;;  %v3470_v60 = vld [vmem:[#allocation4 + $0xf0] sm:$0xff] }
 0x520   :  { %4479 = vrcp.f32 %v3384_v45 }
 0x521   :  { %4481 = vrcp.f32 %v3386_v25 }
 0x522   :  { %v4468_v50 = vpop.eup %4467  ;;  %v3118_v37 = vpop.f32.mrb[84].mxu1  ;;  %3640 = vperm.xlu1 %4142, %v4466_v39   ;;  %4483 = vrcp.f32 %v3388_v40 }
 0x523   :  { %v7284_v4 = vadd.f32 %v3118_v37, %v2664_v46  ;;  %v3120_v9 = vpop.f32.mrb[85].mxu1  ;;  %3715 = vperm.xlu0 %4141, %v4468_v50   ;;  %v4470_v58 = vpop.eup %4469  ;;  %4485 = vrcp.f32 %v3390_v27  ;;  %v3471_v50 = vld [vmem:[#allocation4 + $0xf8] sm:$0xff] }
 0x524   :  { %v3214_v42 = vadd.f32 %v3120_v9, %v2665_v55  ;;  %4487 = vrcp.f32 %v3392_v51  ;;  %v1960_v37 = vld [vmem:[#allocation3 + $0x158] sm:$0x3f] }
 0x525   :  { %4489 = vrcp.f32 %v3394_v57  ;;  %v3475_v9 = vld [vmem:[#allocation4 + $0x118] sm:$0xff]  ;;  %v2004_v16 = vmul.f32 %v6920_v18, %v1960_v37  ;;  %v3498_v37 = vld [vmem:[#allocation4 + $0x1d0] sm:$0xff] }
 0x526   :  { %v4472_v59 = vpop.eup %4471  ;;  %3302 = vst.msk [vmem:[#allocation4 + $0x2a8] sm:$0xff] %vm112_vm2, %v3214_v42  ;;  %v3124_v15 = vpop.f32.mrb[86].mxu1  ;;  %3650 = vperm.xlu1 %4142, %v4470_v58   ;;  %v3483_v27 = vld [vmem:[#allocation4 + $0x158] sm:$0xff] }
 0x527   :  { %v3215_v54 = vadd.f32 %v3124_v15, %v2666_v48  ;;  %v3126_v2 = vpop.f32.mrb[87].mxu1  ;;  %3725 = vperm.xlu0 %4141, %v4472_v59   ;;  %v4474_v44 = vpop.eup %4473  ;;  %v3478_v15 = vld [vmem:[#allocation4 + $0x130] sm:$0xff] }
 0x528   :  { %v3216_v1 = vadd.f32 %v3126_v2, %v2667_v7  ;;  %v4476_v22 = vpop.eup %4475 }
 0x529   :  { %3303 = vst [vmem:[#allocation4 + $0x2b0] sm:$0x3f] %v3215_v54  ;;  %v4478_v26 = vpop.eup %4477  ;;  %v3479_v54 = vld [vmem:[#allocation4 + $0x138] sm:$0xff] }
 0x52a   :  { %3304 = vst.msk [vmem:[#allocation4 + $0x2b8] sm:$0x3f] %vm199_vm4, %v3216_v1  ;;  %3660 = vperm.xlu1 %4142, %v4474_v44   ;;  %v4480_v5 = vpop.eup %4479  ;;  %v3448_v1 = vld [vmem:[#allocation4 + $0x40] sm:$0xff]  ;;  %v3449_v44 = vld [vmem:[#allocation4 + $0x48] sm:$0xff] }
 0x52b   :  { %v4482_v34 = vpop.eup %4481 }
 0x52c   :  { %v4484_v32 = vpop.eup %4483 }
 0x52d   :  { %v4486_v47 = vpop.eup %4485 }
 0x52e   :  { %3670 = vperm.xlu1 %4142, %v4476_v22   ;;  %v4488_v21 = vpop.eup %4487 }
 0x52f   :  { %v4490_v30 = vpop.eup %4489 }
 0x532   :  { %3680 = vperm.xlu1 %4142, %v4478_v26   ;;  %v3482_v26 = vld [vmem:[#allocation4 + $0x150] sm:$0xff] }
 0x536   :  { %3690 = vperm.xlu1 %4142, %v4480_v5  }
 0x538   :  { %v3576_v43 = vpop.permute.xlu0 %3575 }
 0x539   :  { %v3766_v19 = vmul.f32 %v3576_v43, %v3458_v14  ;;  %v3767_v49 = vmul.f32 %v3576_v43, %v3459_v0  ;;  %v3452_v0 = vld [vmem:[#allocation4 + $0x60] sm:$0xff]  ;;  %v3453_v43 = vld [vmem:[#allocation4 + $0x68] sm:$0xff] }
 0x53a   :  { %3700 = vperm.xlu1 %4142, %v4482_v34  }
 0x53b   :  { %3854 = vst [vmem:[%s7574_s4 + $0x90] sm:$0xff] %v3766_v19  ;;  %3855 = vst.msk [vmem:[%s7574_s4 + $0x98] sm:$0xff] %vm112_vm2, %v3767_v49 }
 0x53e   :  { %3710 = vperm.xlu1 %4142, %v4484_v32   ;;  %v3486_v32 = vld [vmem:[#allocation4 + $0x170] sm:$0xff] }
 0x542   :  { %3720 = vperm.xlu1 %4142, %v4486_v47   ;;  %v3487_v47 = vld [vmem:[#allocation4 + $0x178] sm:$0xff] }
 0x545   :  { %v2172_v8 = vpop.xlane.xlu1 %2171 }
 0x546   :  { %v2223_v53 = vadd.f32 %v2172_v8, %v2002_v12  ;;  %3730 = vperm.xlu1 %4142, %v4488_v21   ;;  %v3456_v21 = vld [vmem:[#allocation4 + $0x80] sm:$0xff]  ;;  %v3457_v8 = vld [vmem:[#allocation4 + $0x88] sm:$0xff] }
 0x548   :  { %2268 = vst.msk [vmem:[#allocation3 + $0x148] sm:$0xff] %vm21_vm3, %v2223_v53 }
 0x549   :  { %v3541_v61 = vpop.permute.xlu1 %3540 }
 0x54a   :  { %v3752_v62 = vmul.f32 %v3541_v61, %v3444_v36  ;;  %v3753_v35 = vmul.f32 %v3541_v61, %v3445_v38  ;;  %3740 = vperm.xlu1 %4142, %v4490_v30   ;;  %v3490_v38 = vld [vmem:[#allocation4 + $0x190] sm:$0xff]  ;;  %v3491_v61 = vld [vmem:[#allocation4 + $0x198] sm:$0xff] }
 0x54c   :  { %3840 = vst [vmem:[%s7574_s4 + $0x20] sm:$0xff] %v3752_v62  ;;  %3841 = vst.msk [vmem:[%s7574_s4 + $0x28] sm:$0xff] %vm112_vm2, %v3753_v35 }
 0x54f   :  { %v3393_v28 = vld [vmem:[#allocation3 + $0x148] sm:$0xff] }
 0x550   :  { %4491 = vrcp.f32 %v3393_v28 }
 0x55a   :  { %v4492_v52 = vpop.eup %4491 }
 0x55b   :  { %3735 = vperm.xlu0 %4141, %v4492_v52   ;;  %v3460_v52 = vld [vmem:[#allocation4 + $0xa0] sm:$0xff] }
 0x56d   :  { %v3586_v3 = vpop.permute.xlu0 %3585 }
 0x56e   :  { %v3770_v6 = vmul.f32 %v3586_v3, %v3462_v20  ;;  %v3771_v13 = vmul.f32 %v3586_v3, %v3463_v23  ;;  %v3461_v20 = vld [vmem:[#allocation4 + $0xa8] sm:$0xff] }
 0x570   :  { %3858 = vst [vmem:[%s7574_s4 + $0xb0] sm:$0xff] %v3770_v6  ;;  %3859 = vst.msk [vmem:[%s7574_s4 + $0xb8] sm:$0xff] %vm112_vm2, %v3771_v13  ;;  %v3494_v13 = vld [vmem:[#allocation4 + $0x1b0] sm:$0xff] }
 0x571   :  { %v3596_v31 = vpop.permute.xlu0 %3595 }
 0x572   :  { %v3774_v10 = vmul.f32 %v3596_v31, %v3466_v33  ;;  %v3775_v39 = vmul.f32 %v3596_v31, %v3467_v11  ;;  %v3495_v33 = vld [vmem:[#allocation4 + $0x1b8] sm:$0xff] }
 0x574   :  { %3862 = vst [vmem:[%s7574_s4 + $0xd0] sm:$0xff] %v3774_v10  ;;  %3863 = vst.msk [vmem:[%s7574_s4 + $0xd8] sm:$0xff] %vm112_vm2, %v3775_v39  ;;  %v3464_v39 = vld [vmem:[#allocation4 + $0xc0] sm:$0xff] }
 0x575   :  { %v3606_v46 = vpop.permute.xlu0 %3605 }
 0x576   :  { %v3778_v63 = vmul.f32 %v3606_v46, %v3470_v60  ;;  %v3779_v55 = vmul.f32 %v3606_v46, %v3471_v50  ;;  %v3465_v60 = vld [vmem:[#allocation4 + $0xc8] sm:$0xff] }
 0x578   :  { %3866 = vst [vmem:[%s7574_s4 + $0xf0] sm:$0xff] %v3778_v63  ;;  %3867 = vst.msk [vmem:[%s7574_s4 + $0xf8] sm:$0xff] %vm112_vm2, %v3779_v55 }
 0x579   :  { %v3616_v58 = vpop.permute.xlu0 %3615 }
 0x57a   :  { %v3782_v42 = vmul.f32 %v3616_v58, %v3474_v29  ;;  %v3783_v59 = vmul.f32 %v3616_v58, %v3475_v9  ;;  %v2181_v48 = vpop.xlane.xlu1 %2180  ;;  %v3499_v29 = vld [vmem:[#allocation4 + $0x1d8] sm:$0xff] }
 0x57b   :  { %v2225_v7 = vadd.f32 %v2181_v48, %v2004_v16 }
 0x57c   :  { %3870 = vst [vmem:[%s7574_s4 + $0x110] sm:$0xff] %v3782_v42  ;;  %3871 = vst.msk [vmem:[%s7574_s4 + $0x118] sm:$0xff] %vm112_vm2, %v3783_v59  ;;  %v3468_v42 = vld [vmem:[#allocation4 + $0xe0] sm:$0xff]  ;;  %v3469_v59 = vld [vmem:[#allocation4 + $0xe8] sm:$0xff] }
 0x57d   :  { %2271 = vst.msk [vmem:[#allocation3 + $0x158] sm:$0x3f] %vm65_vm6, %v2225_v7  ;;  %v3626_v2 = vpop.permute.xlu0 %3625 }
 0x57e   :  { %v3786_v45 = vmul.f32 %v3626_v2, %v3478_v15  ;;  %v3787_v18 = vmul.f32 %v3626_v2, %v3479_v54  ;;  %v3551_v25 = vpop.permute.xlu1 %3550  ;;  %v3472_v54 = vld [vmem:[#allocation4 + $0x100] sm:$0xff]  ;;  %v3502_v2 = vld [vmem:[#allocation4 + $0x1f0] sm:$0xff] }
 0x57f   :  { %v3756_v22 = vmul.f32 %v3551_v25, %v3448_v1  ;;  %v3757_v40 = vmul.f32 %v3551_v25, %v3449_v44  ;;  %v3473_v1 = vld [vmem:[#allocation4 + $0x108] sm:$0xff] }
 0x580   :  { %3874 = vst [vmem:[%s7574_s4 + $0x130] sm:$0xff] %v3786_v45  ;;  %3875 = vst.msk [vmem:[%s7574_s4 + $0x138] sm:$0xff] %vm112_vm2, %v3787_v18  ;;  %v3503_v45 = vld [vmem:[#allocation4 + $0x1f8] sm:$0xff] }
 0x581   :  { %3844 = vst [vmem:[%s7574_s4 + $0x40] sm:$0xff] %v3756_v22  ;;  %3845 = vst.msk [vmem:[%s7574_s4 + $0x48] sm:$0xff] %vm112_vm2, %v3757_v40  ;;  %v3636_v5 = vpop.permute.xlu0 %3635 }
 0x582   :  { %v3790_v51 = vmul.f32 %v3636_v5, %v3482_v26  ;;  %v3791_v14 = vmul.f32 %v3636_v5, %v3483_v27  ;;  %v3561_v34 = vpop.permute.xlu1 %3560  ;;  %v3476_v27 = vld [vmem:[#allocation4 + $0x120] sm:$0xff]  ;;  %v3506_v5 = vld [vmem:[#allocation4 + $0x210] sm:$0xff] }
 0x583   :  { %v3760_v19 = vmul.f32 %v3561_v34, %v3452_v0  ;;  %v3761_v49 = vmul.f32 %v3561_v34, %v3453_v43  ;;  %v3477_v0 = vld [vmem:[#allocation4 + $0x128] sm:$0xff] }
 0x584   :  { %v3395_v57 = vld [vmem:[#allocation3 + $0x158] sm:$0x3f]  ;;  %3878 = vst [vmem:[%s7574_s4 + $0x150] sm:$0xff] %v3790_v51  ;;  %3879 = vst.msk [vmem:[%s7574_s4 + $0x158] sm:$0xff] %vm112_vm2, %v3791_v14 }
 0x585   :  { %4493 = vrcp.f32 %v3395_v57  ;;  %3848 = vst [vmem:[%s7574_s4 + $0x60] sm:$0xff] %v3760_v19  ;;  %3849 = vst.msk [vmem:[%s7574_s4 + $0x68] sm:$0xff] %vm112_vm2, %v3761_v49  ;;  %v3646_v56 = vpop.permute.xlu0 %3645  ;;  %v3507_v51 = vld [vmem:[#allocation4 + $0x218] sm:$0xff] }
 0x586   :  { %v3794_v24 = vmul.f32 %v3646_v56, %v3486_v32  ;;  %v3795_v12 = vmul.f32 %v3646_v56, %v3487_v47  ;;  %v3571_v53 = vpop.permute.xlu1 %3570  ;;  %v3480_v32 = vld [vmem:[#allocation4 + $0x140] sm:$0xff]  ;;  %v3510_v47 = vld [vmem:[#allocation4 + $0x230] sm:$0xff]  ;;  %v3511_v56 = vld [vmem:[#allocation4 + $0x238] sm:$0xff] }
 0x587   :  { %v3764_v30 = vmul.f32 %v3571_v53, %v3456_v21  ;;  %v3765_v36 = vmul.f32 %v3571_v53, %v3457_v8 }
 0x588   :  { %3882 = vst [vmem:[%s7574_s4 + $0x170] sm:$0xff] %v3794_v24  ;;  %3883 = vst.msk [vmem:[%s7574_s4 + $0x178] sm:$0xff] %vm112_vm2, %v3795_v12  ;;  %v3481_v12 = vld [vmem:[#allocation4 + $0x148] sm:$0xff] }
 0x589   :  { %3852 = vst [vmem:[%s7574_s4 + $0x80] sm:$0xff] %v3764_v30  ;;  %3853 = vst.msk [vmem:[%s7574_s4 + $0x88] sm:$0xff] %vm112_vm2, %v3765_v36  ;;  %v3656_v62 = vpop.permute.xlu0 %3655 }
 0x58a   :  { %v3798_v35 = vmul.f32 %v3656_v62, %v3490_v38  ;;  %v3799_v28 = vmul.f32 %v3656_v62, %v3491_v61  ;;  %v3581_v23 = vpop.permute.xlu1 %3580  ;;  %v3484_v38 = vld [vmem:[#allocation4 + $0x160] sm:$0xff]  ;;  %v3514_v61 = vld [vmem:[#allocation4 + $0x250] sm:$0xff]  ;;  %v3515_v62 = vld [vmem:[#allocation4 + $0x258] sm:$0xff] }
 0x58b   :  { %v3768_v3 = vmul.f32 %v3581_v23, %v3460_v52  ;;  %v3769_v6 = vmul.f32 %v3581_v23, %v3461_v20 }
 0x58c   :  { %3886 = vst [vmem:[%s7574_s4 + $0x190] sm:$0xff] %v3798_v35  ;;  %3887 = vst.msk [vmem:[%s7574_s4 + $0x198] sm:$0xff] %vm112_vm2, %v3799_v28  ;;  %v3485_v28 = vld [vmem:[#allocation4 + $0x168] sm:$0xff] }
 0x58d   :  { %3856 = vst [vmem:[%s7574_s4 + $0xa0] sm:$0xff] %v3768_v3  ;;  %3857 = vst.msk [vmem:[%s7574_s4 + $0xa8] sm:$0xff] %vm112_vm2, %v3769_v6  ;;  %v3666_v11 = vpop.permute.xlu0 %3665 }
 0x58e   :  { %v3802_v31 = vmul.f32 %v3666_v11, %v3494_v13  ;;  %v3803_v10 = vmul.f32 %v3666_v11, %v3495_v33  ;;  %v3591_v50 = vpop.permute.xlu1 %3590  ;;  %v3519_v13 = vld [vmem:[#allocation4 + $0x278] sm:$0xff]  ;;  %v3488_v11 = vld [vmem:[#allocation4 + $0x180] sm:$0xff] }
 0x58f   :  { %v4494_v46 = vpop.eup %4493  ;;  %v3772_v63 = vmul.f32 %v3591_v50, %v3464_v39  ;;  %v3773_v55 = vmul.f32 %v3591_v50, %v3465_v60  ;;  %v4495_v39 = vld [vmem:[#allocation4 + $0x270] sm:$0xff] }
 0x590   :  { %3890 = vst [vmem:[%s7574_s4 + $0x1b0] sm:$0xff] %v3802_v31  ;;  %3891 = vst.msk [vmem:[%s7574_s4 + $0x1b8] sm:$0xff] %vm112_vm2, %v3803_v10  ;;  %3745 = vperm.xlu0 %4141, %v4494_v46   ;;  %v3489_v31 = vld [vmem:[#allocation4 + $0x188] sm:$0xff] }
 0x591   :  { %3860 = vst [vmem:[%s7574_s4 + $0xc0] sm:$0xff] %v3772_v63  ;;  %3861 = vst.msk [vmem:[%s7574_s4 + $0xc8] sm:$0xff] %vm112_vm2, %v3773_v55  ;;  %v3676_v9 = vpop.permute.xlu0 %3675  ;;  %v3492_v55 = vld [vmem:[#allocation4 + $0x1a0] sm:$0xff] }
 0x592   :  { %v3806_v58 = vmul.f32 %v3676_v9, %v3498_v37  ;;  %v3807_v16 = vmul.f32 %v3676_v9, %v3499_v29  ;;  %v3601_v48 = vpop.permute.xlu1 %3600  ;;  %v3493_v37 = vld [vmem:[#allocation4 + $0x1a8] sm:$0xff] }
 0x593   :  { %v3776_v7 = vmul.f32 %v3601_v48, %v3468_v42  ;;  %v3777_v15 = vmul.f32 %v3601_v48, %v3469_v59  ;;  %v3497_v42 = vld [vmem:[#allocation4 + $0x1c8] sm:$0xff] }
 0x594   :  { %3894 = vst [vmem:[%s7574_s4 + $0x1d0] sm:$0xff] %v3806_v58  ;;  %3895 = vst.msk [vmem:[%s7574_s4 + $0x1d8] sm:$0xff] %vm112_vm2, %v3807_v16  ;;  %v3496_v16 = vld [vmem:[#allocation4 + $0x1c0] sm:$0xff] }
 0x595   :  { %3864 = vst [vmem:[%s7574_s4 + $0xe0] sm:$0xff] %v3776_v7  ;;  %3865 = vst.msk [vmem:[%s7574_s4 + $0xe8] sm:$0xff] %vm112_vm2, %v3777_v15  ;;  %v3686_v18 = vpop.permute.xlu0 %3685  ;;  %v3500_v15 = vld [vmem:[#allocation4 + $0x1e0] sm:$0xff] }
 0x596   :  { %v3611_v44 = vpop.permute.xlu1 %3610  ;;  %v3810_v25 = vmul.f32 %v3686_v18, %v3502_v2  ;;  %v3811_v22 = vmul.f32 %v3686_v18, %v3503_v45 }
 0x597   :  { %v3780_v40 = vmul.f32 %v3611_v44, %v3472_v54  ;;  %v3781_v26 = vmul.f32 %v3611_v44, %v3473_v1  ;;  %v3501_v54 = vld [vmem:[#allocation4 + $0x1e8] sm:$0xff]  ;;  %v3504_v1 = vld [vmem:[#allocation4 + $0x200] sm:$0xff] }
 0x598   :  { %3898 = vst [vmem:[%s7574_s4 + $0x1f0] sm:$0xff] %v3810_v25  ;;  %3899 = vst.msk [vmem:[%s7574_s4 + $0x1f8] sm:$0xff] %vm112_vm2, %v3811_v22  ;;  %v3505_v44 = vld [vmem:[#allocation4 + $0x208] sm:$0xff] }
 0x599   :  { %3868 = vst [vmem:[%s7574_s4 + $0x100] sm:$0xff] %v3780_v40  ;;  %3869 = vst.msk [vmem:[%s7574_s4 + $0x108] sm:$0xff] %vm112_vm2, %v3781_v26  ;;  %v3696_v14 = vpop.permute.xlu0 %3695  ;;  %v3508_v26 = vld [vmem:[#allocation4 + $0x220] sm:$0xff] }
 0x59a   :  { %v3621_v43 = vpop.permute.xlu1 %3620  ;;  %v3814_v34 = vmul.f32 %v3696_v14, %v3506_v5  ;;  %v3815_v19 = vmul.f32 %v3696_v14, %v3507_v51 }
 0x59b   :  { %v3784_v49 = vmul.f32 %v3621_v43, %v3476_v27  ;;  %v3785_v57 = vmul.f32 %v3621_v43, %v3477_v0  ;;  %v3509_v27 = vld [vmem:[#allocation4 + $0x228] sm:$0xff]  ;;  %v3512_v0 = vld [vmem:[#allocation4 + $0x240] sm:$0xff] }
 0x59c   :  { %3902 = vst [vmem:[%s7574_s4 + $0x210] sm:$0xff] %v3814_v34  ;;  %3903 = vst.msk [vmem:[%s7574_s4 + $0x218] sm:$0xff] %vm112_vm2, %v3815_v19  ;;  %v3513_v43 = vld [vmem:[#allocation4 + $0x248] sm:$0xff] }
 0x59d   :  { %3872 = vst [vmem:[%s7574_s4 + $0x120] sm:$0xff] %v3784_v49  ;;  %3873 = vst.msk [vmem:[%s7574_s4 + $0x128] sm:$0xff] %vm112_vm2, %v3785_v57  ;;  %v3516_v57 = vld [vmem:[#allocation4 + $0x260] sm:$0xff] }
 0x59e   :  { %v3706_v24 = vpop.permute.xlu0 %3705  ;;  %v3631_v21 = vpop.permute.xlu1 %3630 }
 0x59f   :  { %v3818_v8 = vmul.f32 %v3706_v24, %v3510_v47  ;;  %v3819_v53 = vmul.f32 %v3706_v24, %v3511_v56  ;;  %v3788_v30 = vmul.f32 %v3631_v21, %v3480_v32  ;;  %v3789_v36 = vmul.f32 %v3631_v21, %v3481_v12  ;;  %v3517_v32 = vld [vmem:[#allocation4 + $0x268] sm:$0xff] }
 0x5a0   :  { %v3521_v12 = vld [vmem:[#allocation4 + $0x288] sm:$0xff] }
 0x5a1   :  { %3906 = vst [vmem:[%s7574_s4 + $0x230] sm:$0xff] %v3818_v8  ;;  %3907 = vst.msk [vmem:[%s7574_s4 + $0x238] sm:$0xff] %vm112_vm2, %v3819_v53 }
 0x5a2   :  { %3876 = vst [vmem:[%s7574_s4 + $0x140] sm:$0xff] %v3788_v30  ;;  %3877 = vst.msk [vmem:[%s7574_s4 + $0x148] sm:$0xff] %vm112_vm2, %v3789_v36  ;;  %v3716_v35 = vpop.permute.xlu0 %3715  ;;  %v3641_v52 = vpop.permute.xlu1 %3640  ;;  %v3525_v30 = vld [vmem:[#allocation4 + $0x2a8] sm:$0xff] }
 0x5a3   :  { %v3822_v20 = vmul.f32 %v3716_v35, %v3514_v61  ;;  %v3823_v23 = vmul.f32 %v3716_v35, %v3515_v62  ;;  %v3792_v3 = vmul.f32 %v3641_v52, %v3484_v38  ;;  %v3793_v6 = vmul.f32 %v3641_v52, %v3485_v28  ;;  %v3527_v52 = vld [vmem:[#allocation4 + $0x2b8] sm:$0x3f] }
 0x5a5   :  { %3910 = vst [vmem:[%s7574_s4 + $0x250] sm:$0xff] %v3822_v20  ;;  %3911 = vst.msk [vmem:[%s7574_s4 + $0x258] sm:$0xff] %vm112_vm2, %v3823_v23 }
 0x5a6   :  { %3880 = vst [vmem:[%s7574_s4 + $0x160] sm:$0xff] %v3792_v3  ;;  %3881 = vst.msk [vmem:[%s7574_s4 + $0x168] sm:$0xff] %vm112_vm2, %v3793_v6  ;;  %v3726_v33 = vpop.permute.xlu0 %3725  ;;  %v3651_v10 = vpop.permute.xlu1 %3650 }
 0x5a7   :  { %v3826_v60 = vmul.f32 %v4495_v39, %v3726_v33  ;;  %v3827_v50 = vmul.f32 %v3726_v33, %v3519_v13  ;;  %v3796_v46 = vmul.f32 %v3651_v10, %v3488_v11  ;;  %v3797_v63 = vmul.f32 %v3651_v10, %v3489_v31 }
 0x5a9   :  { %3914 = vst [vmem:[%s7574_s4 + $0x270] sm:$0xff] %v3826_v60  ;;  %3915 = vst.msk [vmem:[%s7574_s4 + $0x278] sm:$0xff] %vm112_vm2, %v3827_v50 }
 0x5aa   :  { %3884 = vst [vmem:[%s7574_s4 + $0x180] sm:$0xff] %v3796_v46  ;;  %3885 = vst.msk [vmem:[%s7574_s4 + $0x188] sm:$0xff] %vm112_vm2, %v3797_v63  ;;  %v3661_v29 = vpop.permute.xlu1 %3660 }
 0x5ab   :  { %v3800_v9 = vmul.f32 %v3661_v29, %v3492_v55  ;;  %v3801_v58 = vmul.f32 %v3661_v29, %v3493_v37 }
 0x5ad   :  { %3888 = vst [vmem:[%s7574_s4 + $0x1a0] sm:$0xff] %v3800_v9  ;;  %3889 = vst.msk [vmem:[%s7574_s4 + $0x1a8] sm:$0xff] %vm112_vm2, %v3801_v58 }
 0x5ae   :  { %v3671_v59 = vpop.permute.xlu1 %3670 }
 0x5af   :  { %v3804_v48 = vmul.f32 %v3671_v59, %v3496_v16  ;;  %v3805_v7 = vmul.f32 %v3671_v59, %v3497_v42 }
 0x5b1   :  { %3892 = vst [vmem:[%s7574_s4 + $0x1c0] sm:$0xff] %v3804_v48  ;;  %3893 = vst.msk [vmem:[%s7574_s4 + $0x1c8] sm:$0xff] %vm112_vm2, %v3805_v7 }
 0x5b2   :  { %v3681_v2 = vpop.permute.xlu1 %3680 }
 0x5b3   :  { %v3808_v45 = vmul.f32 %v3681_v2, %v3500_v15  ;;  %v3809_v18 = vmul.f32 %v3681_v2, %v3501_v54 }
 0x5b5   :  { %3896 = vst [vmem:[%s7574_s4 + $0x1e0] sm:$0xff] %v3808_v45  ;;  %3897 = vst.msk [vmem:[%s7574_s4 + $0x1e8] sm:$0xff] %vm112_vm2, %v3809_v18 }
 0x5b6   :  { %v3691_v25 = vpop.permute.xlu1 %3690 }
 0x5b7   :  { %v3812_v22 = vmul.f32 %v3691_v25, %v3504_v1  ;;  %v3813_v40 = vmul.f32 %v3691_v25, %v3505_v44 }
 0x5b9   :  { %3900 = vst [vmem:[%s7574_s4 + $0x200] sm:$0xff] %v3812_v22  ;;  %3901 = vst.msk [vmem:[%s7574_s4 + $0x208] sm:$0xff] %vm112_vm2, %v3813_v40 }
 0x5ba   :  { %v3701_v5 = vpop.permute.xlu1 %3700 }
 0x5bb   :  { %v3816_v51 = vmul.f32 %v3701_v5, %v3508_v26  ;;  %v3817_v14 = vmul.f32 %v3701_v5, %v3509_v27 }
 0x5bd   :  { %3904 = vst [vmem:[%s7574_s4 + $0x220] sm:$0xff] %v3816_v51  ;;  %3905 = vst.msk [vmem:[%s7574_s4 + $0x228] sm:$0xff] %vm112_vm2, %v3817_v14 }
 0x5be   :  { %v3711_v34 = vpop.permute.xlu1 %3710 }
 0x5bf   :  { %v3820_v19 = vmul.f32 %v3711_v34, %v3512_v0  ;;  %v3821_v49 = vmul.f32 %v3711_v34, %v3513_v43 }
 0x5c1   :  { %3908 = vst [vmem:[%s7574_s4 + $0x240] sm:$0xff] %v3820_v19  ;;  %3909 = vst.msk [vmem:[%s7574_s4 + $0x248] sm:$0xff] %vm112_vm2, %v3821_v49 }
 0x5c2   :  { %v3721_v47 = vpop.permute.xlu1 %3720 }
 0x5c3   :  { %v3824_v56 = vmul.f32 %v3721_v47, %v3516_v57  ;;  %v3825_v24 = vmul.f32 %v3721_v47, %v3517_v32 }
 0x5c5   :  { %3912 = vst [vmem:[%s7574_s4 + $0x260] sm:$0xff] %v3824_v56  ;;  %3913 = vst.msk [vmem:[%s7574_s4 + $0x268] sm:$0xff] %vm112_vm2, %v3825_v24 }
 0x5c6   :  { %v3731_v21 = vpop.permute.xlu1 %3730 }
 0x5c7   :  { %v3828_v8 = vmul.f32 %v3731_v21, %v7223_v17  ;;  %v3829_v53 = vmul.f32 %v3731_v21, %v3521_v12  ;;  %v3523_v17 = vld [vmem:[#allocation4 + $0x298] sm:$0xff] }
 0x5c9   :  { %3916 = vst [vmem:[%s7574_s4 + $0x280] sm:$0xff] %v3828_v8  ;;  %3917 = vst.msk [vmem:[%s7574_s4 + $0x288] sm:$0xff] %vm112_vm2, %v3829_v53 }
 0x5ca   :  { %v3741_v36 = vpop.permute.xlu1 %3740 }
 0x5cb   :  { %v3832_v38 = vmul.f32 %v3741_v36, %v7284_v4  ;;  %v3833_v61 = vmul.f32 %v3741_v36, %v3525_v30  ;;  %v3526_v4 = vld [vmem:[#allocation4 + $0x2b0] sm:$0x3f] }
 0x5cd   :  { %3920 = vst [vmem:[%s7574_s4 + $0x2a0] sm:$0xff] %v3832_v38  ;;  %3921 = vst.msk [vmem:[%s7574_s4 + $0x2a8] sm:$0xff] %vm112_vm2, %v3833_v61 }
 0x5da   :  { %v3736_v62 = vpop.permute.xlu0 %3735 }
 0x5db   :  { %v3830_v35 = vmul.f32 %v3736_v62, %v7230_v41  ;;  %v3831_v28 = vmul.f32 %v3736_v62, %v3523_v17 }
 0x5dd   :  { %3918 = vst [vmem:[%s7574_s4 + $0x290] sm:$0xff] %v3830_v35  ;;  %3919 = vst.msk [vmem:[%s7574_s4 + $0x298] sm:$0xff] %vm112_vm2, %v3831_v28 }
 0x60f   :  { %v3746_v20 = vpop.permute.xlu0 %3745 }
 0x610   :  { %v3834_v23 = vmul.f32 %v3746_v20, %v3526_v4  ;;  %v3835_v3 = vmul.f32 %v3746_v20, %v3527_v52 }
 0x612   :  { %3922 = vst [vmem:[%s7574_s4 + $0x2b0] sm:$0x3f] %v3834_v23  ;;  %3923 = vst.msk [vmem:[%s7574_s4 + $0x2b8] sm:$0x3f] %vm199_vm4, %v3835_v3 }

</bundles_post_ra>
